<compile_context>
chip_gen: v5e
topology: v5e:2x2
jax: 0.10.0
libtpu: 0.0.40
codegen_flags: <defaults>
</compile_context>

<pallas_src>
import jax
import jax.numpy as jnp
from jax.experimental import pallas as pl
from jax.experimental.pallas import tpu as pltpu


def _round_up(x, m):
    return ((x + m - 1) // m) * m


# ----------------------------- Pallas kernel --------------------------------


def uada_fused_kernel(x_ref, wf_ref, bf_ref,
                      w1_ref, b1_ref, w2_ref, b2_ref, w3_ref, b3_ref,
                      out_ref):
    """Fused GAP + FE projection stand-in + three packed MLP heads.

    x_ref  : (Bt, Cp, S)       f32  raw activations (pooled in f32 here)
    wf_ref : (Cp, FEAT)        f32  FE projection stand-in (tiny K, kept f32)
    w1_ref : (FEAT, 3*BN)      bf16 layer-1 of all heads, concatenated
    w2_ref : (3, BN, WIDTH)    bf16 layer-2 per head (no zero block-diagonal)
    w3_ref : (3*WIDTH, OUTP)   bf16 layer-3, heads placed in 128-lane slab
    out_ref: (Bt, FEAT+OUTP)   f32  [ feature | class | dis | adv | pad ]
    Dropout layers are identity at inference.
    """
    feat_dim = wf_ref.shape[1]
    n_heads, bn_dim, _ = w2_ref.shape

    # Global-average-pool over the spatial axis, in f32 (matches reference
    # semantics: pool first, then project).
    pooled = jnp.mean(x_ref[...], axis=-1)                        # (Bt, Cp) f32

    # FE projection stand-in (tiny K -> negligible MXU work, keep f32).
    feat = jnp.dot(pooled, wf_ref[...],
                   preferred_element_type=jnp.float32) + bf_ref[...]
    out_ref[:, :feat_dim] = feat                                   # 256-aligned

    # Layer 1: one wide matmul for all three heads.
    h1 = jnp.dot(feat.astype(jnp.bfloat16), w1_ref[...],
                 preferred_element_type=jnp.float32) + b1_ref[...]
    h1 = jnp.maximum(h1, 0.0)                                      # (Bt, 3*BN)

    # Layer 2: per-head dots on lane-aligned slices (no zero-padding FLOPs).
    parts = []
    for h in range(n_heads):
        hi = h1[:, h * bn_dim:(h + 1) * bn_dim].astype(jnp.bfloat16)
        parts.append(jnp.dot(hi, w2_ref[h],
                             preferred_element_type=jnp.float32))
    h2 = jnp.concatenate(parts, axis=-1) + b2_ref[...]             # (Bt, 3*W)
    h2 = jnp.maximum(h2, 0.0)

    # Layer 3: one lane-dense slab -> unmasked 128-aligned stores.
    out_ref[:, feat_dim:] = (
        jnp.dot(h2.astype(jnp.bfloat16), w3_ref[...],
                preferred_element_type=jnp.float32) + b3_ref[...])


# ------------------------------ param packing --------------------------------


def init_head_params(key, in_dim, bn_dim, width, out_dim):
    """Matches PyTorch init: weight ~ N(0, 0.015), bias = 0.  Weights stored
    pre-transposed as (in, out)."""
    k1, k2, k3 = jax.random.split(key, 3)
    w1 = 0.015 * jax.random.normal(k1, (in_dim, bn_dim), jnp.float32)
    b1 = jnp.zeros((1, bn_dim), jnp.float32)
    w2 = 0.015 * jax.random.normal(k2, (bn_dim, width), jnp.float32)
    b2 = jnp.zeros((1, width), jnp.float32)
    w3 = 0.015 * jax.random.normal(k3, (width, out_dim), jnp.float32)
    b3 = jnp.zeros((1, out_dim), jnp.float32)
    return (w1, b1, w2, b2, w3, b3)


def pack_uada_params(fe_params, class_params, dis_params, adv_params):
    """Build fused / packed weights (bf16 matmul operands, f32 biases)."""
    wf, bf = fe_params
    C, FEAT = wf.shape
    c_pad = _round_up(C, 8)                        # sublane-full pooled vector
    wf_pad = jnp.zeros((c_pad, FEAT), jnp.float32).at[:C, :].set(wf)

    heads = (class_params, dis_params, adv_params)
    bn_dims = [p[0].shape[1] for p in heads]
    widths = [p[2].shape[1] for p in heads]
    out_dims = [p[4].shape[1] for p in heads]
    assert len(set(bn_dims)) == 1 and len(set(widths)) == 1, \
        "UADAnet heads share bn_dim / width"
    BN, WD = bn_dims[0], widths[0]

    # Layer 1: one wide matmul (FEAT, 3*BN).
    w1_cat = jnp.concatenate([p[0] for p in heads], axis=1)
    b1_cat = jnp.concatenate([p[1] for p in heads], axis=1)

    # Layer 2: stacked per-head weights (3, BN, WIDTH) — no zero padding.
    w2_stk = jnp.stack([p[2] for p in heads], axis=0)
    b2_cat = jnp.concatenate([p[3] for p in heads], axis=1)

    # Layer 3: each head's block placed into a lane-padded (>=128) slab.
    total_out = sum(out_dims)
    out_pad = _round_up(total_out, 128)
    w3_cat = jnp.zeros((3 * WD, out_pad), jnp.float32)
    b3_cat = jnp.zeros((1, out_pad), jnp.float32)
    r = c = 0
    for p, od in zip(heads, out_dims):
        w3_cat = w3_cat.at[r:r + WD, c:c + od].set(p[4])
        b3_cat = b3_cat.at[:, c:c + od].set(p[5])
        r += WD
        c += od

    packed = dict(
        wf=wf_pad, bf=bf.astype(jnp.float32),
        w1=w1_cat.astype(jnp.bfloat16), b1=b1_cat.astype(jnp.float32),
        w2=w2_stk.astype(jnp.bfloat16), b2=b2_cat.astype(jnp.float32),
        w3=w3_cat.astype(jnp.bfloat16), b3=b3_cat.astype(jnp.float32),
    )
    splits = (out_dims[0], out_dims[0] + out_dims[1], total_out)
    return packed, splits


# ------------------------------ forward wrapper -------------------------------


def _chip_tuning():
    """Per-chip batch-tile cap and TensorCore count (conservative fallback)."""
    tile_max, n_tc = 128, 1
    try:
        kind = jax.devices()[0].device_kind.lower()
        if "v5e" in kind or "v5 lite" in kind or "v5lite" in kind:
            tile_max, n_tc = 128, 1        # 128-wide MXU, single TC
        elif "v7" in kind:
            tile_max, n_tc = 256, 2        # dual TensorCore, 64 MiB VMEM
        elif "v6" in kind:
            tile_max, n_tc = 256, 1        # 256-wide MXU in M
        elif "v5p" in kind or "v4" in kind:
            tile_max, n_tc = 256, 2        # megacore
    except Exception:
        pass
    return tile_max, n_tc


def _build_call(x_shape, packed, b_tile, grid, out_cols,
                single_buffer_weights, cost, vmem_limit):
    cp, spatial = x_shape[1], x_shape[2]

    def weight_spec(a):
        nd = a.ndim
        kwargs = {}
        if single_buffer_weights:
            # Constant-index blocks are fetched once -> no double buffering.
            kwargs["pipeline_mode"] = pl.Buffered(1)
        return pl.BlockSpec(a.shape, lambda i, nd=nd: (0,) * nd, **kwargs)

    in_specs = [pl.BlockSpec((b_tile, cp, spatial), lambda i: (i, 0, 0))] + [
        weight_spec(packed[k])
        for k in ("wf", "bf", "w1", "b1", "w2", "b2", "w3", "b3")]

    return pl.pallas_call(
        uada_fused_kernel,
        out_shape=jax.ShapeDtypeStruct((x_shape[0], out_cols), jnp.float32),
        grid=grid,
        in_specs=in_specs,
        out_specs=pl.BlockSpec((b_tile, out_cols), lambda i: (i, 0)),
        compiler_params=pltpu.CompilerParams(
            dimension_semantics=("parallel",),
            vmem_limit_bytes=vmem_limit),
        cost_estimate=cost,
    )


def uada_forward(x_nchw, packed, splits):
    B, C, H, W = x_nchw.shape
    S = H * W
    Cp, FEAT = packed["wf"].shape
    bn3 = packed["w1"].shape[1]
    w3_rows, out_pad = packed["w3"].shape
    out_cols = FEAT + out_pad

    # Chip-tuned batch tiling.
    tile_max, n_tc = _chip_tuning()
    b_tile = min(tile_max, _round_up(B, 16))
    if n_tc >= 2 and B >= 32:
        # Ensure >=2 grid steps so the "parallel" axis feeds both TensorCores.
        b_tile = min(b_tile, max(16, _round_up((B + 1) // 2, 16)))
    b_pad = _round_up(B, b_tile)
    grid = (b_pad // b_tile,)

    # Keep x in f32 so the in-kernel GAP matches the reference exactly.
    x3 = x_nchw.reshape(B, C, S).astype(jnp.float32)
    x3 = jnp.pad(x3, ((0, b_pad - B), (0, Cp - C), (0, 0)))

    # Cost / VMEM bookkeeping.
    flops = (2 * b_pad * (Cp * FEAT + FEAT * bn3
                          + bn3 * (w3_rows // 3)       # per-head layer-2 dots
                          + w3_rows * out_pad)
             + b_pad * Cp * S)                          # pooling adds
    weight_bytes = sum(int(packed[k].size) * packed[k].dtype.itemsize
                       for k in packed)
    bytes_accessed = int(x3.size * 4 + weight_bytes + b_pad * out_cols * 4)
    cost = pl.CostEstimate(flops=int(flops), transcendentals=0,
                           bytes_accessed=bytes_accessed)

    tile_bytes = b_tile * (Cp * S * 4 + out_cols * 4)   # x + out tiles
    vmem_est = 2 * tile_bytes + 2 * weight_bytes + (1 << 20)
    vmem_limit = int(min(64 << 20, max(32 << 20, 2 * vmem_est)))

    args = (x3, packed["wf"], packed["bf"], packed["w1"], packed["b1"],
            packed["w2"], packed["b2"], packed["w3"], packed["b3"])
    try:
        slab = _build_call(x3.shape, packed, b_tile, grid, out_cols,
                           True, cost, vmem_limit)(*args)
    except Exception:
        # Fallback: default (double) buffering if Buffered(1) is unsupported
        # by the installed JAX version.
        slab = _build_call(x3.shape, packed, b_tile, grid, out_cols,
                           False, cost, vmem_limit)(*args)

    s1, s2, s3 = splits
    feature = slab[:B, :FEAT]
    class_out = slab[:B, FEAT:FEAT + s1]
    dis_out = slab[:B, FEAT + s1:FEAT + s2]
    adv_out = slab[:B, FEAT + s2:FEAT + s3]
    return feature, class_out, dis_out, adv_out


# ------------------------------ references -----------------------------------


def _ref_forward_f32(x, fe_params, class_params, dis_params, adv_params):
    """Original (unfused, f32) semantics: GAP -> proj, three MLP heads."""
    wf, bf = fe_params
    B, C, H, W = x.shape
    pooled = jnp.mean(x.reshape(B, C, H * W), axis=-1)
    feature = pooled @ wf + bf

    def head(f, p):
        w1, b1, w2, b2, w3, b3 = p
        h = jnp.maximum(f @ w1 + b1, 0.0)
        h = jnp.maximum(h @ w2 + b2, 0.0)
        return h @ w3 + b3

    return (feature, head(feature, class_params), head(feature, dis_params),
            head(feature, adv_params))


def _ref_forward_packed(x, packed, splits):
    """Pure-JAX mirror of the exact packed kernel math (tight check)."""
    B, C, H, W = x.shape
    Cp, FEAT = packed["wf"].shape
    pooled = jnp.mean(x.reshape(B, C, H * W).astype(jnp.float32), axis=-1)
    pooled = jnp.pad(pooled, ((0, 0), (0, Cp - C)))

    def mm(a, w):
        return jnp.dot(a, w, preferred_element_type=jnp.float32)

    feat = jnp.dot(pooled, packed["wf"], preferred_element_type=jnp.float32,
                   precision=jax.lax.Precision.HIGHEST) + packed["bf"]
    h1 = jnp.maximum(mm(feat.astype(jnp.bfloat16), packed["w1"])
                     + packed["b1"], 0.0)
    n_heads, BN, _ = packed["w2"].shape
    parts = [mm(h1[:, i * BN:(i + 1) * BN].astype(jnp.bfloat16),
                packed["w2"][i]) for i in range(n_heads)]
    h2 = jnp.maximum(jnp.concatenate(parts, -1) + packed["b2"], 0.0)
    slab = mm(h2.astype(jnp.bfloat16), packed["w3"]) + packed["b3"]
    s1, s2, s3 = splits
    return feat, slab[:, :s1], slab[:, s1:s2], slab[:, s2:s3]


# --------------------------------- main ---------------------------------------

if __name__ == "__main__":
    # Small shapes consistent with the module's constructor arguments.
    B, C, H, W = 2, 4, 16, 16     # input image NCHW
    FEAT = 256                    # FE_network.output_num() stand-in
    BN_DIM = 256                  # bn_dim
    WIDTH = 256                   # width
    NUM_CLASS = 16                # num_class (dis head outputs num_class*2)

    key = jax.random.PRNGKey(0)
    kx, kf, kc, kd, ka = jax.random.split(key, 5)

    x = jax.random.normal(kx, (B, C, H, W), jnp.float32)

    # Stand-in FE projection params (GAP + linear).
    wf = 0.05 * jax.random.normal(kf, (C, FEAT), jnp.float32)
    bf = jnp.zeros((1, FEAT), jnp.float32)
    fe_params = (wf, bf)

    class_params = init_head_params(kc, FEAT, BN_DIM, WIDTH, NUM_CLASS)
    dis_params = init_head_params(kd, FEAT, BN_DIM, WIDTH, NUM_CLASS * 2)
    adv_params = init_head_params(ka, FEAT, BN_DIM, WIDTH, NUM_CLASS)

    packed, splits = pack_uada_params(fe_params, class_params, dis_params,
                                      adv_params)

    outs = uada_forward(x, packed, splits)
    jax.block_until_ready(outs)
    feature, class_out, dis_out, adv_out = outs

    assert feature.shape == (B, FEAT)
    assert class_out.shape == (B, NUM_CLASS)
    assert dis_out.shape == (B, NUM_CLASS * 2)
    assert adv_out.shape == (B, NUM_CLASS)

    # Tight check vs a pure-JAX version of the exact packed math.
    ref_p = _ref_forward_packed(x, packed, splits)
    for got, want in zip(outs, ref_p):
        assert jnp.allclose(got, want, atol=2e-4, rtol=1e-2), \
            "packed-ref mismatch"

    # Loose check vs the original f32 (pool-then-project, unfused) semantics;
    # bf16 head-operand rounding bounds the discrepancy.
    ref_f = _ref_forward_f32(x, fe_params, class_params, dis_params, adv_params)
    for got, want in zip(outs, ref_f):
        scale = float(jnp.max(jnp.abs(want))) + 1e-12
        rel = float(jnp.max(jnp.abs(got - want))) / scale
        assert rel < 5e-2, f"f32-ref relative error too large: {rel}"

    print("KERNEL_OK")
</pallas_src>

<mosaic_0001>
module attributes {stable_mosaic.version = 11 : i64} {
  func.func @uada_fused_kernel(%arg0: i32, %arg1: memref<16x8x256xf32, #tpu.memory_space<vmem>>, %arg2: memref<8x256xf32, #tpu.memory_space<vmem>>, %arg3: memref<1x256xf32, #tpu.memory_space<vmem>>, %arg4: memref<256x768xbf16, #tpu.memory_space<vmem>>, %arg5: memref<1x768xf32, #tpu.memory_space<vmem>>, %arg6: memref<3x256x256xbf16, #tpu.memory_space<vmem>>, %arg7: memref<1x768xf32, #tpu.memory_space<vmem>>, %arg8: memref<768x128xbf16, #tpu.memory_space<vmem>>, %arg9: memref<1x128xf32, #tpu.memory_space<vmem>>, %arg10: memref<16x384xf32, #tpu.memory_space<vmem>>) attributes {dimension_semantics = [#tpu.dimension_semantics<parallel>], iteration_bounds = array<i64: 1>, scalar_prefetch = 0 : i64, scratch_operands = 0 : i64, tpu.core_type = #tpu.core_type<tc>, window_params = [{transform_indices = @transform_0, window_bounds = array<i64: 16, 8, 256>}, {pipeline_mode = #tpu.pipeline_mode<synchronous>, transform_indices = @transform_1, window_bounds = array<i64: 8, 256>}, {pipeline_mode = #tpu.pipeline_mode<synchronous>, transform_indices = @transform_2, window_bounds = array<i64: 1, 256>}, {pipeline_mode = #tpu.pipeline_mode<synchronous>, transform_indices = @transform_3, window_bounds = array<i64: 256, 768>}, {pipeline_mode = #tpu.pipeline_mode<synchronous>, transform_indices = @transform_4, window_bounds = array<i64: 1, 768>}, {pipeline_mode = #tpu.pipeline_mode<synchronous>, transform_indices = @transform_5, window_bounds = array<i64: 3, 256, 256>}, {pipeline_mode = #tpu.pipeline_mode<synchronous>, transform_indices = @transform_6, window_bounds = array<i64: 1, 768>}, {pipeline_mode = #tpu.pipeline_mode<synchronous>, transform_indices = @transform_7, window_bounds = array<i64: 768, 128>}, {pipeline_mode = #tpu.pipeline_mode<synchronous>, transform_indices = @transform_8, window_bounds = array<i64: 1, 128>}, {transform_indices = @transform_9, window_bounds = array<i64: 16, 384>}]} {
    %c0 = arith.constant 0 : index
    %c0_0 = arith.constant 0 : index
    %c0_1 = arith.constant 0 : index
    %0 = vector.load %arg1[%c0, %c0_0, %c0_1] : memref<16x8x256xf32, #tpu.memory_space<vmem>>, vector<16x8x256xf32>
    %cst = arith.constant dense<0.000000e+00> : vector<16x8xf32>
    %1 = vector.multi_reduction <add>, %0, %cst [2] : vector<16x8x256xf32> to vector<16x8xf32>
    %cst_2 = arith.constant 2.560000e+02 : f32
    %2 = vector.broadcast %cst_2 : f32 to vector<16x8xf32>
    %3 = arith.divf %1, %2 : vector<16x8xf32>
    %c0_3 = arith.constant 0 : index
    %c0_4 = arith.constant 0 : index
    %4 = vector.load %arg2[%c0_3, %c0_4] : memref<8x256xf32, #tpu.memory_space<vmem>>, vector<8x256xf32>
    %cst_5 = arith.constant dense<0.000000e+00> : vector<16x256xf32>
    %5 = tpu.matmul %3, %4, %cst_5 {dimension_numbers = #tpu.dot_dimension_numbers<[1], [0], [0], [1], [0, 0, 1, 1], [], []>} : vector<16x8xf32>, vector<8x256xf32>, vector<16x256xf32> -> vector<16x256xf32>
    %c0_6 = arith.constant 0 : index
    %c0_7 = arith.constant 0 : index
    %6 = vector.load %arg3[%c0_6, %c0_7] : memref<1x256xf32, #tpu.memory_space<vmem>>, vector<1x256xf32>
    %7 = vector.broadcast %6 : vector<1x256xf32> to vector<16x256xf32>
    %8 = arith.addf %5, %7 : vector<16x256xf32>
    %c0_8 = arith.constant 0 : index
    %c0_9 = arith.constant 0 : index
    %9 = vector.load %arg10[%c0_8, %c0_9] : memref<16x384xf32, #tpu.memory_space<vmem>>, vector<16x256xf32>
    tpu.vector_store %arg10[%c0_8, %c0_9], %8 {strides = array<i32>} : memref<16x384xf32, #tpu.memory_space<vmem>>, vector<16x256xf32>,
    %10 = arith.truncf %8 : vector<16x256xf32> to vector<16x256xbf16>
    %c0_10 = arith.constant 0 : index
    %c0_11 = arith.constant 0 : index
    %11 = vector.load %arg4[%c0_10, %c0_11] : memref<256x768xbf16, #tpu.memory_space<vmem>>, vector<256x768xbf16>
    %cst_12 = arith.constant dense<0.000000e+00> : vector<16x768xf32>
    %12 = tpu.matmul %10, %11, %cst_12 {dimension_numbers = #tpu.dot_dimension_numbers<[1], [0], [0], [1], [0, 0, 1, 1], [], []>} : vector<16x256xbf16>, vector<256x768xbf16>, vector<16x768xf32> -> vector<16x768xf32>
    %c0_13 = arith.constant 0 : index
    %c0_14 = arith.constant 0 : index
    %13 = vector.load %arg5[%c0_13, %c0_14] : memref<1x768xf32, #tpu.memory_space<vmem>>, vector<1x768xf32>
    %14 = vector.broadcast %13 : vector<1x768xf32> to vector<16x768xf32>
    %15 = arith.addf %12, %14 : vector<16x768xf32>
    %cst_15 = arith.constant 0.000000e+00 : f32
    %16 = vector.broadcast %cst_15 : f32 to vector<16x768xf32>
    %17 = arith.maximumf %15, %16 : vector<16x768xf32>
    %18 = vector.extract_strided_slice %17 {offsets = [0, 0], sizes = [16, 256], strides = [1, 1]} : vector<16x768xf32> to vector<16x256xf32>
    %19 = arith.truncf %18 : vector<16x256xf32> to vector<16x256xbf16>
    %c0_16 = arith.constant 0 : index
    %c0_17 = arith.constant 0 : index
    %c0_18 = arith.constant 0 : index
    %20 = vector.load %arg6[%c0_16, %c0_17, %c0_18] : memref<3x256x256xbf16, #tpu.memory_space<vmem>>, vector<1x256x256xbf16>
    %21 = vector.shape_cast %20 : vector<1x256x256xbf16> to vector<256x256xbf16>
    %cst_19 = arith.constant dense<0.000000e+00> : vector<16x256xf32>
    %22 = tpu.matmul %19, %21, %cst_19 {dimension_numbers = #tpu.dot_dimension_numbers<[1], [0], [0], [1], [0, 0, 1, 1], [], []>} : vector<16x256xbf16>, vector<256x256xbf16>, vector<16x256xf32> -> vector<16x256xf32>
    %23 = vector.extract_strided_slice %17 {offsets = [0, 256], sizes = [16, 256], strides = [1, 1]} : vector<16x768xf32> to vector<16x256xf32>
    %24 = arith.truncf %23 : vector<16x256xf32> to vector<16x256xbf16>
    %c1 = arith.constant 1 : index
    %c0_20 = arith.constant 0 : index
    %c0_21 = arith.constant 0 : index
    %25 = vector.load %arg6[%c1, %c0_20, %c0_21] : memref<3x256x256xbf16, #tpu.memory_space<vmem>>, vector<1x256x256xbf16>
    %26 = vector.shape_cast %25 : vector<1x256x256xbf16> to vector<256x256xbf16>
    %cst_22 = arith.constant dense<0.000000e+00> : vector<16x256xf32>
    %27 = tpu.matmul %24, %26, %cst_22 {dimension_numbers = #tpu.dot_dimension_numbers<[1], [0], [0], [1], [0, 0, 1, 1], [], []>} : vector<16x256xbf16>, vector<256x256xbf16>, vector<16x256xf32> -> vector<16x256xf32>
    %28 = vector.extract_strided_slice %17 {offsets = [0, 512], sizes = [16, 256], strides = [1, 1]} : vector<16x768xf32> to vector<16x256xf32>
    %29 = arith.truncf %28 : vector<16x256xf32> to vector<16x256xbf16>
    %c2 = arith.constant 2 : index
    %c0_23 = arith.constant 0 : index
    %c0_24 = arith.constant 0 : index
    %30 = vector.load %arg6[%c2, %c0_23, %c0_24] : memref<3x256x256xbf16, #tpu.memory_space<vmem>>, vector<1x256x256xbf16>
    %31 = vector.shape_cast %30 : vector<1x256x256xbf16> to vector<256x256xbf16>
    %cst_25 = arith.constant dense<0.000000e+00> : vector<16x256xf32>
    %32 = tpu.matmul %29, %31, %cst_25 {dimension_numbers = #tpu.dot_dimension_numbers<[1], [0], [0], [1], [0, 0, 1, 1], [], []>} : vector<16x256xbf16>, vector<256x256xbf16>, vector<16x256xf32> -> vector<16x256xf32>
    %33 = tpu.concatenate %22, %27, %32 in 1 : vector<16x256xf32>, vector<16x256xf32>, vector<16x256xf32> -> vector<16x768xf32>
    %c0_26 = arith.constant 0 : index
    %c0_27 = arith.constant 0 : index
    %34 = vector.load %arg7[%c0_26, %c0_27] : memref<1x768xf32, #tpu.memory_space<vmem>>, vector<1x768xf32>
    %35 = vector.broadcast %34 : vector<1x768xf32> to vector<16x768xf32>
    %36 = arith.addf %33, %35 : vector<16x768xf32>
    %cst_28 = arith.constant 0.000000e+00 : f32
    %37 = vector.broadcast %cst_28 : f32 to vector<16x768xf32>
    %38 = arith.maximumf %36, %37 : vector<16x768xf32>
    %39 = arith.truncf %38 : vector<16x768xf32> to vector<16x768xbf16>
    %c0_29 = arith.constant 0 : index
    %c0_30 = arith.constant 0 : index
    %40 = vector.load %arg8[%c0_29, %c0_30] : memref<768x128xbf16, #tpu.memory_space<vmem>>, vector<768x128xbf16>
    %cst_31 = arith.constant dense<0.000000e+00> : vector<16x128xf32>
    %41 = tpu.matmul %39, %40, %cst_31 {dimension_numbers = #tpu.dot_dimension_numbers<[1], [0], [0], [1], [0, 0, 1, 1], [], []>} : vector<16x768xbf16>, vector<768x128xbf16>, vector<16x128xf32> -> vector<16x128xf32>
    %c0_32 = arith.constant 0 : index
    %c0_33 = arith.constant 0 : index
    %42 = vector.load %arg9[%c0_32, %c0_33] : memref<1x128xf32, #tpu.memory_space<vmem>>, vector<1x128xf32>
    %43 = vector.broadcast %42 : vector<1x128xf32> to vector<16x128xf32>
    %44 = arith.addf %41, %43 : vector<16x128xf32>
    %c0_34 = arith.constant 0 : index
    %c256 = arith.constant 256 : index
    %45 = vector.load %arg10[%c0_34, %c256] : memref<16x384xf32, #tpu.memory_space<vmem>>, vector<16x128xf32>
    tpu.vector_store %arg10[%c0_34, %c256], %44 {strides = array<i32>} : memref<16x384xf32, #tpu.memory_space<vmem>>, vector<16x128xf32>,
    return
  }
  func.func @transform_0(%arg0: i32) -> (i32, i32, i32) {
    %c0_i32 = arith.constant 0 : i32
    %c0_i32_0 = arith.constant 0 : i32
    %c0_i32_1 = arith.constant 0 : i32
    return %arg0, %c0_i32, %c0_i32_0 : i32, i32, i32
  }
  func.func @transform_1(%arg0: i32) -> (i32, i32) {
    %c0_i32 = arith.constant 0 : i32
    %c0_i32_0 = arith.constant 0 : i32
    %c0_i32_1 = arith.constant 0 : i32
    return %c0_i32, %c0_i32_0 : i32, i32
  }
  func.func @transform_2(%arg0: i32) -> (i32, i32) {
    %c0_i32 = arith.constant 0 : i32
    %c0_i32_0 = arith.constant 0 : i32
    %c0_i32_1 = arith.constant 0 : i32
    return %c0_i32, %c0_i32_0 : i32, i32
  }
  func.func @transform_3(%arg0: i32) -> (i32, i32) {
    %c0_i32 = arith.constant 0 : i32
    %c0_i32_0 = arith.constant 0 : i32
    %c0_i32_1 = arith.constant 0 : i32
    return %c0_i32, %c0_i32_0 : i32, i32
  }
  func.func @transform_4(%arg0: i32) -> (i32, i32) {
    %c0_i32 = arith.constant 0 : i32
    %c0_i32_0 = arith.constant 0 : i32
    %c0_i32_1 = arith.constant 0 : i32
    return %c0_i32, %c0_i32_0 : i32, i32
  }
  func.func @transform_5(%arg0: i32) -> (i32, i32, i32) {
    %c0_i32 = arith.constant 0 : i32
    %c0_i32_0 = arith.constant 0 : i32
    %c0_i32_1 = arith.constant 0 : i32
    %c0_i32_2 = arith.constant 0 : i32
    return %c0_i32, %c0_i32_0, %c0_i32_1 : i32, i32, i32
  }
  func.func @transform_6(%arg0: i32) -> (i32, i32) {
    %c0_i32 = arith.constant 0 : i32
    %c0_i32_0 = arith.constant 0 : i32
    %c0_i32_1 = arith.constant 0 : i32
    return %c0_i32, %c0_i32_0 : i32, i32
  }
  func.func @transform_7(%arg0: i32) -> (i32, i32) {
    %c0_i32 = arith.constant 0 : i32
    %c0_i32_0 = arith.constant 0 : i32
    %c0_i32_1 = arith.constant 0 : i32
    return %c0_i32, %c0_i32_0 : i32, i32
  }
  func.func @transform_8(%arg0: i32) -> (i32, i32) {
    %c0_i32 = arith.constant 0 : i32
    %c0_i32_0 = arith.constant 0 : i32
    %c0_i32_1 = arith.constant 0 : i32
    return %c0_i32, %c0_i32_0 : i32, i32
  }
  func.func @transform_9(%arg0: i32) -> (i32, i32) {
    %c0_i32 = arith.constant 0 : i32
    %c0_i32_0 = arith.constant 0 : i32
    return %arg0, %c0_i32 : i32, i32
  }
}

module attributes {stable_mosaic.version = 11 : i64} {
  func.func @uada_fused_kernel(%arg0: i32, %arg1: memref<16x8x256xf32, #tpu.memory_space<vmem>>, %arg2: memref<8x256xf32, #tpu.memory_space<vmem>>, %arg3: memref<1x256xf32, #tpu.memory_space<vmem>>, %arg4: memref<256x768xbf16, #tpu.memory_space<vmem>>, %arg5: memref<1x768xf32, #tpu.memory_space<vmem>>, %arg6: memref<3x256x256xbf16, #tpu.memory_space<vmem>>, %arg7: memref<1x768xf32, #tpu.memory_space<vmem>>, %arg8: memref<768x128xbf16, #tpu.memory_space<vmem>>, %arg9: memref<1x128xf32, #tpu.memory_space<vmem>>, %arg10: memref<16x384xf32, #tpu.memory_space<vmem>>) attributes {dimension_semantics = [#tpu.dimension_semantics<parallel>], iteration_bounds = array<i64: 1>, scalar_prefetch = 0 : i64, scratch_operands = 0 : i64, tpu.core_type = #tpu.core_type<tc>, window_params = [{transform_indices = @transform_0, window_bounds = array<i64: 16, 8, 256>}, {pipeline_mode = #tpu.pipeline_mode<synchronous>, transform_indices = @transform_1, window_bounds = array<i64: 8, 256>}, {pipeline_mode = #tpu.pipeline_mode<synchronous>, transform_indices = @transform_2, window_bounds = array<i64: 1, 256>}, {pipeline_mode = #tpu.pipeline_mode<synchronous>, transform_indices = @transform_3, window_bounds = array<i64: 256, 768>}, {pipeline_mode = #tpu.pipeline_mode<synchronous>, transform_indices = @transform_4, window_bounds = array<i64: 1, 768>}, {pipeline_mode = #tpu.pipeline_mode<synchronous>, transform_indices = @transform_5, window_bounds = array<i64: 3, 256, 256>}, {pipeline_mode = #tpu.pipeline_mode<synchronous>, transform_indices = @transform_6, window_bounds = array<i64: 1, 768>}, {pipeline_mode = #tpu.pipeline_mode<synchronous>, transform_indices = @transform_7, window_bounds = array<i64: 768, 128>}, {pipeline_mode = #tpu.pipeline_mode<synchronous>, transform_indices = @transform_8, window_bounds = array<i64: 1, 128>}, {transform_indices = @transform_9, window_bounds = array<i64: 16, 384>}]} {
    %c0 = arith.constant 0 : index
    %c0_0 = arith.constant 0 : index
    %c0_1 = arith.constant 0 : index
    %0 = vector.load %arg1[%c0, %c0_0, %c0_1] : memref<16x8x256xf32, #tpu.memory_space<vmem>>, vector<16x8x256xf32>
    %cst = arith.constant dense<0.000000e+00> : vector<16x8xf32>
    %1 = vector.multi_reduction <add>, %0, %cst [2] : vector<16x8x256xf32> to vector<16x8xf32>
    %cst_2 = arith.constant 2.560000e+02 : f32
    %2 = vector.broadcast %cst_2 : f32 to vector<16x8xf32>
    %3 = arith.divf %1, %2 : vector<16x8xf32>
    %c0_3 = arith.constant 0 : index
    %c0_4 = arith.constant 0 : index
    %4 = vector.load %arg2[%c0_3, %c0_4] : memref<8x256xf32, #tpu.memory_space<vmem>>, vector<8x256xf32>
    %cst_5 = arith.constant dense<0.000000e+00> : vector<16x256xf32>
    %5 = tpu.matmul %3, %4, %cst_5 {dimension_numbers = #tpu.dot_dimension_numbers<[1], [0], [0], [1], [0, 0, 1, 1], [], []>} : vector<16x8xf32>, vector<8x256xf32>, vector<16x256xf32> -> vector<16x256xf32>
    %c0_6 = arith.constant 0 : index
    %c0_7 = arith.constant 0 : index
    %6 = vector.load %arg3[%c0_6, %c0_7] : memref<1x256xf32, #tpu.memory_space<vmem>>, vector<1x256xf32>
    %7 = vector.broadcast %6 : vector<1x256xf32> to vector<16x256xf32>
    %8 = arith.addf %5, %7 : vector<16x256xf32>
    %c0_8 = arith.constant 0 : index
    %c0_9 = arith.constant 0 : index
    %9 = vector.load %arg10[%c0_8, %c0_9] : memref<16x384xf32, #tpu.memory_space<vmem>>, vector<16x256xf32>
    tpu.vector_store %arg10[%c0_8, %c0_9], %8 {strides = array<i32>} : memref<16x384xf32, #tpu.memory_space<vmem>>, vector<16x256xf32>,
    %10 = arith.truncf %8 : vector<16x256xf32> to vector<16x256xbf16>
    %c0_10 = arith.constant 0 : index
    %c0_11 = arith.constant 0 : index
    %11 = vector.load %arg4[%c0_10, %c0_11] : memref<256x768xbf16, #tpu.memory_space<vmem>>, vector<256x768xbf16>
    %cst_12 = arith.constant dense<0.000000e+00> : vector<16x768xf32>
    %12 = tpu.matmul %10, %11, %cst_12 {dimension_numbers = #tpu.dot_dimension_numbers<[1], [0], [0], [1], [0, 0, 1, 1], [], []>} : vector<16x256xbf16>, vector<256x768xbf16>, vector<16x768xf32> -> vector<16x768xf32>
    %c0_13 = arith.constant 0 : index
    %c0_14 = arith.constant 0 : index
    %13 = vector.load %arg5[%c0_13, %c0_14] : memref<1x768xf32, #tpu.memory_space<vmem>>, vector<1x768xf32>
    %14 = vector.broadcast %13 : vector<1x768xf32> to vector<16x768xf32>
    %15 = arith.addf %12, %14 : vector<16x768xf32>
    %cst_15 = arith.constant 0.000000e+00 : f32
    %16 = vector.broadcast %cst_15 : f32 to vector<16x768xf32>
    %17 = arith.maximumf %15, %16 : vector<16x768xf32>
    %18 = vector.extract_strided_slice %17 {offsets = [0, 0], sizes = [16, 256], strides = [1, 1]} : vector<16x768xf32> to vector<16x256xf32>
    %19 = arith.truncf %18 : vector<16x256xf32> to vector<16x256xbf16>
    %c0_16 = arith.constant 0 : index
    %c0_17 = arith.constant 0 : index
    %c0_18 = arith.constant 0 : index
    %20 = vector.load %arg6[%c0_16, %c0_17, %c0_18] : memref<3x256x256xbf16, #tpu.memory_space<vmem>>, vector<1x256x256xbf16>
    %21 = vector.shape_cast %20 : vector<1x256x256xbf16> to vector<256x256xbf16>
    %cst_19 = arith.constant dense<0.000000e+00> : vector<16x256xf32>
    %22 = tpu.matmul %19, %21, %cst_19 {dimension_numbers = #tpu.dot_dimension_numbers<[1], [0], [0], [1], [0, 0, 1, 1], [], []>} : vector<16x256xbf16>, vector<256x256xbf16>, vector<16x256xf32> -> vector<16x256xf32>
    %23 = vector.extract_strided_slice %17 {offsets = [0, 256], sizes = [16, 256], strides = [1, 1]} : vector<16x768xf32> to vector<16x256xf32>
    %24 = arith.truncf %23 : vector<16x256xf32> to vector<16x256xbf16>
    %c1 = arith.constant 1 : index
    %c0_20 = arith.constant 0 : index
    %c0_21 = arith.constant 0 : index
    %25 = vector.load %arg6[%c1, %c0_20, %c0_21] : memref<3x256x256xbf16, #tpu.memory_space<vmem>>, vector<1x256x256xbf16>
    %26 = vector.shape_cast %25 : vector<1x256x256xbf16> to vector<256x256xbf16>
    %cst_22 = arith.constant dense<0.000000e+00> : vector<16x256xf32>
    %27 = tpu.matmul %24, %26, %cst_22 {dimension_numbers = #tpu.dot_dimension_numbers<[1], [0], [0], [1], [0, 0, 1, 1], [], []>} : vector<16x256xbf16>, vector<256x256xbf16>, vector<16x256xf32> -> vector<16x256xf32>
    %28 = vector.extract_strided_slice %17 {offsets = [0, 512], sizes = [16, 256], strides = [1, 1]} : vector<16x768xf32> to vector<16x256xf32>
    %29 = arith.truncf %28 : vector<16x256xf32> to vector<16x256xbf16>
    %c2 = arith.constant 2 : index
    %c0_23 = arith.constant 0 : index
    %c0_24 = arith.constant 0 : index
    %30 = vector.load %arg6[%c2, %c0_23, %c0_24] : memref<3x256x256xbf16, #tpu.memory_space<vmem>>, vector<1x256x256xbf16>
    %31 = vector.shape_cast %30 : vector<1x256x256xbf16> to vector<256x256xbf16>
    %cst_25 = arith.constant dense<0.000000e+00> : vector<16x256xf32>
    %32 = tpu.matmul %29, %31, %cst_25 {dimension_numbers = #tpu.dot_dimension_numbers<[1], [0], [0], [1], [0, 0, 1, 1], [], []>} : vector<16x256xbf16>, vector<256x256xbf16>, vector<16x256xf32> -> vector<16x256xf32>
    %33 = tpu.concatenate %22, %27, %32 in 1 : vector<16x256xf32>, vector<16x256xf32>, vector<16x256xf32> -> vector<16x768xf32>
    %c0_26 = arith.constant 0 : index
    %c0_27 = arith.constant 0 : index
    %34 = vector.load %arg7[%c0_26, %c0_27] : memref<1x768xf32, #tpu.memory_space<vmem>>, vector<1x768xf32>
    %35 = vector.broadcast %34 : vector<1x768xf32> to vector<16x768xf32>
    %36 = arith.addf %33, %35 : vector<16x768xf32>
    %cst_28 = arith.constant 0.000000e+00 : f32
    %37 = vector.broadcast %cst_28 : f32 to vector<16x768xf32>
    %38 = arith.maximumf %36, %37 : vector<16x768xf32>
    %39 = arith.truncf %38 : vector<16x768xf32> to vector<16x768xbf16>
    %c0_29 = arith.constant 0 : index
    %c0_30 = arith.constant 0 : index
    %40 = vector.load %arg8[%c0_29, %c0_30] : memref<768x128xbf16, #tpu.memory_space<vmem>>, vector<768x128xbf16>
    %cst_31 = arith.constant dense<0.000000e+00> : vector<16x128xf32>
    %41 = tpu.matmul %39, %40, %cst_31 {dimension_numbers = #tpu.dot_dimension_numbers<[1], [0], [0], [1], [0, 0, 1, 1], [], []>} : vector<16x768xbf16>, vector<768x128xbf16>, vector<16x128xf32> -> vector<16x128xf32>
    %c0_32 = arith.constant 0 : index
    %c0_33 = arith.constant 0 : index
    %42 = vector.load %arg9[%c0_32, %c0_33] : memref<1x128xf32, #tpu.memory_space<vmem>>, vector<1x128xf32>
    %43 = vector.broadcast %42 : vector<1x128xf32> to vector<16x128xf32>
    %44 = arith.addf %41, %43 : vector<16x128xf32>
    %c0_34 = arith.constant 0 : index
    %c256 = arith.constant 256 : index
    %45 = vector.load %arg10[%c0_34, %c256] : memref<16x384xf32, #tpu.memory_space<vmem>>, vector<16x128xf32>
    tpu.vector_store %arg10[%c0_34, %c256], %44 {strides = array<i32>} : memref<16x384xf32, #tpu.memory_space<vmem>>, vector<16x128xf32>,
    return
  }
  func.func @transform_0(%arg0: i32) -> (i32, i32, i32) {
    %c0_i32 = arith.constant 0 : i32
    %c0_i32_0 = arith.constant 0 : i32
    %c0_i32_1 = arith.constant 0 : i32
    return %arg0, %c0_i32, %c0_i32_0 : i32, i32, i32
  }
  func.func @transform_1(%arg0: i32) -> (i32, i32) {
    %c0_i32 = arith.constant 0 : i32
    %c0_i32_0 = arith.constant 0 : i32
    %c0_i32_1 = arith.constant 0 : i32
    return %c0_i32, %c0_i32_0 : i32, i32
  }
  func.func @transform_2(%arg0: i32) -> (i32, i32) {
    %c0_i32 = arith.constant 0 : i32
    %c0_i32_0 = arith.constant 0 : i32
    %c0_i32_1 = arith.constant 0 : i32
    return %c0_i32, %c0_i32_0 : i32, i32
  }
  func.func @transform_3(%arg0: i32) -> (i32, i32) {
    %c0_i32 = arith.constant 0 : i32
    %c0_i32_0 = arith.constant 0 : i32
    %c0_i32_1 = arith.constant 0 : i32
    return %c0_i32, %c0_i32_0 : i32, i32
  }
  func.func @transform_4(%arg0: i32) -> (i32, i32) {
    %c0_i32 = arith.constant 0 : i32
    %c0_i32_0 = arith.constant 0 : i32
    %c0_i32_1 = arith.constant 0 : i32
    return %c0_i32, %c0_i32_0 : i32, i32
  }
  func.func @transform_5(%arg0: i32) -> (i32, i32, i32) {
    %c0_i32 = arith.constant 0 : i32
    %c0_i32_0 = arith.constant 0 : i32
    %c0_i32_1 = arith.constant 0 : i32
    %c0_i32_2 = arith.constant 0 : i32
    return %c0_i32, %c0_i32_0, %c0_i32_1 : i32, i32, i32
  }
  func.func @transform_6(%arg0: i32) -> (i32, i32) {
    %c0_i32 = arith.constant 0 : i32
    %c0_i32_0 = arith.constant 0 : i32
    %c0_i32_1 = arith.constant 0 : i32
    return %c0_i32, %c0_i32_0 : i32, i32
  }
  func.func @transform_7(%arg0: i32) -> (i32, i32) {
    %c0_i32 = arith.constant 0 : i32
    %c0_i32_0 = arith.constant 0 : i32
    %c0_i32_1 = arith.constant 0 : i32
    return %c0_i32, %c0_i32_0 : i32, i32
  }
  func.func @transform_8(%arg0: i32) -> (i32, i32) {
    %c0_i32 = arith.constant 0 : i32
    %c0_i32_0 = arith.constant 0 : i32
    %c0_i32_1 = arith.constant 0 : i32
    return %c0_i32, %c0_i32_0 : i32, i32
  }
  func.func @transform_9(%arg0: i32) -> (i32, i32) {
    %c0_i32 = arith.constant 0 : i32
    %c0_i32_0 = arith.constant 0 : i32
    return %arg0, %c0_i32 : i32, i32
  }
}

</mosaic_0001>

<bundles_post_ra>
// kernel: tpu_custom_call.1
= control target key start
LH: loop header
LB: loop body
LE: loop exit
PB: predicated region body
PF: predicated region fallthrough
CT: control target
= control target key end

     0   :  { %14 = vsyncpa [#allocation3], 0  ;;  %s4079_s0 = inlined_call_operand.hbm [shape: f32[16,8,256], index: 0, kind: input, shape index: {}]   ;;  %s4080_s1 = inlined_call_operand.hbm [shape: f32[8,256], index: 1, kind: input, shape index: {}]   ;;  %s4081_s2 = inlined_call_operand.hbm [shape: f32[1,256], index: 2, kind: input, shape index: {}]   ;;  %s4082_s3 = inlined_call_operand.hbm [shape: bf16[256,768], index: 3, kind: input, shape index: {}]   ;;  %s4083_s4 = inlined_call_operand.hbm [shape: f32[1,768], index: 4, kind: input, shape index: {}]   ;;  %s4084_s5 = inlined_call_operand.hbm [shape: bf16[3,256,256], index: 5, kind: input, shape index: {}]   ;;  %s4085_s6 = inlined_call_operand.hbm [shape: f32[1,768], index: 6, kind: input, shape index: {}]   ;;  %s4086_s7 = inlined_call_operand.hbm [shape: bf16[768,128], index: 7, kind: input, shape index: {}]   ;;  %s4087_s8 = inlined_call_operand.vmem [shape: f32[1,128], index: 8, kind: input, shape index: {}]   ;;  %s4088_s9 = inlined_call_operand.hbm [shape: f32[16,384], index: 9, kind: output, shape index: {}]  }
   0x1   :  { %15 = vsyncpa [#allocation6], 0 }
   0x2   :  { %16 = vsyncpa [#allocation9], 0 }
   0x3   :  { %17 = vsyncpa [#allocation12], 0 }
   0x4   :  { %18 = vsyncpa [#allocation15], 0  ;;  %s38_s11 = sshll.u32 %s4080_s1, 4  ;;  %s39_s11 = int_to_ptr.hbm [resolvable:$true] %s38_s11 }
   0x5   :  { %19 = vsyncpa [#allocation4], 0  ;;  %s3889_s12 = smov [#allocation5]   ;;  %s59_s16 = sshll.u32 %s4082_s3, 4  ;;  %s60_s16 = int_to_ptr.hbm [resolvable:$true] %s59_s16 }
   0x6   :  { %s40_s13 = sshll.u32 %s3889_s12, 4  ;;  %s3890_s17 = smov [#allocation8]   ;;  %s41_s13 = int_to_ptr.vmem [resolvable:$true] %s40_s13 }
   0x7   :  { %43 = dma.hbm_to_vmem [thread:$0]  %s39_s11, 256, %s41_s13, [#allocation6]  }
   0x8   :  { %s61_s18 = sshll.u32 %s3890_s17, 4  ;;  %s3891_s19 = smov 384   ;;  %s62_s18 = int_to_ptr.vmem [resolvable:$true] %s61_s18 }
   0x9   :  { %s3892_s20 = smov 24   ;;  %s83_s22 = sshll.u32 %s4084_s5, 4  ;;  %s84_s22 = int_to_ptr.hbm [resolvable:$true] %s83_s22 }
   0xa   :  { %67 = dma.hbm_to_vmem [thread:$0]  %s60_s16, 12288, %s62_s18, [#allocation9], %s3891_s19, %s3891_s19, %s3892_s20  }
   0xb   :  { %s3893_s23 = smov [#allocation11]   ;;  %s24_s26 = sshll.u32 %s4079_s0, 4  ;;  %s25_s26 = int_to_ptr.hbm [resolvable:$true] %s24_s26 }
   0xc   :  { %s85_s24 = sshll.u32 %s3893_s23, 4  ;;  %s3894_s27 = smov 128   ;;  %s86_s24 = int_to_ptr.vmem [resolvable:$true] %s85_s24 }
   0xd   :  { %s3895_s28 = smov 8   ;;  %s3896_s29 = smov [#allocation2]  }
   0xe   :  { %91 = dma.hbm_to_vmem [thread:$0]  %s84_s22, 12288, %s86_s24, [#allocation12], %s3894_s27, %s3894_s27, %s3895_s28  }
   0xf   :  { %s26_s30 = sshll.u32 %s3896_s29, 4  ;;  %s3897_s10 = smov 256   ;;  %s27_s30 = int_to_ptr.vmem [resolvable:$true] %s26_s30 }
  0x10   :  { %s3898_s11 = smov 16   ;;  %s49_s13 = sshll.u32 %s4081_s2, 4  ;;  %s50_s13 = int_to_ptr.hbm [resolvable:$true] %s49_s13 }
  0x11   :  { %32 = dma.hbm_to_vmem [thread:$0]  %s25_s26, 4096, %s27_s30, [#allocation3], %s3897_s10, %s3897_s10, %s3898_s11  }
  0x12   :  { %s3899_s14 = smov [#allocation7]   ;;  %s73_s17 = sshll.u32 %s4083_s4, 4  ;;  %s74_s17 = int_to_ptr.hbm [resolvable:$true] %s73_s17 }
  0x13   :  { %s51_s15 = sshll.u32 %s3899_s14, 4  ;;  %s3900_s18 = smov [#allocation10]   ;;  %s52_s15 = int_to_ptr.vmem [resolvable:$true] %s51_s15 }
  0x14   :  { %54 = dma.hbm_to_vmem [thread:$0]  %s50_s13, 32, %s52_s15, [#allocation6]  }
  0x15   :  { %s75_s1 = sshll.u32 %s3900_s18, 4  ;;  %s97_s23 = sshll.u32 %s4085_s6, 4  ;;  %s76_s1 = int_to_ptr.vmem [resolvable:$true] %s75_s1  ;;  %s98_s23 = int_to_ptr.hbm [resolvable:$true] %s97_s23 }
  0x16   :  { %78 = dma.hbm_to_vmem [thread:$0]  %s74_s17, 96, %s76_s1, [#allocation9]  }
  0x17   :  { %s107_s3 = sshll.u32 %s4086_s7, 4  ;;  %s3901_s25 = smov [#allocation13]   ;;  %s108_s3 = int_to_ptr.hbm [resolvable:$true] %s107_s3 }
  0x18   :  { %s99_s26 = sshll.u32 %s3901_s25, 4  ;;  %s3902_s4 = smov [#allocation14]   ;;  %s100_s26 = int_to_ptr.vmem [resolvable:$true] %s99_s26 }
  0x19   :  { %102 = dma.hbm_to_vmem [thread:$0]  %s98_s23, 96, %s100_s26, [#allocation12]  }
  0x1a   :  { %s109_s27 = sshll.u32 %s3902_s4, 4  ;;  %s3903_s28 = smov 64   ;;  %s110_s27 = int_to_ptr.vmem [resolvable:$true] %s109_s27 }
  0x1b   :  { %s3904_s29 = smov 4  }
  0x1c   :  { %115 = dma.hbm_to_vmem [thread:$0]  %s108_s3, 6144, %s110_s27, [#allocation15], %s3903_s28, %s3903_s28, %s3904_s29  }
  0x1d   :  { %3877 = dma.done.wait [#allocation3], 4096  }
  0x1e   :  { %3878 = vsyncadd [#allocation3], 4294963200 }
  0x1f   :  { %3879 = dma.done.wait [#allocation6], 288  }
  0x20   :  { %3880 = vsyncadd [#allocation6], 4294967008 }
  0x21   :  { %3881 = dma.done.wait [#allocation9], 12384  }
  0x22   :  { %3882 = vsyncadd [#allocation9], 4294954912 }
  0x23   :  { %3883 = dma.done.wait [#allocation12], 12384  }
  0x24   :  { %3884 = vsyncadd [#allocation12], 4294954912 }
  0x25   :  { %3885 = dma.done.wait [#allocation15], 6144  }
  0x26   :  { %3886 = vsyncadd [#allocation15], 4294961152  ;;  %v150_v0 = vld [vmem:[#allocation2] sm:$0xff]  ;;  %v151_v1 = vld [vmem:[#allocation2 + $0x8] sm:$0xff]  ;;  %v3905_v48 = vmov 256.0   ;;  %v277_v59 = vlaneseq  ;;  %vm295_vm1 = vcmask 1041409  }
  0x27   :  { %v154_v2 = vld [vmem:[#allocation2 + $0x20] sm:$0xff]  ;;  %v182_v3 = vadd.f32 %v151_v1, %v150_v0  ;;  %v155_v4 = vld [vmem:[#allocation2 + $0x28] sm:$0xff]  ;;  %v152_v9 = vld [vmem:[#allocation2 + $0x10] sm:$0xff]  ;;  %3659 = vrcp.f32 %v3905_v48  ;;  %vm297_vm2 = vcmask 1042434   ;;  %vm299_vm3 = vcmask 1043459   ;;  %s2419_s12 = sshll.u32 %s4088_s9, 4  ;;  %s2420_s12 = int_to_ptr.hbm [resolvable:$true] %s2419_s12 }
  0x28   :  { %v158_v5 = vld [vmem:[#allocation2 + $0x40] sm:$0xff]  ;;  %v159_v6 = vld [vmem:[#allocation2 + $0x48] sm:$0xff]  ;;  %v188_v7 = vadd.f32 %v155_v4, %v154_v2  ;;  %v153_v10 = vld [vmem:[#allocation2 + $0x18] sm:$0xff]  ;;  %v3986_v61 = vand.u32 127, %v277_v59  ;;  %vm301_vm4 = vcmask 1044484   ;;  %vm303_vm5 = vcmask 1045509  }
  0x29   :  { %v194_v8 = vadd.f32 %v159_v6, %v158_v5  ;;  %183 = vadd.xlane.f32.xlu0 %v182_v3  ;;  %v156_v11 = vld [vmem:[#allocation2 + $0x30] sm:$0xff]  ;;  %v157_v12 = vld [vmem:[#allocation2 + $0x38] sm:$0xff]  ;;  %v185_v15 = vadd.f32 %v153_v10, %v152_v9  ;;  %v162_v18 = vld [vmem:[#allocation2 + $0x60] sm:$0xff]  ;;  %vm305_vm6 = vcmask 1046534   ;;  %vm307_vm7 = vcmask 1047559  }
  0x2a   :  { %189 = vadd.xlane.f32.xlu1 %v188_v7  ;;  %v160_v13 = vld [vmem:[#allocation2 + $0x50] sm:$0xff]  ;;  %v161_v14 = vld [vmem:[#allocation2 + $0x58] sm:$0xff]  ;;  %v191_v16 = vadd.f32 %v157_v12, %v156_v11  ;;  %v163_v19 = vld [vmem:[#allocation2 + $0x68] sm:$0xff]  ;;  %vm316_vm8 = vcmask 64512  }
  0x2b   :  { %195 = vadd.xlane.f32.xlu2 %v194_v8  ;;  %v197_v17 = vadd.f32 %v161_v14, %v160_v13  ;;  %v164_v20 = vld [vmem:[#allocation2 + $0x70] sm:$0xff]  ;;  %v165_v21 = vld [vmem:[#allocation2 + $0x78] sm:$0xff]  ;;  %v166_v22 = vld [vmem:[#allocation2 + $0x80] sm:$0xff]  ;;  %v200_v24 = vadd.f32 %v163_v19, %v162_v18 }
  0x2c   :  { %v167_v23 = vld [vmem:[#allocation2 + $0x88] sm:$0xff]  ;;  %v203_v25 = vadd.f32 %v165_v21, %v164_v20  ;;  %v168_v27 = vld [vmem:[#allocation2 + $0x90] sm:$0xff]  ;;  %v169_v28 = vld [vmem:[#allocation2 + $0x98] sm:$0xff] }
  0x2d   :  { %v206_v26 = vadd.f32 %v167_v23, %v166_v22  ;;  %v170_v29 = vld [vmem:[#allocation2 + $0xa0] sm:$0xff]  ;;  %v171_v30 = vld [vmem:[#allocation2 + $0xa8] sm:$0xff]  ;;  %v172_v31 = vld [vmem:[#allocation2 + $0xb0] sm:$0xff]  ;;  %v209_v33 = vadd.f32 %v169_v28, %v168_v27  ;;  %v3660_v49 = vpop.eup %3659 }
  0x2e   :  { %v173_v32 = vld [vmem:[#allocation2 + $0xb8] sm:$0xff]  ;;  %v212_v34 = vadd.f32 %v171_v30, %v170_v29  ;;  %v174_v36 = vld [vmem:[#allocation2 + $0xc0] sm:$0xff]  ;;  %v175_v37 = vld [vmem:[#allocation2 + $0xc8] sm:$0xff]  ;;  %v231_v50 = vmul.f32 256.0, %v3660_v49  ;;  %vm235_vm0 = vweird.f32 %v3660_v49 }
  0x2f   :  { %v215_v35 = vadd.f32 %v173_v32, %v172_v31  ;;  %v176_v38 = vld [vmem:[#allocation2 + $0xd0] sm:$0xff]  ;;  %v177_v39 = vld [vmem:[#allocation2 + $0xd8] sm:$0xff]  ;;  %v178_v40 = vld [vmem:[#allocation2 + $0xe0] sm:$0xff]  ;;  %v218_v42 = vadd.f32 %v175_v37, %v174_v36 }
  0x30   :  { %v179_v41 = vld [vmem:[#allocation2 + $0xe8] sm:$0xff]  ;;  %v221_v43 = vadd.f32 %v177_v39, %v176_v38  ;;  %v180_v45 = vld [vmem:[#allocation2 + $0xf0] sm:$0xff]  ;;  %v181_v46 = vld [vmem:[#allocation2 + $0xf8] sm:$0xff]  ;;  %v232_v53 = vsub.f32 1.0, %v231_v50 }
  0x31   :  { %186 = vadd.xlane.f32.xlu0 %v185_v15  ;;  %v224_v44 = vadd.f32 %v179_v41, %v178_v40  ;;  %v227_v47 = vadd.f32 %v181_v46, %v180_v45  ;;  %v253_v51 = vld [vmem:[#allocation5] sm:$0xff]  ;;  %v254_v52 = vld [vmem:[#allocation5 + $0x8] sm:$0xff]  ;;  %v3445_v14 = vld [vmem:[#allocation8 + $0x164] sm:$0xf0] }
  0x32   :  { %192 = vadd.xlane.f32.xlu1 %v191_v16  ;;  %336 = vmatpush.msra.mxu0 %v253_v51  ;;  %v233_v54 = vmul.f32 %v3660_v49, %v232_v53  ;;  %v2610_v13 = vld [vmem:[#allocation8 + $0x150] sm:$0xf]  ;;  %v3493_v19 = vld [vmem:[#allocation8 + $0x2e4] sm:$0xf0]  ;;  %v3442_v20 = vld [vmem:[#allocation8 + $0x154] sm:$0xf] }
  0x33   :  { %198 = vadd.xlane.f32.xlu2 %v197_v17  ;;  %359 = vmatpush.msra.mxu1 %v254_v52  ;;  %v2802_v15 = vld [vmem:[#allocation8 + $0x2d0] sm:$0xf]  ;;  %v2611_v18 = vor.u32 %v3445_v14, %v2610_v13  ;;  %v2612_v21 = vld [vmem:[#allocation8 + $0x168] sm:$0xf0]  ;;  %v2586_v28 = vld [vmem:[#allocation8 + $0x120] sm:$0xf] }
  0x34   :  { %v234_v55 = vadd.f32 %v3660_v49, %v233_v54  ;;  %v2804_v27 = vld [vmem:[#allocation8 + $0x2e8] sm:$0xf0]  ;;  %v3487_v36 = vld [vmem:[#allocation8 + $0x2b4] sm:$0xf0]  ;;  %v3436_v39 = vld [vmem:[#allocation8 + $0x124] sm:$0xf] }
  0x35   :  { %963 = vmatpush.bf16.msra.mxu2 %v2611_v18  ;;  %v2588_v40 = vld [vmem:[#allocation8 + $0x138] sm:$0xf0]  ;;  %v3484_v41 = vld [vmem:[#allocation8 + $0x2a4] sm:$0xf]  ;;  %v2562_v46 = vld [vmem:[#allocation8 + $0xf0] sm:$0xf] }
  0x36   :  { %v3984_v60 = vsel %vm235_vm0, %v3660_v49, %v234_v55  ;;  %v2780_v45 = vld [vmem:[#allocation8 + $0x2b8] sm:$0xf0]  ;;  %v2754_v51 = vld [vmem:[#allocation8 + $0x270] sm:$0xf]  ;;  %v3481_v52 = vld [vmem:[#allocation8 + $0x284] sm:$0xf0] }
  0x37   :  { %v2783_v50 = vor.u32 %v3484_v41, %v2780_v45  ;;  %v3430_v53 = vld [vmem:[#allocation8 + $0xf4] sm:$0xf]  ;;  %v3472_v13 = vld [vmem:[#allocation8 + $0x244] sm:$0xf]  ;;  %v2732_v14 = vld [vmem:[#allocation8 + $0x258] sm:$0xf0] }
  0x38   :  { %v2514_v18 = vld [vmem:[#allocation8 + $0x90] sm:$0xf] }
  0x39   :  { %201 = vadd.xlane.f32.xlu0 %v200_v24  ;;  %v2803_v24 = vor.u32 %v3493_v19, %v2802_v15  ;;  %v3421_v19 = vld [vmem:[#allocation8 + $0xa4] sm:$0xf0] }
  0x3a   :  { %204 = vadd.xlane.f32.xlu1 %v203_v25  ;;  %v2615_v25 = vor.u32 %v3442_v20, %v2612_v21  ;;  %v2706_v20 = vld [vmem:[#allocation8 + $0x210] sm:$0xf] }
  0x3b   :  { %207 = vadd.xlane.f32.xlu2 %v206_v26  ;;  %v3490_v26 = vld [vmem:[#allocation8 + $0x2d4] sm:$0xf]  ;;  %977 = vmatpush.bf16.msra.mxu3 %v2803_v24 }
  0x3c   :  { %991 = vmatpush.bf16.msrb.mxu0 %v2615_v25  ;;  %v3418_v24 = vld [vmem:[#allocation8 + $0x94] sm:$0xf]  ;;  %v2516_v25 = vld [vmem:[#allocation8 + $0xa8] sm:$0xf0] }
  0x41   :  { %210 = vadd.xlane.f32.xlu0 %v209_v33  ;;  %v2807_v33 = vor.u32 %v3490_v26, %v2804_v27  ;;  %v2735_v26 = vor.u32 %v3472_v13, %v2732_v14 }
  0x42   :  { %213 = vadd.xlane.f32.xlu1 %v212_v34  ;;  %v3439_v34 = vld [vmem:[#allocation8 + $0x134] sm:$0xf0] }
  0x43   :  { %216 = vadd.xlane.f32.xlu2 %v215_v35  ;;  %v2778_v35 = vld [vmem:[#allocation8 + $0x2a0] sm:$0xf]  ;;  %v2587_v38 = vor.u32 %v3439_v34, %v2586_v28  ;;  %1005 = vmatpush.bf16.msrb.mxu1 %v2807_v33  ;;  %v2515_v28 = vor.u32 %v3421_v19, %v2514_v18  ;;  %v2519_v34 = vor.u32 %v3418_v24, %v2516_v25 }
  0x45   :  { %964 = vmatpush.bf16.msra.mxu2 %v2587_v38 }
  0x47   :  { %1006 = vmatpush.bf16.msrb.mxu1 %v2783_v50  ;;  %v2684_v50 = vld [vmem:[#allocation8 + $0x1f8] sm:$0xf0] }
  0x49   :  { %219 = vadd.xlane.f32.xlu0 %v218_v42 }
  0x4a   :  { %222 = vadd.xlane.f32.xlu1 %v221_v43  ;;  %v2779_v43 = vor.u32 %v3487_v36, %v2778_v35  ;;  %v3415_v35 = vld [vmem:[#allocation8 + $0x74] sm:$0xf0]  ;;  %v2682_v36 = vld [vmem:[#allocation8 + $0x1e0] sm:$0xf] }
  0x4b   :  { %225 = vadd.xlane.f32.xlu2 %v224_v44  ;;  %v2591_v44 = vor.u32 %v3436_v39, %v2588_v40  ;;  %v3412_v39 = vld [vmem:[#allocation8 + $0x64] sm:$0xf]  ;;  %v2492_v40 = vld [vmem:[#allocation8 + $0x78] sm:$0xf0] }
  0x4c   :  { %978 = vmatpush.bf16.msra.mxu3 %v2779_v43 }
  0x4d   :  { %992 = vmatpush.bf16.msrb.mxu0 %v2591_v44 }
  0x51   :  { %228 = vadd.xlane.f32.xlu0 %v227_v47  ;;  %v3433_v47 = vld [vmem:[#allocation8 + $0x104] sm:$0xf0] }
  0x52   :  { %v2563_v55 = vor.u32 %v3433_v47, %v2562_v46 }
  0x54   :  { %965 = vmatpush.bf16.msra.mxu2 %v2563_v55  ;;  %v3409_v55 = vld [vmem:[#allocation8 + $0x44] sm:$0xf0] }
  0x9c   :  { %v184_v56 = vpop.xlane.xlu0 %183 }
  0x9d   :  { %v190_v57 = vpop.xlane.xlu1 %189  ;;  %v237_v62 = vmul.f32 %v3984_v60, %v184_v56  ;;  %v2564_v56 = vld [vmem:[#allocation8 + $0x108] sm:$0xf0] }
  0x9e   :  { %v196_v58 = vpop.xlane.xlu2 %195  ;;  %v239_v63 = vmul.f32 %v3984_v60, %v190_v57  ;;  %v3478_v57 = vld [vmem:[#allocation8 + $0x274] sm:$0xf] }
  0x9f   :  { %v279_v5 = vperm.slane %v237_v62, %v3986_v61  ;;  %v241_v6 = vmul.f32 %v3984_v60, %v196_v58  ;;  %v2756_v58 = vld [vmem:[#allocation8 + $0x288] sm:$0xf0]  ;;  %v2755_v62 = vor.u32 %v3481_v52, %v2754_v51 }
  0xa0   :  { %v281_v8 = vperm.slane %v239_v63, %v3986_v61  ;;  %v2567_v63 = vor.u32 %v3430_v53, %v2564_v56  ;;  %v2495_v53 = vor.u32 %v3412_v39, %v2492_v40  ;;  %v2658_v56 = vld [vmem:[#allocation8 + $0x1b0] sm:$0xf]  ;;  %v2594_v39 = vld [vmem:[#allocation8 + $0x128] sm:$0xf]  ;;  %v3440_v40 = vld [vmem:[#allocation8 + $0x13c] sm:$0xf0] }
  0xa1   :  { %v283_v16 = vperm.slane %v241_v6, %v3986_v61  ;;  %v2540_v6 = vld [vmem:[#allocation8 + $0xd8] sm:$0xf0]  ;;  %979 = vmatpush.bf16.msra.mxu3 %v2755_v62  ;;  %v2468_v62 = vld [vmem:[#allocation8 + $0x48] sm:$0xf0] }
  0xa2   :  { %993 = vmatpush.bf16.msrb.mxu0 %v2567_v63 }
  0xa4   :  { %v187_v0 = vpop.xlane.xlu0 %186 }
  0xa5   :  { %v238_v1 = vmul.f32 %v3984_v60, %v187_v0  ;;  %v193_v2 = vpop.xlane.xlu1 %192  ;;  %v2538_v0 = vld [vmem:[#allocation8 + $0xc0] sm:$0xf] }
  0xa6   :  { %v199_v3 = vpop.xlane.xlu2 %198  ;;  %v240_v4 = vmul.f32 %v3984_v60, %v193_v2  ;;  %v2730_v2 = vld [vmem:[#allocation8 + $0x240] sm:$0xf] }
  0xa7   :  { %v280_v7 = vperm.slane %v238_v1, %v3986_v61  ;;  %v242_v10 = vmul.f32 %v3984_v60, %v199_v3  ;;  %v3427_v1 = vld [vmem:[#allocation8 + $0xd4] sm:$0xf0] }
  0xa8   :  { %v282_v9 = vperm.slane %v240_v4, %v3986_v61  ;;  %v3475_v4 = vld [vmem:[#allocation8 + $0x254] sm:$0xf0] }
  0xa9   :  { %v296_v11 = vsel %vm295_vm1, %v280_v7, %v279_v5  ;;  %v284_v22 = vperm.slane %v242_v10, %v3986_v61  ;;  %v3424_v5 = vld [vmem:[#allocation8 + $0xc4] sm:$0xf] }
  0xaa   :  { %v298_v12 = vsel %vm297_vm2, %v281_v8, %v296_v11  ;;  %v2759_v8 = vor.u32 %v3478_v57, %v2756_v58  ;;  %v3457_v58 = vld [vmem:[#allocation8 + $0x1c4] sm:$0xf0] }
  0xab   :  { %v300_v17 = vsel %vm299_vm3, %v282_v9, %v298_v12  ;;  %v2539_v12 = vor.u32 %v3427_v1, %v2538_v0 }
  0xac   :  { %v202_v23 = vpop.xlane.xlu0 %201  ;;  %v302_v32 = vsel %vm301_vm4, %v283_v16, %v300_v17  ;;  %v2731_v16 = vor.u32 %v3475_v4, %v2730_v2  ;;  %v2543_v17 = vor.u32 %v3424_v5, %v2540_v6  ;;  %1007 = vmatpush.bf16.msrb.mxu1 %v2759_v8  ;;  %v3454_v4 = vld [vmem:[#allocation8 + $0x1b4] sm:$0xf]  ;;  %v2660_v5 = vld [vmem:[#allocation8 + $0x1c8] sm:$0xf0] }
  0xad   :  { %v243_v29 = vmul.f32 %v3984_v60, %v202_v23  ;;  %v205_v30 = vpop.xlane.xlu1 %204  ;;  %v304_v49 = vsel %vm303_vm5, %v284_v22, %v302_v32  ;;  %v3469_v23 = vld [vmem:[#allocation8 + $0x224] sm:$0xf0]  ;;  %966 = vmatpush.bf16.msra.mxu2 %v2539_v12  ;;  %v2663_v14 = vor.u32 %v3454_v4, %v2660_v5  ;;  %v3476_v4 = vld [vmem:[#allocation8 + $0x25c] sm:$0xf0]  ;;  %v3425_v5 = vld [vmem:[#allocation8 + $0xcc] sm:$0xf] }
  0xae   :  { %v208_v31 = vpop.xlane.xlu2 %207  ;;  %v244_v37 = vmul.f32 %v3984_v60, %v205_v30  ;;  %v2708_v30 = vld [vmem:[#allocation8 + $0x228] sm:$0xf0]  ;;  %980 = vmatpush.bf16.msra.mxu3 %v2731_v16  ;;  %994 = vmatpush.bf16.msrb.mxu0 %v2543_v17  ;;  %v2707_v33 = vor.u32 %v3469_v23, %v2706_v20  ;;  %v3400_v16 = vld [vmem:[#allocation8 + $0x4] sm:$0xf]  ;;  %v2444_v17 = vld [vmem:[#allocation8 + $0x18] sm:$0xf0] }
  0xaf   :  { %v285_v42 = vperm.slane %v243_v29, %v3986_v61  ;;  %v245_v3 = vmul.f32 %v3984_v60, %v208_v31  ;;  %v3466_v29 = vld [vmem:[#allocation8 + $0x214] sm:$0xf]  ;;  %v2490_v31 = vld [vmem:[#allocation8 + $0x60] sm:$0xf]  ;;  %v2447_v25 = vor.u32 %v3400_v16, %v2444_v17  ;;  %v3470_v16 = vld [vmem:[#allocation8 + $0x22c] sm:$0xf0] }
  0xb0   :  { %v286_v48 = vperm.slane %v244_v37, %v3986_v61  ;;  %v3463_v37 = vld [vmem:[#allocation8 + $0x1f4] sm:$0xf0]  ;;  %1008 = vmatpush.bf16.msrb.mxu1 %v2735_v26  ;;  %v2491_v47 = vor.u32 %v3415_v35, %v2490_v31  ;;  %v3494_v31 = vld [vmem:[#allocation8 + $0x2ec] sm:$0xf0]  ;;  %v3491_v35 = vld [vmem:[#allocation8 + $0x2dc] sm:$0xf] }
  0xb1   :  { %v306_v54 = vsel %vm305_vm6, %v285_v42, %v304_v49  ;;  %v287_v21 = vperm.slane %v245_v3, %v3986_v61  ;;  %v2711_v42 = vor.u32 %v3466_v29, %v2708_v30  ;;  %967 = vmatpush.bf16.msra.mxu2 %v2515_v28  ;;  %v3460_v49 = vld [vmem:[#allocation8 + $0x1e4] sm:$0xf]  ;;  %v3446_v29 = vld [vmem:[#allocation8 + $0x16c] sm:$0xf0]  ;;  %v2810_v30 = vld [vmem:[#allocation8 + $0x2d8] sm:$0xf] }
  0xb2   :  { %v308_v59 = vsel %vm307_vm7, %v286_v48, %v306_v54  ;;  %v2683_v48 = vor.u32 %v3463_v37, %v2682_v36  ;;  %981 = vmatpush.bf16.msra.mxu3 %v2707_v33  ;;  %995 = vmatpush.bf16.msrb.mxu0 %v2519_v34  ;;  %v2466_v54 = vld [vmem:[#allocation8 + $0x30] sm:$0xf]  ;;  %v2687_v0 = vor.u32 %v3460_v49, %v2684_v50  ;;  %v2620_v34 = vld [vmem:[#allocation8 + $0x170] sm:$0xf0]  ;;  %v2788_v49 = vld [vmem:[#allocation8 + $0x2c0] sm:$0xf0] }
  0xb3   :  { %2436 = vmatmul.msk.f32.vlgmr.msra.gmra.mxu0 %vm316_vm8, %v308_v59  ;;  %2438 = vmatmul.msk.f32.vlgmr.msra.gmra.mxu1 %vm316_vm8, %v308_v59  ;;  %v3406_v59 = vld [vmem:[#allocation8 + $0x34] sm:$0xf]  ;;  %v2467_v3 = vor.u32 %v3409_v55, %v2466_v54  ;;  %v2811_v33 = vor.u32 %v3494_v31, %v2810_v30  ;;  %v2570_v50 = vld [vmem:[#allocation8 + $0xf8] sm:$0xf]  ;;  %v3482_v54 = vld [vmem:[#allocation8 + $0x28c] sm:$0xf0] }
  0xb4   :  { %v211_v7 = vpop.xlane.xlu0 %210  ;;  %1009 = vmatpush.bf16.msrb.mxu1 %v2711_v42  ;;  %v2471_v8 = vor.u32 %v3406_v59, %v2468_v62  ;;  %v2812_v36 = vld [vmem:[#allocation8 + $0x2f0] sm:$0xf0]  ;;  %v2595_v42 = vor.u32 %v3440_v40, %v2594_v39  ;;  %v3479_v59 = vld [vmem:[#allocation8 + $0x27c] sm:$0xf]  ;;  %v3461_v30 = vld [vmem:[#allocation8 + $0x1ec] sm:$0xf] }
  0xb5   :  { %v246_v9 = vmul.f32 %v3984_v60, %v211_v7  ;;  %v214_v10 = vpop.xlane.xlu1 %213  ;;  %968 = vmatpush.bf16.msra.mxu2 %v2491_v47  ;;  %v2659_v7 = vor.u32 %v3457_v58, %v2658_v56  ;;  %v2572_v58 = vld [vmem:[#allocation8 + $0x110] sm:$0xf0]  ;;  %v3419_v17 = vld [vmem:[#allocation8 + $0x9c] sm:$0xf]  ;;  %v3458_v39 = vld [vmem:[#allocation8 + $0x1cc] sm:$0xf0] }
  0xb6   :  { %v217_v11 = vpop.xlane.xlu2 %216  ;;  %v247_v15 = vmul.f32 %v3984_v60, %v214_v10  ;;  %982 = vmatpush.bf16.msra.mxu3 %v2683_v48  ;;  %996 = vmatpush.bf16.msrb.mxu0 %v2495_v53  ;;  %v3403_v10 = vld [vmem:[#allocation8 + $0x14] sm:$0xf0]  ;;  %v3485_v48 = vld [vmem:[#allocation8 + $0x2ac] sm:$0xf]  ;;  %v3407_v40 = vld [vmem:[#allocation8 + $0x3c] sm:$0xf] }
  0xb7   :  { %v288_v22 = vperm.slane %v246_v9, %v3986_v61  ;;  %v248_v27 = vmul.f32 %v3984_v60, %v217_v11  ;;  %v2442_v9 = vld [vmem:[#allocation8] sm:$0xf]  ;;  %v2762_v53 = vld [vmem:[#allocation8 + $0x278] sm:$0xf] }
  0xb8   :  { %v289_v32 = vperm.slane %v247_v15, %v3986_v61  ;;  %v2634_v11 = vld [vmem:[#allocation8 + $0x180] sm:$0xf]  ;;  %1010 = vmatpush.bf16.msrb.mxu1 %v2687_v0  ;;  %v3451_v15 = vld [vmem:[#allocation8 + $0x194] sm:$0xf0]  ;;  %v2443_v20 = vor.u32 %v3403_v10, %v2442_v9  ;;  %v2763_v56 = vor.u32 %v3482_v54, %v2762_v53  ;;  %v2546_v0 = vld [vmem:[#allocation8 + $0xc8] sm:$0xf] }
  0xb9   :  { %v309_v38 = vsel %vm295_vm1, %v288_v22, %v287_v21  ;;  %v290_v43 = vperm.slane %v248_v27, %v3986_v61  ;;  %969 = vmatpush.bf16.msra.mxu2 %v2467_v3  ;;  %v3448_v21 = vld [vmem:[#allocation8 + $0x184] sm:$0xf]  ;;  %v2636_v22 = vld [vmem:[#allocation8 + $0x198] sm:$0xf0]  ;;  %v2635_v24 = vor.u32 %v3451_v15, %v2634_v11  ;;  %v2738_v3 = vld [vmem:[#allocation8 + $0x248] sm:$0xf] }
  0xba   :  { %v310_v51 = vsel %vm297_vm2, %v289_v32, %v309_v38  ;;  %983 = vmatpush.bf16.msra.mxu3 %v2659_v7  ;;  %997 = vmatpush.bf16.msrb.mxu0 %v2471_v8  ;;  %v2639_v27 = vor.u32 %v3448_v21, %v2636_v22  ;;  %v3443_v32 = vld [vmem:[#allocation8 + $0x15c] sm:$0xf]  ;;  %v2815_v38 = vor.u32 %v3491_v35, %v2812_v36  ;;  %v2548_v7 = vld [vmem:[#allocation8 + $0xe0] sm:$0xf0]  ;;  %v3473_v8 = vld [vmem:[#allocation8 + $0x24c] sm:$0xf] }
  0xbb   :  { %v311_v1 = vsel %vm299_vm3, %v290_v43, %v310_v51  ;;  %v2623_v37 = vor.u32 %v3443_v32, %v2620_v34  ;;  %v3488_v43 = vld [vmem:[#allocation8 + $0x2bc] sm:$0xf0]  ;;  %v2791_v51 = vor.u32 %v3485_v48, %v2788_v49  ;;  %v2740_v9 = vld [vmem:[#allocation8 + $0x260] sm:$0xf0]  ;;  %v2739_v10 = vor.u32 %v3476_v4, %v2738_v3  ;;  %v2522_v11 = vld [vmem:[#allocation8 + $0x98] sm:$0xf] }
  0xbc   :  { %v220_v41 = vpop.xlane.xlu0 %219  ;;  %1011 = vmatpush.bf16.msrb.mxu1 %v2663_v14  ;;  %v2743_v14 = vor.u32 %v3473_v8, %v2740_v9  ;;  %v2714_v15 = vld [vmem:[#allocation8 + $0x218] sm:$0xf]  ;;  %v3410_v36 = vld [vmem:[#allocation8 + $0x4c] sm:$0xf0]  ;;  %v2450_v48 = vld [vmem:[#allocation8 + $0x8] sm:$0xf] }
  0xbd   :  { %v249_v44 = vmul.f32 %v3984_v60, %v220_v41  ;;  %v223_v45 = vpop.xlane.xlu1 %222  ;;  %970 = vmatpush.bf16.msra.mxu2 %v2443_v20  ;;  %v2786_v41 = vld [vmem:[#allocation8 + $0x2a8] sm:$0xf]  ;;  %v2716_v20 = vld [vmem:[#allocation8 + $0x230] sm:$0xf0]  ;;  %v2715_v22 = vor.u32 %v3470_v16, %v2714_v15  ;;  %v2474_v35 = vld [vmem:[#allocation8 + $0x38] sm:$0xf] }
  0xbe   :  { %v226_v46 = vpop.xlane.xlu2 %225  ;;  %v250_v52 = vmul.f32 %v3984_v60, %v223_v45  ;;  %984 = vmatpush.bf16.msra.mxu3 %v2635_v24  ;;  %998 = vmatpush.bf16.msrb.mxu0 %v2447_v25  ;;  %v2596_v45 = vld [vmem:[#allocation8 + $0x140] sm:$0xf0]  ;;  %v3416_v24 = vld [vmem:[#allocation8 + $0x7c] sm:$0xf0]  ;;  %v3401_v53 = vld [vmem:[#allocation8 + $0xc] sm:$0xf] }
  0xbf   :  { %v291_v57 = vperm.slane %v249_v44, %v3986_v61  ;;  %v251_v63 = vmul.f32 %v3984_v60, %v226_v46  ;;  %v3437_v44 = vld [vmem:[#allocation8 + $0x12c] sm:$0xf]  ;;  %v2787_v46 = vor.u32 %v3488_v43, %v2786_v41  ;;  %v2476_v41 = vld [vmem:[#allocation8 + $0x50] sm:$0xf0]  ;;  %v3404_v49 = vld [vmem:[#allocation8 + $0x1c] sm:$0xf0] }
  0xc0   :  { %v292_v2 = vperm.slane %v250_v52, %v3986_v61  ;;  %1012 = vmatpush.bf16.msrb.mxu1 %v2639_v27  ;;  %v2599_v47 = vor.u32 %v3437_v44, %v2596_v45  ;;  %v3434_v52 = vld [vmem:[#allocation8 + $0x10c] sm:$0xf0]  ;;  %v2690_v27 = vld [vmem:[#allocation8 + $0x1e8] sm:$0xf]  ;;  %v2479_v43 = vor.u32 %v3407_v40, %v2476_v41  ;;  %v3455_v44 = vld [vmem:[#allocation8 + $0x1bc] sm:$0xf] }
  0xc1   :  { %v312_v6 = vsel %vm301_vm4, %v291_v57, %v311_v1  ;;  %v293_v12 = vperm.slane %v251_v63, %v3986_v61  ;;  %v2571_v55 = vor.u32 %v3434_v52, %v2570_v50  ;;  %v3431_v57 = vld [vmem:[#allocation8 + $0xfc] sm:$0xf]  ;;  %v2764_v63 = vld [vmem:[#allocation8 + $0x290] sm:$0xf0]  ;;  %v3428_v1 = vld [vmem:[#allocation8 + $0xdc] sm:$0xf0] }
  0xc2   :  { %v313_v19 = vsel %vm303_vm5, %v292_v2, %v312_v6  ;;  %1033 = vmatpush.bf16.msrb.mxu3 %v2811_v33  ;;  %1047 = vmatpush.bf16.msra.mxu0 %v2623_v37  ;;  %v2575_v62 = vor.u32 %v3431_v57, %v2572_v58  ;;  %v2767_v2 = vor.u32 %v3479_v59, %v2764_v63  ;;  %v2666_v37 = vld [vmem:[#allocation8 + $0x1b8] sm:$0xf]  ;;  %v2668_v45 = vld [vmem:[#allocation8 + $0x1d0] sm:$0xf0]  ;;  %v2642_v50 = vld [vmem:[#allocation8 + $0x188] sm:$0xf] }
  0xc3   :  { %v314_v26 = vsel %vm305_vm6, %v293_v12, %v313_v19  ;;  %v2547_v6 = vor.u32 %v3428_v1, %v2546_v0  ;;  %v3422_v12 = vld [vmem:[#allocation8 + $0xac] sm:$0xf0]  ;;  %v3467_v19 = vld [vmem:[#allocation8 + $0x21c] sm:$0xf]  ;;  %v3452_v52 = vld [vmem:[#allocation8 + $0x19c] sm:$0xf0] }
  0xc4   :  { %v229_v13 = vpop.xlane.xlu0 %228  ;;  %1061 = vmatpush.bf16.msra.mxu1 %v2815_v38  ;;  %v2523_v21 = vor.u32 %v3422_v12, %v2522_v11  ;;  %v2475_v38 = vor.u32 %v3410_v36, %v2474_v35  ;;  %v2452_v54 = vld [vmem:[#allocation8 + $0x20] sm:$0xf0]  ;;  %v3449_v57 = vld [vmem:[#allocation8 + $0x18c] sm:$0xf]  ;;  %v2626_v4 = vld [vmem:[#allocation8 + $0x160] sm:$0xf] }
  0xc5   :  { %v252_v18 = vmul.f32 %v3984_v60, %v229_v13  ;;  %v2618_v60 = vld [vmem:[#allocation8 + $0x158] sm:$0xf]  ;;  %v2551_v13 = vor.u32 %v3425_v5, %v2548_v7  ;;  %v2644_v58 = vld [vmem:[#allocation8 + $0x1a0] sm:$0xf0]  ;;  %v2818_v8 = vld [vmem:[#allocation8 + $0x2e0] sm:$0xf] }
  0xc6   :  { %1034 = vmatpush.bf16.msrb.mxu3 %v2787_v46  ;;  %1048 = vmatpush.bf16.msra.mxu0 %v2599_v47  ;;  %v255_v46 = vld [vmem:[#allocation7] sm:$0x3]  ;;  %v2671_v47 = vor.u32 %v3455_v44, %v2668_v45  ;;  %v2647_v63 = vor.u32 %v3449_v57, %v2644_v58  ;;  %v3447_v5 = vld [vmem:[#allocation8 + $0x174] sm:$0xf0]  ;;  %v2602_v16 = vld [vmem:[#allocation8 + $0x130] sm:$0xf] }
  0xc7   :  { %v294_v23 = vperm.slane %v252_v18, %v3986_v61  ;;  %v2619_v61 = vor.u32 %v3446_v29, %v2618_v60  ;;  %v2524_v18 = vld [vmem:[#allocation8 + $0xb0] sm:$0xf0]  ;;  %v3413_v60 = vld [vmem:[#allocation8 + $0x6c] sm:$0xf]  ;;  %v2500_v29 = vld [vmem:[#allocation8 + $0x80] sm:$0xf0] }
  0xc8   :  { %1062 = vmatpush.bf16.msra.mxu1 %v2791_v51  ;;  %v2527_v25 = vor.u32 %v3419_v17, %v2524_v18  ;;  %v2503_v33 = vor.u32 %v3413_v60, %v2500_v29  ;;  %v2451_v51 = vor.u32 %v3404_v49, %v2450_v48  ;;  %v257_v59 = vperm.slane %v255_v46, 0  ;;  %v3495_v9 = vld [vmem:[#allocation8 + $0x2f4] sm:$0xf0]  ;;  %v2820_v15 = vld [vmem:[#allocation8 + $0x2f8] sm:$0xf0] }
  0xc9   :  { %v315_v28 = vsel %vm307_vm7, %v294_v23, %v314_v26  ;;  %1019 = vmatpush.bf16.msrb.mxu2 %v2619_v61  ;;  %v2498_v23 = vld [vmem:[#allocation8 + $0x68] sm:$0xf]  ;;  %v2719_v26 = vor.u32 %v3467_v19, %v2716_v20  ;;  %v2692_v61 = vld [vmem:[#allocation8 + $0x200] sm:$0xf0]  ;;  %v2627_v19 = vor.u32 %v3447_v5, %v2626_v4  ;;  %v2819_v20 = vor.u32 %v3495_v9, %v2818_v8  ;;  %v2796_v60 = vld [vmem:[#allocation8 + $0x2c8] sm:$0xf0] }
  0xca   :  { %2437 = vmatmul.msk.f32.gmra.mxu0 %vm316_vm8, %v315_v28  ;;  %2439 = vmatmul.msk.f32.gmra.mxu1 %vm316_vm8, %v315_v28  ;;  %v3464_v28 = vld [vmem:[#allocation8 + $0x1fc] sm:$0xf0]  ;;  %v2499_v31 = vor.u32 %v3416_v24, %v2498_v23  ;;  %v2695_v34 = vor.u32 %v3461_v30, %v2692_v61  ;;  %v3483_v35 = vld [vmem:[#allocation8 + $0x294] sm:$0xf0]  ;;  %v3432_v36 = vld [vmem:[#allocation8 + $0x104] sm:$0xf] }
  0xcb   :  { %1035 = vmatpush.bf16.msrb.mxu3 %v2763_v56  ;;  %1049 = vmatpush.bf16.msra.mxu0 %v2575_v62  ;;  %v2691_v32 = vor.u32 %v3464_v28, %v2690_v27  ;;  %v2455_v56 = vor.u32 %v3401_v53, %v2452_v54  ;;  %v258_v62 = vperm.slane %v255_v46, 1  ;;  %v2604_v27 = vld [vmem:[#allocation8 + $0x148] sm:$0xf0]  ;;  %v3486_v28 = vld [vmem:[#allocation8 + $0x2b4] sm:$0xf] }
  0xcc   :  { %1063 = vmatpush.bf16.msra.mxu1 %v2767_v2  ;;  %v2578_v61 = vld [vmem:[#allocation8 + $0x100] sm:$0xf]  ;;  %v2746_v46 = vld [vmem:[#allocation8 + $0x250] sm:$0xf]  ;;  %v3426_v48 = vld [vmem:[#allocation8 + $0xd4] sm:$0xf] }
  0xcd   :  { %1020 = vmatpush.bf16.msrb.mxu2 %v2595_v42  ;;  %v2667_v42 = vor.u32 %v3458_v39, %v2666_v37  ;;  %v2580_v37 = vld [vmem:[#allocation8 + $0x118] sm:$0xf0]  ;;  %v2556_v49 = vld [vmem:[#allocation8 + $0xe8] sm:$0xf0]  ;;  %v2530_v54 = vld [vmem:[#allocation8 + $0xa0] sm:$0xf] }
  0xce   :  { %v2772_v39 = vld [vmem:[#allocation8 + $0x298] sm:$0xf0]  ;;  %v2583_v44 = vor.u32 %v3432_v36, %v2580_v37  ;;  %v2722_v58 = vld [vmem:[#allocation8 + $0x220] sm:$0xf]  ;;  %v2506_v4 = vld [vmem:[#allocation8 + $0x70] sm:$0xf] }
  0xcf   :  { %1036 = vmatpush.bf16.msrb.mxu3 %v2739_v10  ;;  %1050 = vmatpush.bf16.msra.mxu0 %v2551_v13  ;;  %v3444_v10 = vld [vmem:[#allocation8 + $0x164] sm:$0xf]  ;;  %v2628_v13 = vld [vmem:[#allocation8 + $0x178] sm:$0xf0]  ;;  %v3417_v5 = vld [vmem:[#allocation8 + $0x84] sm:$0xf0] }
  0xd0   :  { %1064 = vmatpush.bf16.msra.mxu1 %v2743_v14  ;;  %v3492_v14 = vld [vmem:[#allocation8 + $0x2e4] sm:$0xf]  ;;  %v2631_v23 = vor.u32 %v3444_v10, %v2628_v13  ;;  %v2698_v8 = vld [vmem:[#allocation8 + $0x1f0] sm:$0xf]  ;;  %v3465_v9 = vld [vmem:[#allocation8 + $0x204] sm:$0xf0] }
  0xd1   :  { %1021 = vmatpush.bf16.msrb.mxu2 %v2571_v55  ;;  %v2643_v55 = vor.u32 %v3452_v52, %v2642_v50  ;;  %v2823_v24 = vor.u32 %v3492_v14, %v2820_v15  ;;  %v3474_v50 = vld [vmem:[#allocation8 + $0x254] sm:$0xf]  ;;  %v2700_v13 = vld [vmem:[#allocation8 + $0x208] sm:$0xf0]  ;;  %v2507_v14 = vor.u32 %v3417_v5, %v2506_v4  ;;  %v2699_v15 = vor.u32 %v3465_v9, %v2698_v8  ;;  %v3522_v4 = vld [vmem:[#allocation11 + $0xd4] sm:$0xf] }
  0xd2   :  { %v3414_v10 = vld [vmem:[#allocation8 + $0x74] sm:$0xf]  ;;  %v2652_v37 = vld [vmem:[#allocation8 + $0x1a8] sm:$0xf0]  ;;  %v2932_v5 = vld [vmem:[#allocation11 + $0xd8] sm:$0xf0] }
  0xd3   :  { %1037 = vmatpush.bf16.msrb.mxu3 %v2715_v22  ;;  %1051 = vmatpush.bf16.msra.mxu0 %v2527_v25  ;;  %v2794_v22 = vld [vmem:[#allocation8 + $0x2b0] sm:$0xf]  ;;  %v3489_v25 = vld [vmem:[#allocation8 + $0x2c4] sm:$0xf0]  ;;  %v3450_v36 = vld [vmem:[#allocation8 + $0x194] sm:$0xf] }
  0xd4   :  { %1065 = vmatpush.bf16.msra.mxu1 %v2719_v26  ;;  %v3438_v26 = vld [vmem:[#allocation8 + $0x134] sm:$0xf]  ;;  %v2795_v30 = vor.u32 %v3489_v25, %v2794_v22  ;;  %v2674_v22 = vld [vmem:[#allocation8 + $0x1c0] sm:$0xf]  ;;  %v2484_v25 = vld [vmem:[#allocation8 + $0x58] sm:$0xf0] }
  0xd5   :  { %1022 = vmatpush.bf16.msrb.mxu2 %v2547_v6  ;;  %v2922_v8 = vld [vmem:[#allocation11 + $0xc0] sm:$0xf]  ;;  %v2866_v9 = vld [vmem:[#allocation11 + $0x50] sm:$0xf] }
  0xd7   :  { %1038 = vmatpush.bf16.msrb.mxu3 %v2691_v32  ;;  %1052 = vmatpush.bf16.msra.mxu0 %v2503_v33  ;;  %v2607_v32 = vor.u32 %v3438_v26, %v2604_v27  ;;  %v2799_v33 = vor.u32 %v3486_v28, %v2796_v60  ;;  %v3456_v26 = vld [vmem:[#allocation8 + $0x1c4] sm:$0xf]  ;;  %v2676_v27 = vld [vmem:[#allocation8 + $0x1d8] sm:$0xf0] }
  0xd8   :  { %1066 = vmatpush.bf16.msra.mxu1 %v2695_v34  ;;  %v2770_v34 = vld [vmem:[#allocation8 + $0x280] sm:$0xf] }
  0xd9   :  { %1023 = vmatpush.bf16.msrb.mxu2 %v2523_v21  ;;  %v3441_v21 = vld [vmem:[#allocation8 + $0x144] sm:$0xf0]  ;;  %v2771_v41 = vor.u32 %v3483_v35, %v2770_v34  ;;  %v3402_v34 = vld [vmem:[#allocation8 + $0x14] sm:$0xf]  ;;  %v2460_v35 = vld [vmem:[#allocation8 + $0x28] sm:$0xf0] }
  0xda   :  { %v2603_v29 = vor.u32 %v3441_v21, %v2602_v16  ;;  %v2482_v16 = vld [vmem:[#allocation8 + $0x40] sm:$0xf] }
  0xdb   :  { %1039 = vmatpush.bf16.msrb.mxu3 %v2667_v42  ;;  %1053 = vmatpush.bf16.msra.mxu0 %v2479_v43  ;;  %v2554_v42 = vld [vmem:[#allocation8 + $0xd0] sm:$0xf]  ;;  %v3429_v43 = vld [vmem:[#allocation8 + $0xe4] sm:$0xf0] }
  0xdc   :  { %1067 = vmatpush.bf16.msra.mxu1 %v2671_v47  ;;  %v3477_v47 = vld [vmem:[#allocation8 + $0x264] sm:$0xf0]  ;;  %v2555_v52 = vor.u32 %v3429_v43, %v2554_v42 }
  0xdd   :  { %1024 = vmatpush.bf16.msrb.mxu2 %v2499_v31  ;;  %v3435_v31 = vld [vmem:[#allocation8 + $0x114] sm:$0xf0]  ;;  %v2747_v53 = vor.u32 %v3477_v47, %v2746_v46  ;;  %v2938_v46 = vld [vmem:[#allocation11 + $0xe0] sm:$0xf] }
  0xde   :  { %v2579_v40 = vor.u32 %v3435_v31, %v2578_v61  ;;  %v2650_v61 = vld [vmem:[#allocation8 + $0x190] sm:$0xf]  ;;  %v2882_v47 = vld [vmem:[#allocation11 + $0x70] sm:$0xf] }
  0xdf   :  { %1040 = vmatpush.bf16.msrb.mxu3 %v2643_v55  ;;  %1054 = vmatpush.bf16.msra.mxu0 %v2455_v56  ;;  %v3423_v55 = vld [vmem:[#allocation8 + $0xb4] sm:$0xf0]  ;;  %v2559_v56 = vor.u32 %v3426_v48, %v2556_v49 }
  0xe0   :  { %1068 = vmatpush.bf16.msra.mxu1 %v2647_v63  ;;  %v2532_v63 = vld [vmem:[#allocation8 + $0xb8] sm:$0xf0] }
  0xe1   :  { %1025 = vmatpush.bf16.msrb.mxu2 %v2475_v38  ;;  %v3480_v38 = vld [vmem:[#allocation8 + $0x284] sm:$0xf] }
  0xe2   :  { %v2775_v45 = vor.u32 %v3480_v38, %v2772_v39  ;;  %v2946_v38 = vld [vmem:[#allocation11 + $0xf0] sm:$0xf]  ;;  %v3527_v39 = vld [vmem:[#allocation11 + $0xf4] sm:$0xf0] }
  0xe3   :  { %v2947_v48 = vor.u32 %v3527_v39, %v2946_v38  ;;  %v3516_v38 = vld [vmem:[#allocation11 + $0xa4] sm:$0xf]  ;;  %v2908_v39 = vld [vmem:[#allocation11 + $0xa8] sm:$0xf0] }
  0xe5   :  { %1026 = vmatpush.bf16.msrb.mxu2 %v2451_v51  ;;  %v2748_v51 = vld [vmem:[#allocation8 + $0x268] sm:$0xf0] }
  0xe6   :  { %v2751_v57 = vor.u32 %v3474_v50, %v2748_v51  ;;  %v3511_v50 = vld [vmem:[#allocation11 + $0x74] sm:$0xf0]  ;;  %v3510_v51 = vld [vmem:[#allocation11 + $0x74] sm:$0xf] }
 0x130   :  { %v338_v0 = vpop.f32.mrf.mxu0  ;;  %v361_v1 = vpop.f32.mrf.mxu1 }
 0x131   :  { %v339_v2 = vadd.f32 %v338_v0, %v257_v59  ;;  %v362_v3 = vadd.f32 %v361_v1, %v258_v62  ;;  %v3468_v0 = vld [vmem:[#allocation8 + $0x224] sm:$0xf]  ;;  %v2724_v1 = vld [vmem:[#allocation8 + $0x238] sm:$0xf0] }
 0x133   :  { %367 = vst [vmem:[#allocation16] sm:$0xff] %v339_v2 }
 0x134   :  { %368 = vst [vmem:[#allocation16 + $0x8] sm:$0xff] %v362_v3 }
 0x147   :  { %v341_v6 = vpop.f32.mrf.mxu0  ;;  %v364_v7 = vpop.f32.mrf.mxu1 }
 0x148   :  { %v342_v11 = vadd.f32 %v341_v6, %v257_v59  ;;  %v365_v12 = vadd.f32 %v364_v7, %v258_v62  ;;  %v3471_v59 = vld [vmem:[#allocation8 + $0x234] sm:$0xf0]  ;;  %v3420_v62 = vld [vmem:[#allocation8 + $0xa4] sm:$0xf]  ;;  %v2727_v7 = vor.u32 %v3468_v0, %v2724_v1  ;;  %v3509_v0 = vld [vmem:[#allocation11 + $0x64] sm:$0xf0] }
 0x149   :  { %v2535_v6 = vor.u32 %v3420_v62, %v2532_v63  ;;  %v3508_v1 = vld [vmem:[#allocation11 + $0x64] sm:$0xf] }
 0x14a   :  { %369 = vst [vmem:[#allocation16 + $0x18] sm:$0xff] %v342_v11  ;;  %v4038_v17 = vpack.c.bf16 %v342_v11, %v339_v2  ;;  %v4040_v18 = vpack.c.bf16 %v365_v12, %v362_v3  ;;  %v2531_v2 = vor.u32 %v3423_v55, %v2530_v54  ;;  %v2723_v3 = vor.u32 %v3471_v59, %v2722_v58  ;;  %v2508_v11 = vld [vmem:[#allocation8 + $0x88] sm:$0xf0]  ;;  %v2940_v55 = vld [vmem:[#allocation11 + $0xe8] sm:$0xf0] }
 0x14b   :  { %370 = vst [vmem:[#allocation16 + $0x20] sm:$0xff] %v365_v12  ;;  %v3462_v12 = vld [vmem:[#allocation8 + $0x1f4] sm:$0xf]  ;;  %v3524_v54 = vld [vmem:[#allocation11 + $0xe4] sm:$0xf] }
 0x14c   :  { %971 = vmatmul.bf16.vlgmr.msra.gmra.mxu2 %v4038_v17  ;;  %985 = vmatmul.bf16.vlgmr.msra.gmra.mxu3 %v4040_v18  ;;  %v2703_v21 = vor.u32 %v3462_v12, %v2700_v13  ;;  %v2930_v58 = vld [vmem:[#allocation11 + $0xd0] sm:$0xf]  ;;  %v2874_v59 = vld [vmem:[#allocation11 + $0x60] sm:$0xf]  ;;  %v2943_v63 = vor.u32 %v3524_v54, %v2940_v55  ;;  %v3507_v12 = vld [vmem:[#allocation11 + $0x54] sm:$0xf0] }
 0x14d   :  { %999 = vmatmul.bf16.vlgmr.msrb.gmra.mxu0 %v4038_v17  ;;  %1013 = vmatmul.bf16.vlgmr.msrb.gmra.mxu1 %v4040_v18  ;;  %v3506_v13 = vld [vmem:[#allocation11 + $0x54] sm:$0xf]  ;;  %v2890_v54 = vld [vmem:[#allocation11 + $0x80] sm:$0xf]  ;;  %v3513_v55 = vld [vmem:[#allocation11 + $0x84] sm:$0xf0] }
 0x14e   :  { %1075 = vmatpush.bf16.msra.mxu2 %v2627_v19  ;;  %1089 = vmatpush.bf16.msra.mxu3 %v2819_v20  ;;  %v3411_v19 = vld [vmem:[#allocation8 + $0x54] sm:$0xf0]  ;;  %v2511_v20 = vor.u32 %v3414_v10, %v2508_v11  ;;  %v2935_v11 = vor.u32 %v3522_v4, %v2932_v5  ;;  %v3076_v5 = vld [vmem:[#allocation11 + $0x1f8] sm:$0xf0] }
 0x14f   :  { %1103 = vmatpush.bf16.msrb.mxu0 %v2631_v23  ;;  %1117 = vmatpush.bf16.msrb.mxu1 %v2823_v24  ;;  %v3459_v23 = vld [vmem:[#allocation8 + $0x1d4] sm:$0xf0]  ;;  %v3408_v24 = vld [vmem:[#allocation8 + $0x44] sm:$0xf]  ;;  %v2483_v28 = vor.u32 %v3411_v19, %v2482_v16  ;;  %v3520_v16 = vld [vmem:[#allocation11 + $0xc4] sm:$0xf] }
 0x150   :  { %v2675_v60 = vor.u32 %v3459_v23, %v2674_v22  ;;  %v2487_v31 = vor.u32 %v3408_v24, %v2484_v25  ;;  %v2924_v19 = vld [vmem:[#allocation11 + $0xc8] sm:$0xf0]  ;;  %v3505_v24 = vld [vmem:[#allocation11 + $0x44] sm:$0xf0]  ;;  %v3504_v25 = vld [vmem:[#allocation11 + $0x44] sm:$0xf] }
 0x151   :  { %v2927_v23 = vor.u32 %v3520_v16, %v2924_v19  ;;  %v3558_v4 = vld [vmem:[#allocation11 + $0x1f4] sm:$0xf] }
 0x152   :  { %1076 = vmatpush.bf16.msra.mxu2 %v2603_v29  ;;  %1090 = vmatpush.bf16.msra.mxu3 %v2795_v30  ;;  %v2458_v29 = vld [vmem:[#allocation8 + $0x10] sm:$0xf]  ;;  %v3405_v30 = vld [vmem:[#allocation8 + $0x24] sm:$0xf0]  ;;  %v3079_v19 = vor.u32 %v3558_v4, %v3076_v5 }
 0x153   :  { %1104 = vmatpush.bf16.msrb.mxu0 %v2607_v32  ;;  %1118 = vmatpush.bf16.msrb.mxu1 %v2799_v33  ;;  %v2679_v32 = vor.u32 %v3456_v26, %v2676_v27  ;;  %v3453_v33 = vld [vmem:[#allocation8 + $0x1a4] sm:$0xf0]  ;;  %v2459_v42 = vor.u32 %v3405_v30, %v2458_v29  ;;  %v2860_v26 = vld [vmem:[#allocation11 + $0x48] sm:$0xf0]  ;;  %v3519_v27 = vld [vmem:[#allocation11 + $0xb4] sm:$0xf0] }
 0x154   :  { %v2651_v43 = vor.u32 %v3453_v33, %v2650_v61  ;;  %v2863_v30 = vor.u32 %v3504_v25, %v2860_v26  ;;  %v2906_v61 = vld [vmem:[#allocation11 + $0xa0] sm:$0xf]  ;;  %v3548_v4 = vld [vmem:[#allocation11 + $0x1a4] sm:$0xf] }
 0x156   :  { %1077 = vmatpush.bf16.msra.mxu2 %v2579_v40  ;;  %1091 = vmatpush.bf16.msra.mxu3 %v2771_v41  ;;  %v3526_v40 = vld [vmem:[#allocation11 + $0xf4] sm:$0xf]  ;;  %v2948_v41 = vld [vmem:[#allocation11 + $0xf8] sm:$0xf0] }
 0x157   :  { %1105 = vmatpush.bf16.msrb.mxu0 %v2583_v44  ;;  %1119 = vmatpush.bf16.msrb.mxu1 %v2775_v45  ;;  %v2463_v44 = vor.u32 %v3402_v34, %v2460_v35  ;;  %v2655_v45 = vor.u32 %v3450_v36, %v2652_v37  ;;  %v2951_v49 = vor.u32 %v3526_v40, %v2948_v41  ;;  %v3503_v34 = vld [vmem:[#allocation11 + $0x34] sm:$0xf0]  ;;  %v3502_v35 = vld [vmem:[#allocation11 + $0x34] sm:$0xf]  ;;  %v2852_v36 = vld [vmem:[#allocation11 + $0x38] sm:$0xf0] }
 0x158   :  { %v3517_v37 = vld [vmem:[#allocation11 + $0xa4] sm:$0xf0]  ;;  %v2855_v41 = vor.u32 %v3502_v35, %v2852_v36  ;;  %v3060_v35 = vld [vmem:[#allocation11 + $0x1d8] sm:$0xf0] }
 0x15a   :  { %1078 = vmatpush.bf16.msra.mxu2 %v2555_v52  ;;  %1092 = vmatpush.bf16.msra.mxu3 %v2747_v53  ;;  %v2884_v52 = vld [vmem:[#allocation11 + $0x78] sm:$0xf0]  ;;  %v3525_v53 = vld [vmem:[#allocation11 + $0xe4] sm:$0xf0] }
 0x15b   :  { %1106 = vmatpush.bf16.msrb.mxu0 %v2559_v56  ;;  %1120 = vmatpush.bf16.msrb.mxu1 %v2751_v57  ;;  %v2883_v56 = vor.u32 %v3511_v50, %v2882_v47  ;;  %v2887_v57 = vor.u32 %v3510_v51, %v2884_v52  ;;  %v2939_v62 = vor.u32 %v3525_v53, %v2938_v46  ;;  %v3501_v46 = vld [vmem:[#allocation11 + $0x24] sm:$0xf0]  ;;  %v3500_v47 = vld [vmem:[#allocation11 + $0x24] sm:$0xf]  ;;  %v3514_v50 = vld [vmem:[#allocation11 + $0x94] sm:$0xf] }
 0x15c   :  { %1027 = vmatmul.bf16.vlgmr.msrb.gmra.mxu2 %v4038_v17  ;;  %1041 = vmatmul.bf16.vlgmr.msrb.gmra.mxu3 %v4040_v18  ;;  %v2900_v51 = vld [vmem:[#allocation11 + $0x98] sm:$0xf0] }
 0x15d   :  { %1055 = vmatmul.bf16.vlgmr.msra.gmra.mxu0 %v4038_v17  ;;  %1069 = vmatmul.bf16.vlgmr.msra.gmra.mxu1 %v4040_v18 }
 0x15e   :  { %1079 = vmatpush.bf16.msra.mxu2 %v2531_v2  ;;  %1093 = vmatpush.bf16.msra.mxu3 %v2723_v3  ;;  %v2876_v2 = vld [vmem:[#allocation11 + $0x68] sm:$0xf0]  ;;  %v3523_v3 = vld [vmem:[#allocation11 + $0xd4] sm:$0xf0] }
 0x15f   :  { %1107 = vmatpush.bf16.msrb.mxu0 %v2535_v6  ;;  %1121 = vmatpush.bf16.msrb.mxu1 %v2727_v7  ;;  %v2875_v6 = vor.u32 %v3509_v0, %v2874_v59  ;;  %v2879_v7 = vor.u32 %v3508_v1, %v2876_v2  ;;  %v2931_v10 = vor.u32 %v3523_v3, %v2930_v58  ;;  %v3499_v59 = vld [vmem:[#allocation11 + $0x14] sm:$0xf0]  ;;  %v3512_v0 = vld [vmem:[#allocation11 + $0x84] sm:$0xf]  ;;  %v2892_v1 = vld [vmem:[#allocation11 + $0x88] sm:$0xf0] }
 0x160   :  { %v2903_v58 = vor.u32 %v3514_v50, %v2900_v51  ;;  %v3074_v2 = vld [vmem:[#allocation11 + $0x1f0] sm:$0xf]  ;;  %v3559_v3 = vld [vmem:[#allocation11 + $0x1f4] sm:$0xf0]  ;;  %v2996_v50 = vld [vmem:[#allocation11 + $0x158] sm:$0xf0] }
 0x161   :  { %v3075_v16 = vor.u32 %v3559_v3, %v3074_v2  ;;  %v3034_v2 = vld [vmem:[#allocation11 + $0x1a0] sm:$0xf]  ;;  %v3549_v3 = vld [vmem:[#allocation11 + $0x1a4] sm:$0xf0] }
 0x162   :  { %1080 = vmatpush.bf16.msra.mxu2 %v2507_v14  ;;  %1094 = vmatpush.bf16.msra.mxu3 %v2699_v15  ;;  %v2868_v14 = vld [vmem:[#allocation11 + $0x58] sm:$0xf0]  ;;  %v3521_v15 = vld [vmem:[#allocation11 + $0xc4] sm:$0xf0]  ;;  %v3035_v5 = vor.u32 %v3549_v3, %v3034_v2 }
 0x163   :  { %1108 = vmatpush.bf16.msrb.mxu0 %v2511_v20  ;;  %1122 = vmatpush.bf16.msrb.mxu1 %v2703_v21  ;;  %v2914_v20 = vld [vmem:[#allocation11 + $0xb0] sm:$0xf]  ;;  %v2858_v21 = vld [vmem:[#allocation11 + $0x40] sm:$0xf]  ;;  %v2923_v22 = vor.u32 %v3521_v15, %v2922_v8 }
 0x164   :  { %v2859_v29 = vor.u32 %v3505_v24, %v2858_v21  ;;  %v2826_v8 = vld [vmem:[#allocation11] sm:$0xf]  ;;  %v3010_v15 = vld [vmem:[#allocation11 + $0x170] sm:$0xf]  ;;  %v3557_v21 = vld [vmem:[#allocation11 + $0x1e4] sm:$0xf0] }
 0x166   :  { %1081 = vmatpush.bf16.msra.mxu2 %v2483_v28  ;;  %1095 = vmatpush.bf16.msra.mxu3 %v2675_v60  ;;  %v3518_v28 = vld [vmem:[#allocation11 + $0xb4] sm:$0xf]  ;;  %v2916_v60 = vld [vmem:[#allocation11 + $0xb8] sm:$0xf0] }
 0x167   :  { %1109 = vmatpush.bf16.msrb.mxu0 %v2487_v31  ;;  %1123 = vmatpush.bf16.msrb.mxu1 %v2679_v32  ;;  %v2850_v31 = vld [vmem:[#allocation11 + $0x30] sm:$0xf]  ;;  %v2915_v32 = vor.u32 %v3519_v27, %v2914_v20  ;;  %v2919_v33 = vor.u32 %v3518_v28, %v2916_v60  ;;  %v3012_v20 = vld [vmem:[#allocation11 + $0x178] sm:$0xf0]  ;;  %v3002_v60 = vld [vmem:[#allocation11 + $0x160] sm:$0xf] }
 0x168   :  { %v2851_v40 = vor.u32 %v3503_v34, %v2850_v31  ;;  %v3058_v28 = vld [vmem:[#allocation11 + $0x1d0] sm:$0xf]  ;;  %v3540_v31 = vld [vmem:[#allocation11 + $0x164] sm:$0xf]  ;;  %v3554_v34 = vld [vmem:[#allocation11 + $0x1d4] sm:$0xf] }
 0x16a   :  { %1082 = vmatpush.bf16.msra.mxu2 %v2459_v42  ;;  %1096 = vmatpush.bf16.msra.mxu3 %v2651_v43  ;;  %v2898_v42 = vld [vmem:[#allocation11 + $0x90] sm:$0xf]  ;;  %v2842_v43 = vld [vmem:[#allocation11 + $0x20] sm:$0xf] }
 0x16b   :  { %1110 = vmatpush.bf16.msrb.mxu0 %v2463_v44  ;;  %1124 = vmatpush.bf16.msrb.mxu1 %v2655_v45  ;;  %v2907_v44 = vor.u32 %v3517_v37, %v2906_v61  ;;  %v2911_v45 = vor.u32 %v3516_v38, %v2908_v39  ;;  %v2843_v52 = vor.u32 %v3501_v46, %v2842_v43  ;;  %v3541_v61 = vld [vmem:[#allocation11 + $0x164] sm:$0xf0]  ;;  %v2994_v46 = vld [vmem:[#allocation11 + $0x150] sm:$0xf] }
 0x16c   :  { %v3003_v36 = vor.u32 %v3541_v61, %v3002_v60  ;;  %v3063_v39 = vor.u32 %v3554_v34, %v3060_v35  ;;  %v2962_v61 = vld [vmem:[#allocation11 + $0x110] sm:$0xf]  ;;  %v2964_v34 = vld [vmem:[#allocation11 + $0x118] sm:$0xf0] }
 0x16d   :  { %1083 = vmatmul.bf16.vlgmr.msra.gmra.mxu2 %v4038_v17  ;;  %1097 = vmatmul.bf16.vlgmr.msra.gmra.mxu3 %v4040_v18 }
 0x16e   :  { %1351 = vmatpush.bf16.msrb.mxu3 %v2947_v48  ;;  %1111 = vmatmul.bf16.vlgmr.msrb.gmra.mxu0 %v4038_v17  ;;  %v2867_v17 = vor.u32 %v3507_v12, %v2866_v9  ;;  %v2844_v48 = vld [vmem:[#allocation11 + $0x28] sm:$0xf0]  ;;  %v3497_v9 = vld [vmem:[#allocation11 + $0x4] sm:$0xf0]  ;;  %v3066_v12 = vld [vmem:[#allocation11 + $0x1e0] sm:$0xf] }
 0x16f   :  { %1379 = vmatpush.bf16.msra.mxu1 %v2951_v49  ;;  %1337 = vmatpush.bf16.msrb.mxu2 %v2883_v56  ;;  %v3515_v49 = vld [vmem:[#allocation11 + $0x94] sm:$0xf0]  ;;  %v2847_v53 = vor.u32 %v3500_v47, %v2844_v48  ;;  %v2834_v56 = vld [vmem:[#allocation11 + $0x10] sm:$0xf]  ;;  %v2827_v24 = vor.u32 %v3497_v9, %v2826_v8  ;;  %v3538_v48 = vld [vmem:[#allocation11 + $0x154] sm:$0xf] }
 0x170   :  { %1125 = vmatmul.bf16.vlgmr.msrb.gmra.mxu1 %v4040_v18  ;;  %1365 = vmatpush.bf16.msra.mxu0 %v2887_v57  ;;  %v2871_v18 = vor.u32 %v3506_v13, %v2868_v14  ;;  %v2899_v57 = vor.u32 %v3515_v49, %v2898_v42  ;;  %v3496_v13 = vld [vmem:[#allocation11 + $0x4] sm:$0xf]  ;;  %v2828_v14 = vld [vmem:[#allocation11 + $0x8] sm:$0xf0]  ;;  %v3539_v47 = vld [vmem:[#allocation11 + $0x154] sm:$0xf0]  ;;  %v2999_v51 = vor.u32 %v3538_v48, %v2996_v50 }
 0x171   :  { %v2831_v25 = vor.u32 %v3496_v13, %v2828_v14  ;;  %v3552_v42 = vld [vmem:[#allocation11 + $0x1c4] sm:$0xf]  ;;  %v2995_v49 = vor.u32 %v3539_v47, %v2994_v46  ;;  %v2978_v8 = vld [vmem:[#allocation11 + $0x130] sm:$0xf]  ;;  %v3535_v9 = vld [vmem:[#allocation11 + $0x134] sm:$0xf0] }
 0x172   :  { %1352 = vmatpush.bf16.msrb.mxu3 %v2939_v62  ;;  %v3498_v62 = vld [vmem:[#allocation11 + $0x14] sm:$0xf]  ;;  %v3026_v14 = vld [vmem:[#allocation11 + $0x190] sm:$0xf] }
 0x173   :  { %1380 = vmatpush.bf16.msra.mxu1 %v2943_v63  ;;  %1338 = vmatpush.bf16.msrb.mxu2 %v2875_v6  ;;  %v2836_v63 = vld [vmem:[#allocation11 + $0x18] sm:$0xf0]  ;;  %v2835_v6 = vor.u32 %v3499_v59, %v2834_v56  ;;  %v3537_v59 = vld [vmem:[#allocation11 + $0x144] sm:$0xf0] }
 0x174   :  { %1366 = vmatpush.bf16.msra.mxu0 %v2879_v7  ;;  %v2839_v7 = vor.u32 %v3498_v62, %v2836_v63  ;;  %v3044_v56 = vld [vmem:[#allocation11 + $0x1b8] sm:$0xf0]  ;;  %v3536_v63 = vld [vmem:[#allocation11 + $0x144] sm:$0xf] }
 0x176   :  { %1353 = vmatpush.bf16.msrb.mxu3 %v2931_v10  ;;  %v2891_v10 = vor.u32 %v3513_v55, %v2890_v54  ;;  %v3550_v54 = vld [vmem:[#allocation11 + $0x1b4] sm:$0xf] }
 0x177   :  { %1381 = vmatpush.bf16.msra.mxu1 %v2935_v11  ;;  %1339 = vmatpush.bf16.msrb.mxu2 %v2867_v17  ;;  %v2895_v11 = vor.u32 %v3512_v0, %v2892_v1  ;;  %v3543_v17 = vld [vmem:[#allocation11 + $0x174] sm:$0xf0]  ;;  %v2988_v0 = vld [vmem:[#allocation11 + $0x148] sm:$0xf0] }
 0x178   :  { %1367 = vmatpush.bf16.msra.mxu0 %v2871_v18  ;;  %v3542_v18 = vld [vmem:[#allocation11 + $0x174] sm:$0xf]  ;;  %v3011_v26 = vor.u32 %v3543_v17, %v3010_v15  ;;  %v2991_v1 = vor.u32 %v3536_v63, %v2988_v0  ;;  %v3547_v15 = vld [vmem:[#allocation11 + $0x194] sm:$0xf0]  ;;  %v3028_v17 = vld [vmem:[#allocation11 + $0x198] sm:$0xf0] }
 0x179   :  { %v3015_v27 = vor.u32 %v3542_v18, %v3012_v20  ;;  %v2970_v20 = vld [vmem:[#allocation11 + $0x120] sm:$0xf] }
 0x17a   :  { %1354 = vmatpush.bf16.msrb.mxu3 %v2923_v22  ;;  %v3556_v22 = vld [vmem:[#allocation11 + $0x1e4] sm:$0xf] }
 0x17b   :  { %1382 = vmatpush.bf16.msra.mxu1 %v2927_v23  ;;  %1340 = vmatpush.bf16.msrb.mxu2 %v2859_v29  ;;  %v3068_v23 = vld [vmem:[#allocation11 + $0x1e8] sm:$0xf0]  ;;  %v3067_v29 = vor.u32 %v3557_v21, %v3066_v12  ;;  %v2980_v12 = vld [vmem:[#allocation11 + $0x138] sm:$0xf0]  ;;  %v3533_v21 = vld [vmem:[#allocation11 + $0x124] sm:$0xf0] }
 0x17c   :  { %1368 = vmatpush.bf16.msra.mxu0 %v2863_v30  ;;  %v3071_v30 = vor.u32 %v3556_v22, %v3068_v23  ;;  %v3532_v22 = vld [vmem:[#allocation11 + $0x124] sm:$0xf]  ;;  %v2971_v23 = vor.u32 %v3533_v21, %v2970_v20 }
 0x17e   :  { %1355 = vmatpush.bf16.msrb.mxu3 %v2915_v32  ;;  %v3004_v32 = vld [vmem:[#allocation11 + $0x168] sm:$0xf0] }
 0x17f   :  { %1383 = vmatpush.bf16.msra.mxu1 %v2919_v33  ;;  %1341 = vmatpush.bf16.msrb.mxu2 %v2851_v40  ;;  %v3555_v33 = vld [vmem:[#allocation11 + $0x1d4] sm:$0xf0]  ;;  %v3007_v37 = vor.u32 %v3540_v31, %v3004_v32  ;;  %v3050_v40 = vld [vmem:[#allocation11 + $0x1c0] sm:$0xf]  ;;  %v3530_v32 = vld [vmem:[#allocation11 + $0x114] sm:$0xf] }
 0x180   :  { %1369 = vmatpush.bf16.msra.mxu0 %v2855_v41  ;;  %v3059_v38 = vor.u32 %v3555_v33, %v3058_v28  ;;  %v3553_v41 = vld [vmem:[#allocation11 + $0x1c4] sm:$0xf0]  ;;  %v3544_v28 = vld [vmem:[#allocation11 + $0x184] sm:$0xf]  ;;  %v3531_v31 = vld [vmem:[#allocation11 + $0x114] sm:$0xf0]  ;;  %v2967_v35 = vor.u32 %v3530_v32, %v2964_v34 }
 0x181   :  { %v3051_v43 = vor.u32 %v3553_v41, %v3050_v40  ;;  %v2963_v33 = vor.u32 %v3531_v31, %v2962_v61  ;;  %v3573_v32 = vld [vmem:[#allocation11 + $0x264] sm:$0xf0]  ;;  %v3132_v34 = vld [vmem:[#allocation11 + $0x268] sm:$0xf0] }
 0x182   :  { %1356 = vmatpush.bf16.msrb.mxu3 %v2907_v44  ;;  %v3052_v44 = vld [vmem:[#allocation11 + $0x1c8] sm:$0xf0] }
 0x183   :  { %1384 = vmatpush.bf16.msra.mxu1 %v2911_v45  ;;  %1342 = vmatpush.bf16.msrb.mxu2 %v2843_v52  ;;  %v3055_v45 = vor.u32 %v3552_v42, %v3052_v44  ;;  %v3042_v52 = vld [vmem:[#allocation11 + $0x1b0] sm:$0xf]  ;;  %v4054_v42 = vld [vmem:[#allocation10] sm:$0x3f] }
 0x184   :  { %1370 = vmatpush.bf16.msra.mxu0 %v2847_v53  ;;  %v3551_v53 = vld [vmem:[#allocation11 + $0x1b4] sm:$0xf0] }
 0x185   :  { %v3043_v55 = vor.u32 %v3551_v53, %v3042_v52 }
 0x186   :  { %1357 = vmatpush.bf16.msrb.mxu3 %v2899_v57  ;;  %v3047_v57 = vor.u32 %v3550_v54, %v3044_v56 }
 0x187   :  { %1385 = vmatpush.bf16.msra.mxu1 %v2903_v58  ;;  %1343 = vmatpush.bf16.msrb.mxu2 %v2835_v6  ;;  %v2986_v58 = vld [vmem:[#allocation11 + $0x140] sm:$0xf]  ;;  %v3036_v6 = vld [vmem:[#allocation11 + $0x1a8] sm:$0xf0] }
 0x188   :  { %1371 = vmatpush.bf16.msra.mxu0 %v2839_v7  ;;  %v2987_v62 = vor.u32 %v3537_v59, %v2986_v58  ;;  %v3039_v7 = vor.u32 %v3548_v4, %v3036_v6  ;;  %v3590_v58 = vld [vmem:[#allocation11 + $0x2f4] sm:$0xf]  ;;  %v3204_v59 = vld [vmem:[#allocation11 + $0x2f8] sm:$0xf0]  ;;  %v3194_v6 = vld [vmem:[#allocation11 + $0x2e0] sm:$0xf] }
 0x18a   :  { %1358 = vmatpush.bf16.msrb.mxu3 %v2891_v10  ;;  %v3534_v10 = vld [vmem:[#allocation11 + $0x134] sm:$0xf] }
 0x18b   :  { %1386 = vmatpush.bf16.msra.mxu1 %v2895_v11  ;;  %1344 = vmatpush.bf16.msrb.mxu2 %v2827_v24  ;;  %v2979_v11 = vor.u32 %v3535_v9, %v2978_v8  ;;  %v2983_v13 = vor.u32 %v3534_v10, %v2980_v12  ;;  %v2972_v24 = vld [vmem:[#allocation11 + $0x128] sm:$0xf0]  ;;  %v3589_v8 = vld [vmem:[#allocation11 + $0x2e4] sm:$0xf0]  ;;  %v3588_v9 = vld [vmem:[#allocation11 + $0x2e4] sm:$0xf] }
 0x18c   :  { %1372 = vmatpush.bf16.msra.mxu0 %v2831_v25  ;;  %v2975_v25 = vor.u32 %v3532_v22, %v2972_v24  ;;  %v3196_v10 = vld [vmem:[#allocation11 + $0x2e8] sm:$0xf0]  ;;  %v474_v12 = vperm.slane %v4054_v42, 3  ;;  %v3195_v21 = vor.u32 %v3589_v8, %v3194_v6  ;;  %v3587_v24 = vld [vmem:[#allocation11 + $0x2d4] sm:$0xf0] }
 0x18d   :  { %v3199_v22 = vor.u32 %v3588_v9, %v3196_v10  ;;  %v3568_v8 = vld [vmem:[#allocation11 + $0x244] sm:$0xf]  ;;  %v3116_v9 = vld [vmem:[#allocation11 + $0x248] sm:$0xf0] }
 0x18e   :  { %1602 = vmatpush.bf16.msra.mxu3 %v3075_v16  ;;  %v3546_v16 = vld [vmem:[#allocation11 + $0x194] sm:$0xf] }
 0x18f   :  { %1630 = vmatpush.bf16.msrb.mxu1 %v3079_v19  ;;  %1588 = vmatpush.bf16.msra.mxu2 %v3011_v26  ;;  %v3027_v19 = vor.u32 %v3547_v15, %v3026_v14  ;;  %v3031_v18 = vor.u32 %v3546_v16, %v3028_v17  ;;  %v3018_v26 = vld [vmem:[#allocation11 + $0x180] sm:$0xf]  ;;  %v3138_v15 = vld [vmem:[#allocation11 + $0x270] sm:$0xf]  ;;  %v3575_v16 = vld [vmem:[#allocation11 + $0x274] sm:$0xf0] }
 0x190   :  { %1616 = vmatpush.bf16.msrb.mxu0 %v3015_v27  ;;  %v3545_v27 = vld [vmem:[#allocation11 + $0x184] sm:$0xf0]  ;;  %v3140_v17 = vld [vmem:[#allocation11 + $0x278] sm:$0xf0] }
 0x191   :  { %v3019_v60 = vor.u32 %v3545_v27, %v3018_v26  ;;  %v3188_v26 = vld [vmem:[#allocation11 + $0x2d8] sm:$0xf0] }
 0x192   :  { %1603 = vmatpush.bf16.msra.mxu3 %v3067_v29  ;;  %v3020_v29 = vld [vmem:[#allocation11 + $0x188] sm:$0xf0] }
 0x193   :  { %1631 = vmatpush.bf16.msrb.mxu1 %v3071_v30  ;;  %1589 = vmatpush.bf16.msra.mxu2 %v3003_v36  ;;  %v3023_v30 = vor.u32 %v3544_v28, %v3020_v29  ;;  %v2954_v36 = vld [vmem:[#allocation11 + $0x100] sm:$0xf]  ;;  %v3139_v28 = vor.u32 %v3575_v16, %v3138_v15  ;;  %v3581_v15 = vld [vmem:[#allocation11 + $0x2a4] sm:$0xf0]  ;;  %v3580_v16 = vld [vmem:[#allocation11 + $0x2a4] sm:$0xf] }
 0x194   :  { %1617 = vmatpush.bf16.msrb.mxu0 %v3007_v37  ;;  %v3529_v37 = vld [vmem:[#allocation11 + $0x104] sm:$0xf0]  ;;  %v3130_v29 = vld [vmem:[#allocation11 + $0x260] sm:$0xf] }
 0x195   :  { %v2955_v40 = vor.u32 %v3529_v37, %v2954_v36 }
 0x196   :  { %1604 = vmatpush.bf16.msra.mxu3 %v3059_v38  ;;  %v3528_v38 = vld [vmem:[#allocation11 + $0x104] sm:$0xf] }
 0x197   :  { %1632 = vmatpush.bf16.msrb.mxu1 %v3063_v39  ;;  %1590 = vmatpush.bf16.msra.mxu2 %v2995_v49  ;;  %v2956_v39 = vld [vmem:[#allocation11 + $0x108] sm:$0xf0]  ;;  %v471_v49 = vperm.slane %v4054_v42, 0 }
 0x198   :  { %1618 = vmatpush.bf16.msrb.mxu0 %v2999_v51  ;;  %v2959_v41 = vor.u32 %v3528_v38, %v2956_v39  ;;  %v3178_v38 = vld [vmem:[#allocation11 + $0x2c0] sm:$0xf]  ;;  %v3585_v39 = vld [vmem:[#allocation11 + $0x2c4] sm:$0xf0] }
 0x19a   :  { %1605 = vmatpush.bf16.msra.mxu3 %v3051_v43 }
 0x19b   :  { %1633 = vmatpush.bf16.msrb.mxu1 %v3055_v45  ;;  %1591 = vmatpush.bf16.msra.mxu2 %v2987_v62  ;;  %v472_v45 = vperm.slane %v4054_v42, 1 }
 0x19c   :  { %1619 = vmatpush.bf16.msrb.mxu0 %v2991_v1 }
 0x19e   :  { %1606 = vmatpush.bf16.msra.mxu3 %v3043_v55  ;;  %v3202_v55 = vld [vmem:[#allocation11 + $0x2f0] sm:$0xf] }
 0x19f   :  { %1634 = vmatpush.bf16.msrb.mxu1 %v3047_v57  ;;  %1592 = vmatpush.bf16.msra.mxu2 %v2979_v11  ;;  %v3591_v57 = vld [vmem:[#allocation11 + $0x2f4] sm:$0xf0] }
 0x1a0   :  { %1620 = vmatpush.bf16.msrb.mxu0 %v2983_v13  ;;  %v3203_v4 = vor.u32 %v3591_v57, %v3202_v55  ;;  %v3583_v57 = vld [vmem:[#allocation11 + $0x2b4] sm:$0xf0] }
 0x1a2   :  { %1607 = vmatpush.bf16.msra.mxu3 %v3035_v5  ;;  %v3207_v5 = vor.u32 %v3590_v58, %v3204_v59  ;;  %v3582_v59 = vld [vmem:[#allocation11 + $0x2b4] sm:$0xf] }
 0x1a3   :  { %1635 = vmatpush.bf16.msrb.mxu1 %v3039_v7  ;;  %1593 = vmatpush.bf16.msra.mxu2 %v2971_v23  ;;  %v3186_v23 = vld [vmem:[#allocation11 + $0x2d0] sm:$0xf] }
 0x1a4   :  { %1621 = vmatpush.bf16.msrb.mxu0 %v2975_v25  ;;  %v3586_v25 = vld [vmem:[#allocation11 + $0x2d4] sm:$0xf]  ;;  %v3187_v36 = vor.u32 %v3587_v24, %v3186_v23 }
 0x1a5   :  { %v3191_v37 = vor.u32 %v3586_v25, %v3188_v26  ;;  %v3567_v25 = vld [vmem:[#allocation11 + $0x234] sm:$0xf0]  ;;  %v3566_v26 = vld [vmem:[#allocation11 + $0x234] sm:$0xf] }
 0x1a6   :  { %1608 = vmatpush.bf16.msra.mxu3 %v3027_v19  ;;  %v3574_v19 = vld [vmem:[#allocation11 + $0x274] sm:$0xf] }
 0x1a7   :  { %1636 = vmatpush.bf16.msrb.mxu1 %v3031_v18  ;;  %1594 = vmatpush.bf16.msra.mxu2 %v2963_v33  ;;  %v3572_v33 = vld [vmem:[#allocation11 + $0x264] sm:$0xf] }
 0x1a8   :  { %1622 = vmatpush.bf16.msrb.mxu0 %v2967_v35  ;;  %v473_v35 = vperm.slane %v4054_v42, 2 }
 0x1aa   :  { %1609 = vmatpush.bf16.msra.mxu3 %v3019_v60  ;;  %v3143_v60 = vor.u32 %v3574_v19, %v3140_v17  ;;  %v3164_v19 = vld [vmem:[#allocation11 + $0x2a8] sm:$0xf0] }
 0x1ab   :  { %1637 = vmatpush.bf16.msrb.mxu1 %v3023_v30  ;;  %1595 = vmatpush.bf16.msra.mxu2 %v2955_v40  ;;  %v3584_v40 = vld [vmem:[#allocation11 + $0x2c4] sm:$0xf] }
 0x1ac   :  { %1623 = vmatpush.bf16.msrb.mxu0 %v2959_v41  ;;  %v3180_v41 = vld [vmem:[#allocation11 + $0x2c8] sm:$0xf0] }
 0x1ad   :  { %v3183_v55 = vor.u32 %v3584_v40, %v3180_v41  ;;  %v3100_v40 = vld [vmem:[#allocation11 + $0x228] sm:$0xf0] }
 0x1ca   :  { %v1000_v43 = vpop.f32.mrf.mxu0  ;;  %v1014_v44 = vpop.f32.mrf.mxu1 }
 0x1cb   :  { %v1001_v46 = vadd.f32 %v1000_v43, %v472_v45 }
 0x1cd   :  { %v1015_v52 = vadd.f32 %v1014_v44, %v1001_v46  ;;  %v3135_v46 = vor.u32 %v3572_v33, %v3132_v34  ;;  %v3156_v33 = vld [vmem:[#allocation11 + $0x298] sm:$0xf0] }
 0x1cf   :  { %v972_v47 = vpop.f32.mrf.mxu2  ;;  %v986_v48 = vpop.f32.mrf.mxu3  ;;  %v1132_v62 = vmax.f32 %v1015_v52, 0.0  ;;  %v3124_v52 = vld [vmem:[#allocation11 + $0x258] sm:$0xf0] }
 0x1d0   :  { %v973_v54 = vadd.f32 %v972_v47, %v471_v49  ;;  %v3122_v47 = vld [vmem:[#allocation11 + $0x250] sm:$0xf] }
 0x1d2   :  { %v1002_v50 = vpop.f32.mrf.mxu0  ;;  %v1016_v51 = vpop.f32.mrf.mxu1  ;;  %v987_v2 = vadd.f32 %v986_v48, %v973_v54  ;;  %v3179_v54 = vor.u32 %v3585_v39, %v3178_v38  ;;  %v3565_v38 = vld [vmem:[#allocation11 + $0x224] sm:$0xf0]  ;;  %v3564_v39 = vld [vmem:[#allocation11 + $0x224] sm:$0xf] }
 0x1d3   :  { %v1003_v53 = vadd.f32 %v1002_v50, %v472_v45  ;;  %v3131_v45 = vor.u32 %v3573_v32, %v3130_v29  ;;  %v3571_v50 = vld [vmem:[#allocation11 + $0x254] sm:$0xf0]  ;;  %v3578_v32 = vld [vmem:[#allocation11 + $0x294] sm:$0xf] }
 0x1d4   :  { %v1131_v18 = vmax.f32 %v987_v2, 0.0  ;;  %v3569_v2 = vld [vmem:[#allocation11 + $0x244] sm:$0xf0] }
 0x1d5   :  { %v1017_v56 = vadd.f32 %v1016_v51, %v1003_v53  ;;  %v3570_v51 = vld [vmem:[#allocation11 + $0x254] sm:$0xf] }
 0x1d7   :  { %v1138_v63 = vmax.f32 %v1017_v56, 0.0  ;;  %v974_v0 = vpop.f32.mrf.mxu2  ;;  %v988_v1 = vpop.f32.mrf.mxu3  ;;  %v3170_v56 = vld [vmem:[#allocation11 + $0x2b0] sm:$0xf] }
 0x1d8   :  { %v975_v3 = vadd.f32 %v974_v0, %v471_v49  ;;  %v3127_v0 = vor.u32 %v3570_v51, %v3124_v52  ;;  %v3148_v51 = vld [vmem:[#allocation11 + $0x288] sm:$0xf0] }
 0x1d9   :  { %v1144_v7 = vpack.c.bf16 %v1138_v63, %v1132_v62  ;;  %v3172_v62 = vld [vmem:[#allocation11 + $0x2b8] sm:$0xf0]  ;;  %v3123_v63 = vor.u32 %v3571_v50, %v3122_v47  ;;  %v3146_v47 = vld [vmem:[#allocation11 + $0x280] sm:$0xf]  ;;  %v3576_v50 = vld [vmem:[#allocation11 + $0x284] sm:$0xf] }
 0x1da   :  { %v989_v11 = vadd.f32 %v988_v1, %v975_v3  ;;  %v1056_v13 = vpop.f32.mrf.mxu0  ;;  %v1070_v14 = vpop.f32.mrf.mxu1  ;;  %v3114_v1 = vld [vmem:[#allocation11 + $0x240] sm:$0xf] }
 0x1db   :  { %1359 = vmatmul.bf16.vlgmr.msrb.gmra.mxu3 %v1144_v7  ;;  %1387 = vmatmul.bf16.vlgmr.msra.gmra.mxu1 %v1144_v7  ;;  %v1057_v30 = vadd.f32 %v1056_v13, %v474_v12  ;;  %v3171_v7 = vor.u32 %v3583_v57, %v3170_v56  ;;  %v3162_v13 = vld [vmem:[#allocation11 + $0x2a0] sm:$0xf]  ;;  %v3563_v57 = vld [vmem:[#allocation11 + $0x214] sm:$0xf0] }
 0x1dc   :  { %v1137_v20 = vmax.f32 %v989_v11, 0.0  ;;  %1853 = vmatpush.bf16.msrb.mxu3 %v3203_v4  ;;  %1881 = vmatpush.bf16.msra.mxu1 %v3207_v5  ;;  %v3163_v29 = vor.u32 %v3581_v15, %v3162_v13  ;;  %v3606_v15 = vld [vmem:[#allocation14 + $0x70] sm:$0xff] }
 0x1dd   :  { %v1071_v48 = vadd.f32 %v1070_v14, %v1057_v30  ;;  %v3167_v30 = vor.u32 %v3580_v16, %v3164_v19 }
 0x1de   :  { %v1143_v27 = vpack.c.bf16 %v1137_v20, %v1131_v18  ;;  %v476_v18 = vperm.slane %v4054_v42, 5  ;;  %v3115_v20 = vor.u32 %v3569_v2, %v3114_v1  ;;  %v3607_v2 = vld [vmem:[#allocation14 + $0x78] sm:$0xff] }
 0x1df   :  { %v1028_v61 = vpop.f32.mrf.mxu2  ;;  %v1042_v31 = vpop.f32.mrf.mxu3  ;;  %v1134_v3 = vmax.f32 %v1071_v48, 0.0  ;;  %v3577_v48 = vld [vmem:[#allocation11 + $0x284] sm:$0xf0] }
 0x1e0   :  { %1854 = vmatpush.bf16.msrb.mxu3 %v3195_v21  ;;  %1882 = vmatpush.bf16.msra.mxu1 %v3199_v22  ;;  %v1029_v53 = vadd.f32 %v1028_v61, %v473_v35  ;;  %v3119_v21 = vor.u32 %v3568_v8, %v3116_v9  ;;  %v3106_v22 = vld [vmem:[#allocation11 + $0x230] sm:$0xf]  ;;  %v3147_v56 = vor.u32 %v3577_v48, %v3146_v47  ;;  %v3560_v8 = vld [vmem:[#allocation11 + $0x204] sm:$0xf]  ;;  %v3084_v9 = vld [vmem:[#allocation11 + $0x208] sm:$0xf0] }
 0x1e1   :  { %1345 = vmatmul.bf16.vlgmr.msrb.gmra.mxu2 %v1143_v27  ;;  %1373 = vmatmul.bf16.vlgmr.msra.gmra.mxu0 %v1143_v27  ;;  %v3108_v27 = vld [vmem:[#allocation11 + $0x238] sm:$0xf0]  ;;  %v3154_v61 = vld [vmem:[#allocation11 + $0x290] sm:$0xf] }
 0x1e2   :  { %v1058_v43 = vpop.f32.mrf.mxu0  ;;  %v1072_v44 = vpop.f32.mrf.mxu1  ;;  %1839 = vmatpush.bf16.msrb.mxu2 %v3139_v28  ;;  %1867 = vmatpush.bf16.msra.mxu0 %v3143_v60  ;;  %v1043_v10 = vadd.f32 %v1042_v31, %v1029_v53  ;;  %v3579_v31 = vld [vmem:[#allocation11 + $0x294] sm:$0xf0]  ;;  %v3103_v53 = vor.u32 %v3564_v39, %v3100_v40  ;;  %v3620_v39 = vld [vmem:[#allocation14 + $0xe0] sm:$0xff]  ;;  %v3593_v40 = vld [vmem:[#allocation14 + $0x8] sm:$0xff] }
 0x1e3   :  { %v1059_v49 = vadd.f32 %v1058_v43, %v474_v12  ;;  %v3175_v12 = vor.u32 %v3582_v59, %v3172_v62  ;;  %v3092_v59 = vld [vmem:[#allocation11 + $0x218] sm:$0xf0] }
 0x1e4   :  { %1855 = vmatpush.bf16.msrb.mxu3 %v3187_v36  ;;  %1883 = vmatpush.bf16.msra.mxu1 %v3191_v37  ;;  %v1133_v28 = vmax.f32 %v1043_v10, 0.0  ;;  %v3111_v36 = vor.u32 %v3566_v26, %v3108_v27  ;;  %v3098_v37 = vld [vmem:[#allocation11 + $0x220] sm:$0xf]  ;;  %v3598_v26 = vld [vmem:[#allocation14 + $0x30] sm:$0xff]  ;;  %v3604_v27 = vld [vmem:[#allocation14 + $0x60] sm:$0xff] }
 0x1e5   :  { %v1073_v58 = vadd.f32 %v1072_v44, %v1059_v49  ;;  %v475_v49 = vperm.slane %v4054_v42, 4  ;;  %v3099_v52 = vor.u32 %v3565_v38, %v3098_v37  ;;  %v3614_v37 = vld [vmem:[#allocation14 + $0xb0] sm:$0xff]  ;;  %v3600_v38 = vld [vmem:[#allocation14 + $0x40] sm:$0xff] }
 0x1e6   :  { %1840 = vmatpush.bf16.msrb.mxu2 %v3131_v45  ;;  %1868 = vmatpush.bf16.msra.mxu0 %v3135_v46  ;;  %v3155_v45 = vor.u32 %v3579_v31, %v3154_v61  ;;  %v3159_v46 = vor.u32 %v3578_v32, %v3156_v33  ;;  %v3602_v61 = vld [vmem:[#allocation14 + $0x50] sm:$0xff]  ;;  %v3595_v32 = vld [vmem:[#allocation14 + $0x18] sm:$0xff] }
 0x1e7   :  { %v1140_v4 = vmax.f32 %v1073_v58, 0.0  ;;  %v1030_v5 = vpop.f32.mrf.mxu2  ;;  %v1044_v6 = vpop.f32.mrf.mxu3  ;;  %v3562_v58 = vld [vmem:[#allocation11 + $0x214] sm:$0xf]  ;;  %v3615_v33 = vld [vmem:[#allocation14 + $0xb8] sm:$0xff] }
 0x1e8   :  { %v1031_v11 = vadd.f32 %v1030_v5, %v473_v35  ;;  %1856 = vmatpush.bf16.msrb.mxu3 %v3179_v54  ;;  %1884 = vmatpush.bf16.msra.mxu1 %v3183_v55  ;;  %v3107_v35 = vor.u32 %v3567_v25, %v3106_v22  ;;  %v3090_v54 = vld [vmem:[#allocation11 + $0x210] sm:$0xf]  ;;  %v3095_v5 = vor.u32 %v3562_v58, %v3092_v59  ;;  %v3622_v31 = vld [vmem:[#allocation14 + $0xf0] sm:$0xff] }
 0x1e9   :  { %v1394_v14 = vpack.c.bf16 %v1140_v4, %v1134_v3  ;;  %v3091_v4 = vor.u32 %v3563_v57, %v3090_v54  ;;  %v3605_v25 = vld [vmem:[#allocation14 + $0x68] sm:$0xff]  ;;  %v3618_v47 = vld [vmem:[#allocation14 + $0xd0] sm:$0xff]  ;;  %v3636_v57 = vld [vmem:[#allocation14 + $0x160] sm:$0xff] }
 0x1ea   :  { %v1045_v17 = vadd.f32 %v1044_v6, %v1031_v11  ;;  %1841 = vmatpush.bf16.msrb.mxu2 %v3123_v63  ;;  %1869 = vmatpush.bf16.msra.mxu0 %v3127_v0  ;;  %v3151_v0 = vor.u32 %v3576_v50, %v3148_v51  ;;  %v3082_v6 = vld [vmem:[#allocation11 + $0x200] sm:$0xf]  ;;  %v3638_v48 = vld [vmem:[#allocation14 + $0x170] sm:$0xff]  ;;  %v3617_v51 = vld [vmem:[#allocation14 + $0xc8] sm:$0xff] }
 0x1eb   :  { %v1112_v23 = vpop.f32.mrf.mxu0  ;;  %1610 = vmatmul.bf16.vlgmr.msra.gmra.mxu3 %v1394_v14  ;;  %1638 = vmatmul.bf16.vlgmr.msrb.gmra.mxu1 %v1394_v14  ;;  %v3631_v50 = vld [vmem:[#allocation14 + $0x138] sm:$0xff]  ;;  %v3610_v54 = vld [vmem:[#allocation14 + $0x90] sm:$0xff]  ;;  %v3609_v58 = vld [vmem:[#allocation14 + $0x88] sm:$0xff] }
 0x1ec   :  { %v1139_v60 = vmax.f32 %v1045_v17, 0.0  ;;  %1857 = vmatpush.bf16.msrb.mxu3 %v3171_v7  ;;  %1885 = vmatpush.bf16.msra.mxu1 %v3175_v12  ;;  %v1113_v41 = vadd.f32 %v1112_v23, %v476_v18  ;;  %v3561_v7 = vld [vmem:[#allocation11 + $0x204] sm:$0xf0]  ;;  %v3629_v59 = vld [vmem:[#allocation14 + $0x128] sm:$0xff] }
 0x1ed   :  { %v1126_v24 = vpop.f32.mrf.mxu1  ;;  %v3083_v17 = vor.u32 %v3561_v7, %v3082_v6  ;;  %v3634_v6 = vld [vmem:[#allocation14 + $0x150] sm:$0xff] }
 0x1ee   :  { %v1393_v34 = vpack.c.bf16 %v1139_v60, %v1133_v28  ;;  %1842 = vmatpush.bf16.msrb.mxu2 %v3115_v20  ;;  %1870 = vmatpush.bf16.msra.mxu0 %v3119_v21  ;;  %v1127_v62 = vadd.f32 %v1126_v24, %v1113_v41  ;;  %v3599_v21 = vld [vmem:[#allocation14 + $0x38] sm:$0xff]  ;;  %v3597_v28 = vld [vmem:[#allocation14 + $0x28] sm:$0xff] }
 0x1ef   :  { %v3603_v60 = vld [vmem:[#allocation14 + $0x58] sm:$0xff]  ;;  %v3613_v41 = vld [vmem:[#allocation14 + $0xa8] sm:$0xff] }
 0x1f0   :  { %v1084_v43 = vpop.f32.mrf.mxu2  ;;  %v1098_v44 = vpop.f32.mrf.mxu3  ;;  %1858 = vmatpush.bf16.msrb.mxu3 %v3163_v29  ;;  %1886 = vmatpush.bf16.msra.mxu1 %v3167_v30  ;;  %v1136_v10 = vmax.f32 %v1127_v62, 0.0  ;;  %v3623_v29 = vld [vmem:[#allocation14 + $0xf8] sm:$0xff]  ;;  %v3596_v30 = vld [vmem:[#allocation14 + $0x20] sm:$0xff] }
 0x1f1   :  { %1596 = vmatmul.bf16.vlgmr.msra.gmra.mxu2 %v1393_v34  ;;  %1624 = vmatmul.bf16.vlgmr.msrb.gmra.mxu0 %v1393_v34  ;;  %v1085_v42 = vadd.f32 %v1084_v43, %v475_v49  ;;  %v3601_v34 = vld [vmem:[#allocation14 + $0x48] sm:$0xff]  ;;  %v3619_v43 = vld [vmem:[#allocation14 + $0xd8] sm:$0xff] }
 0x1f2   :  { %1843 = vmatpush.bf16.msrb.mxu2 %v3107_v35  ;;  %1871 = vmatpush.bf16.msra.mxu0 %v3111_v36  ;;  %v3621_v35 = vld [vmem:[#allocation14 + $0xe8] sm:$0xff]  ;;  %v3594_v36 = vld [vmem:[#allocation14 + $0x10] sm:$0xff] }
 0x1f3   :  { %v1114_v55 = vpop.f32.mrf.mxu0  ;;  %v1099_v13 = vadd.f32 %v1098_v44, %v1085_v42  ;;  %v3639_v44 = vld [vmem:[#allocation14 + $0x178] sm:$0xff] }
 0x1f4   :  { %v1115_v63 = vadd.f32 %v1114_v55, %v476_v18  ;;  %1859 = vmatpush.bf16.msrb.mxu3 %v3155_v45  ;;  %1887 = vmatpush.bf16.msra.mxu1 %v3159_v46  ;;  %v3087_v18 = vor.u32 %v3560_v8, %v3084_v9  ;;  %v3592_v45 = vld [vmem:[#allocation14] sm:$0xff]  ;;  %v3630_v55 = vld [vmem:[#allocation14 + $0x130] sm:$0xff]  ;;  %v4062_v42 = vld [vmem:[#allocation13] sm:$0x3f] }
 0x1f5   :  { %v1128_v1 = vpop.f32.mrf.mxu1  ;;  %v1135_v22 = vmax.f32 %v1099_v13, 0.0  ;;  %v3612_v46 = vld [vmem:[#allocation14 + $0xa0] sm:$0xff]  ;;  %v3627_v8 = vld [vmem:[#allocation14 + $0x118] sm:$0xff]  ;;  %v3633_v13 = vld [vmem:[#allocation14 + $0x148] sm:$0xff] }
 0x1f6   :  { %v1129_v3 = vadd.f32 %v1128_v1, %v1115_v63  ;;  %1844 = vmatpush.bf16.msrb.mxu2 %v3099_v52  ;;  %1872 = vmatpush.bf16.msra.mxu0 %v3103_v53  ;;  %v3637_v52 = vld [vmem:[#allocation14 + $0x168] sm:$0xff] }
 0x1f8   :  { %v1142_v11 = vmax.f32 %v1129_v3, 0.0  ;;  %v1086_v12 = vpop.f32.mrf.mxu2  ;;  %1860 = vmatpush.bf16.msrb.mxu3 %v3147_v56  ;;  %1888 = vmatpush.bf16.msra.mxu1 %v3151_v0  ;;  %v1100_v19 = vpop.f32.mrf.mxu3  ;;  %v3616_v56 = vld [vmem:[#allocation14 + $0xc0] sm:$0xff]  ;;  %v3635_v0 = vld [vmem:[#allocation14 + $0x158] sm:$0xff] }
 0x1f9   :  { %v1087_v14 = vadd.f32 %v1086_v12, %v475_v49  ;;  %v3611_v49 = vld [vmem:[#allocation14 + $0x98] sm:$0xff]  ;;  %v3628_v3 = vld [vmem:[#allocation14 + $0x120] sm:$0xff] }
 0x1fa   :  { %v1645_v16 = vpack.c.bf16 %v1142_v11, %v1136_v10  ;;  %1845 = vmatpush.bf16.msrb.mxu2 %v3091_v4  ;;  %1873 = vmatpush.bf16.msra.mxu0 %v3095_v5  ;;  %v1898_v5 = vperm.slane %v4062_v42, 1 }
 0x1fb   :  { %v1101_v20 = vadd.f32 %v1100_v19, %v1087_v14 }
 0x1fc   :  { %2341 = vmatpush.bf16.msra.mxu3 %v3607_v2  ;;  %1889 = vmatmul.bf16.vlgmr.msra.gmra.mxu1 %v1645_v16  ;;  %v3608_v2 = vld [vmem:[#allocation14 + $0x80] sm:$0xff] }
 0x1fd   :  { %1861 = vmatmul.bf16.vlgmr.msrb.gmra.mxu3 %v1645_v16  ;;  %v1141_v23 = vmax.f32 %v1101_v20, 0.0  ;;  %2369 = vmatpush.bf16.msrb.mxu1 %v3623_v29  ;;  %v1897_v16 = vperm.slane %v4062_v42, 0 }
 0x1fe   :  { %1846 = vmatpush.bf16.msrb.mxu2 %v3083_v17  ;;  %1874 = vmatpush.bf16.msra.mxu0 %v3087_v18  ;;  %v3626_v17 = vld [vmem:[#allocation14 + $0x110] sm:$0xff] }
 0x1ff   :  { %v1644_v24 = vpack.c.bf16 %v1141_v23, %v1135_v22 }
 0x200   :  { %2342 = vmatpush.bf16.msra.mxu3 %v3606_v15 }
 0x201   :  { %1847 = vmatmul.bf16.vlgmr.msrb.gmra.mxu2 %v1644_v24  ;;  %1875 = vmatmul.bf16.vlgmr.msra.gmra.mxu0 %v1644_v24 }
 0x202   :  { %2327 = vmatpush.bf16.msra.mxu2 %v3599_v21  ;;  %2370 = vmatpush.bf16.msrb.mxu1 %v3622_v31  ;;  %v3632_v21 = vld [vmem:[#allocation14 + $0x140] sm:$0xff] }
 0x203   :  { %2355 = vmatpush.bf16.msrb.mxu0 %v3615_v33 }
 0x204   :  { %2343 = vmatpush.bf16.msra.mxu3 %v3605_v25 }
 0x206   :  { %2328 = vmatpush.bf16.msra.mxu2 %v3598_v26  ;;  %2371 = vmatpush.bf16.msrb.mxu1 %v3621_v35  ;;  %v3625_v26 = vld [vmem:[#allocation14 + $0x108] sm:$0xff] }
 0x207   :  { %2356 = vmatpush.bf16.msrb.mxu0 %v3614_v37 }
 0x208   :  { %2344 = vmatpush.bf16.msra.mxu3 %v3604_v27 }
 0x20a   :  { %2329 = vmatpush.bf16.msra.mxu2 %v3597_v28  ;;  %2372 = vmatpush.bf16.msrb.mxu1 %v3620_v39 }
 0x20b   :  { %2357 = vmatpush.bf16.msrb.mxu0 %v3613_v41  ;;  %v1899_v41 = vperm.slane %v4062_v42, 2 }
 0x20c   :  { %2345 = vmatpush.bf16.msra.mxu3 %v3603_v60 }
 0x20e   :  { %2330 = vmatpush.bf16.msra.mxu2 %v3596_v30  ;;  %2373 = vmatpush.bf16.msrb.mxu1 %v3619_v43 }
 0x20f   :  { %2358 = vmatpush.bf16.msrb.mxu0 %v3612_v46 }
 0x210   :  { %2346 = vmatpush.bf16.msra.mxu3 %v3602_v61  ;;  %v3624_v61 = vld [vmem:[#allocation14 + $0x100] sm:$0xff] }
 0x212   :  { %2331 = vmatpush.bf16.msra.mxu2 %v3595_v32  ;;  %2374 = vmatpush.bf16.msrb.mxu1 %v3618_v47 }
 0x213   :  { %2359 = vmatpush.bf16.msrb.mxu0 %v3611_v49 }
 0x214   :  { %2347 = vmatpush.bf16.msra.mxu3 %v3601_v34  ;;  %v1900_v34 = vperm.slane %v4062_v42, 3 }
 0x216   :  { %2332 = vmatpush.bf16.msra.mxu2 %v3594_v36  ;;  %2375 = vmatpush.bf16.msrb.mxu1 %v3617_v51 }
 0x217   :  { %2360 = vmatpush.bf16.msrb.mxu0 %v3610_v54 }
 0x218   :  { %2348 = vmatpush.bf16.msra.mxu3 %v3600_v38 }
 0x21a   :  { %2333 = vmatpush.bf16.msra.mxu2 %v3593_v40  ;;  %2376 = vmatpush.bf16.msrb.mxu1 %v3616_v56 }
 0x21b   :  { %2361 = vmatpush.bf16.msrb.mxu0 %v3609_v58  ;;  %v1902_v58 = vperm.slane %v4062_v42, 5 }
 0x21c   :  { %2397 = vmatpush.bf16.msrb.mxu3 %v3639_v44 }
 0x21e   :  { %2334 = vmatpush.bf16.msra.mxu2 %v3592_v45 }
 0x21f   :  { %2362 = vmatpush.bf16.msrb.mxu0 %v3608_v2 }
 0x220   :  { %2398 = vmatpush.bf16.msrb.mxu3 %v3638_v48 }
 0x222   :  { %2383 = vmatpush.bf16.msrb.mxu2 %v3631_v50 }
 0x224   :  { %2399 = vmatpush.bf16.msrb.mxu3 %v3637_v52 }
 0x226   :  { %2384 = vmatpush.bf16.msrb.mxu2 %v3630_v55 }
 0x228   :  { %2400 = vmatpush.bf16.msrb.mxu3 %v3636_v57 }
 0x22a   :  { %2385 = vmatpush.bf16.msrb.mxu2 %v3629_v59 }
 0x22c   :  { %2401 = vmatpush.bf16.msrb.mxu3 %v3635_v0 }
 0x22e   :  { %2386 = vmatpush.bf16.msrb.mxu2 %v3628_v3  ;;  %v1901_v3 = vperm.slane %v4062_v42, 4  ;;  %v3658_v42 = vld [vmem:[%s4087_s8] ss:$0 sm:$0xff]  ;;  %s3906_s8 = smov [#allocation16]  }
 0x22f   :  { %s2417_s30 = sshll.u32 %s3906_s8, 4  ;;  %s2418_s30 = int_to_ptr.vmem [resolvable:$true] %s2417_s30 }
 0x230   :  { %2402 = vmatpush.bf16.msrb.mxu3 %v3634_v6 }
 0x232   :  { %2387 = vmatpush.bf16.msrb.mxu2 %v3627_v8 }
 0x234   :  { %2403 = vmatpush.bf16.msrb.mxu3 %v3633_v13 }
 0x236   :  { %2388 = vmatpush.bf16.msrb.mxu2 %v3626_v17 }
 0x238   :  { %2404 = vmatpush.bf16.msrb.mxu3 %v3632_v21 }
 0x23a   :  { %2389 = vmatpush.bf16.msrb.mxu2 %v3625_v26 }
 0x23e   :  { %2390 = vmatpush.bf16.msrb.mxu2 %v3624_v61 }
 0x258   :  { %v1388_v53 = vpop.f32.mrf.mxu1 }
 0x25e   :  { %v1360_v62 = vpop.f32.mrf.mxu3  ;;  %v1374_v63 = vpop.f32.mrf.mxu0 }
 0x25f   :  { %v1389_v4 = vadd.f32 %v1388_v53, %v1374_v63 }
 0x260   :  { %v1390_v1 = vpop.f32.mrf.mxu1 }
 0x261   :  { %v1910_v11 = vadd.f32 %v1898_v5, %v1389_v4 }
 0x263   :  { %v1922_v18 = vmax.f32 %v1910_v11, 0.0 }
 0x264   :  { %v1346_v7 = vpop.f32.mrf.mxu2 }
 0x265   :  { %v1361_v15 = vadd.f32 %v1360_v62, %v1346_v7 }
 0x266   :  { %v1362_v9 = vpop.f32.mrf.mxu3  ;;  %v1376_v10 = vpop.f32.mrf.mxu0 }
 0x267   :  { %v1391_v12 = vadd.f32 %v1390_v1, %v1376_v10  ;;  %v1909_v23 = vadd.f32 %v1897_v16, %v1361_v15 }
 0x268   :  { %v1639_v14 = vpop.f32.mrf.mxu1 }
 0x269   :  { %v1916_v19 = vadd.f32 %v1898_v5, %v1391_v12  ;;  %v1921_v29 = vmax.f32 %v1909_v23, 0.0 }
 0x26b   :  { %v1928_v20 = vmax.f32 %v1916_v19, 0.0 }
 0x26c   :  { %v1348_v22 = vpop.f32.mrf.mxu2 }
 0x26d   :  { %v1934_v24 = vpack.c.bf16 %v1928_v20, %v1922_v18  ;;  %v1363_v25 = vadd.f32 %v1362_v9, %v1348_v22 }
 0x26e   :  { %v1611_v27 = vpop.f32.mrf.mxu3  ;;  %v1625_v28 = vpop.f32.mrf.mxu0 }
 0x26f   :  { %v1915_v60 = vadd.f32 %v1897_v16, %v1363_v25  ;;  %2349 = vmatmul.bf16.vlgmr.msra.gmra.mxu3 %v1934_v24  ;;  %v1640_v33 = vadd.f32 %v1639_v14, %v1625_v28 }
 0x270   :  { %v1641_v31 = vpop.f32.mrf.mxu1 }
 0x271   :  { %v1927_v30 = vmax.f32 %v1915_v60, 0.0  ;;  %v1912_v37 = vadd.f32 %v1900_v34, %v1640_v33 }
 0x273   :  { %v1933_v32 = vpack.c.bf16 %v1927_v30, %v1921_v29  ;;  %v1924_v44 = vmax.f32 %v1912_v37, 0.0 }
 0x274   :  { %v1597_v35 = vpop.f32.mrf.mxu2 }
 0x275   :  { %2335 = vmatmul.bf16.vlgmr.msra.gmra.mxu2 %v1933_v32  ;;  %v1612_v40 = vadd.f32 %v1611_v27, %v1597_v35 }
 0x276   :  { %v1627_v36 = vpop.f32.mrf.mxu0  ;;  %v1613_v39 = vpop.f32.mrf.mxu3 }
 0x277   :  { %v1642_v38 = vadd.f32 %v1641_v31, %v1627_v36  ;;  %v1911_v48 = vadd.f32 %v1899_v41, %v1612_v40 }
 0x279   :  { %v1918_v43 = vadd.f32 %v1900_v34, %v1642_v38  ;;  %v1890_v46 = vpop.f32.mrf.mxu1  ;;  %v1923_v53 = vmax.f32 %v1911_v48, 0.0 }
 0x27b   :  { %v1930_v45 = vmax.f32 %v1918_v43, 0.0 }
 0x27c   :  { %v1599_v47 = vpop.f32.mrf.mxu2 }
 0x27d   :  { %v1936_v49 = vpack.c.bf16 %v1930_v45, %v1924_v44  ;;  %v1614_v50 = vadd.f32 %v1613_v39, %v1599_v47 }
 0x27e   :  { %v1876_v51 = vpop.f32.mrf.mxu0 }
 0x27f   :  { %v1917_v52 = vadd.f32 %v1899_v41, %v1614_v50  ;;  %2377 = vmatmul.bf16.vlgmr.msrb.gmra.mxu1 %v1936_v49  ;;  %v1891_v57 = vadd.f32 %v1890_v46, %v1876_v51 }
 0x280   :  { %v1862_v55 = vpop.f32.mrf.mxu3 }
 0x281   :  { %v1929_v54 = vmax.f32 %v1917_v52, 0.0  ;;  %v1892_v62 = vpop.f32.mrf.mxu1  ;;  %v1914_v0 = vadd.f32 %v1902_v58, %v1891_v57 }
 0x283   :  { %v1935_v56 = vpack.c.bf16 %v1929_v54, %v1923_v53  ;;  %v1926_v5 = vmax.f32 %v1914_v0, 0.0 }
 0x284   :  { %v1848_v59 = vpop.f32.mrf.mxu2 }
 0x285   :  { %2363 = vmatmul.bf16.vlgmr.msrb.gmra.mxu0 %v1935_v56  ;;  %v1863_v2 = vadd.f32 %v1862_v55, %v1848_v59 }
 0x286   :  { %v1878_v63 = vpop.f32.mrf.mxu0 }
 0x287   :  { %v1893_v1 = vadd.f32 %v1892_v62, %v1878_v63  ;;  %v1913_v9 = vadd.f32 %v1901_v3, %v1863_v2 }
 0x288   :  { %v1864_v7 = vpop.f32.mrf.mxu3 }
 0x289   :  { %v1920_v4 = vadd.f32 %v1902_v58, %v1893_v1  ;;  %v1925_v13 = vmax.f32 %v1913_v9, 0.0 }
 0x28b   :  { %v1932_v6 = vmax.f32 %v1920_v4, 0.0 }
 0x28c   :  { %v1850_v8 = vpop.f32.mrf.mxu2 }
 0x28d   :  { %v1938_v10 = vpack.c.bf16 %v1932_v6, %v1926_v5  ;;  %v1865_v11 = vadd.f32 %v1864_v7, %v1850_v8 }
 0x28f   :  { %v1919_v12 = vadd.f32 %v1901_v3, %v1865_v11  ;;  %2405 = vmatmul.bf16.vlgmr.msrb.gmra.mxu3 %v1938_v10 }
 0x291   :  { %v1931_v14 = vmax.f32 %v1919_v12, 0.0 }
 0x293   :  { %v1937_v15 = vpack.c.bf16 %v1931_v14, %v1925_v13 }
 0x295   :  { %2391 = vmatmul.bf16.vlgmr.msrb.gmra.mxu2 %v1937_v15 }
 0x2f2   :  { %v2350_v16 = vpop.f32.mrf.mxu3 }
 0x2f8   :  { %v2336_v19 = vpop.f32.mrf.mxu2 }
 0x2f9   :  { %v2337_v17 = vadd.f32 %v3658_v42, %v2336_v19 }
 0x2fa   :  { %v2352_v20 = vpop.f32.mrf.mxu3 }
 0x2fb   :  { %v2351_v22 = vadd.f32 %v2350_v16, %v2337_v17 }
 0x2fc   :  { %v2378_v24 = vpop.f32.mrf.mxu1 }
 0x300   :  { %v2338_v21 = vpop.f32.mrf.mxu2 }
 0x301   :  { %v2339_v25 = vadd.f32 %v3658_v42, %v2338_v21 }
 0x302   :  { %v2364_v18 = vpop.f32.mrf.mxu0 }
 0x303   :  { %v2365_v23 = vadd.f32 %v2364_v18, %v2351_v22  ;;  %v2353_v29 = vadd.f32 %v2352_v20, %v2339_v25 }
 0x304   :  { %v2380_v32 = vpop.f32.mrf.mxu1 }
 0x305   :  { %v2379_v27 = vadd.f32 %v2378_v24, %v2365_v23 }
 0x30a   :  { %v2366_v26 = vpop.f32.mrf.mxu0 }
 0x30b   :  { %v2367_v61 = vadd.f32 %v2366_v26, %v2353_v29 }
 0x30d   :  { %v2381_v33 = vadd.f32 %v2380_v32, %v2367_v61 }
 0x312   :  { %v2406_v28 = vpop.f32.mrf.mxu3 }
 0x318   :  { %v2392_v60 = vpop.f32.mrf.mxu2 }
 0x319   :  { %v2393_v30 = vadd.f32 %v2392_v60, %v2379_v27 }
 0x31a   :  { %v2408_v36 = vpop.f32.mrf.mxu3 }
 0x31b   :  { %v2407_v31 = vadd.f32 %v2406_v28, %v2393_v30 }
 0x31d   :  { %2411 = vst [vmem:[#allocation16 + $0x10] sm:$0xff] %v2407_v31 }
 0x320   :  { %v2394_v34 = vpop.f32.mrf.mxu2 }
 0x321   :  { %v2395_v35 = vadd.f32 %v2394_v34, %v2381_v33 }
 0x323   :  { %v2409_v37 = vadd.f32 %v2408_v36, %v2395_v35 }
 0x325   :  { %2412 = vst [vmem:[#allocation16 + $0x28] sm:$0xff] %v2409_v37 }
 0x326   :  { %2425 = dma.vmem_to_hbm [thread:$0]  %s2418_s30, 768, %s2420_s12, [#allocation4], %s3891_s19, %s3891_s19, %s3892_s20  }
 0x327   :  { %3887 = dma.done.wait [#allocation4], 768  }
 0x328   :  { %3888 = vsyncadd [#allocation4], 4294966528 }
 0x329   :  { %2430 = vsyncpa [#allocation3], 1 }
 0x32a   :  { %2431 = vsyncpa [#allocation6], 1 }
 0x32b   :  { %2432 = vsyncpa [#allocation9], 1 }
 0x32c   :  { %2433 = vsyncpa [#allocation12], 1 }
 0x32d   :  { %2434 = vsyncpa [#allocation15], 1 }
 0x32e   :  { %2435 = vsyncpa [#allocation4], 1 }

// kernel: tpu_custom_call.1
= control target key start
LH: loop header
LB: loop body
LE: loop exit
PB: predicated region body
PF: predicated region fallthrough
CT: control target
= control target key end

     0   :  { %14 = vsyncpa [#allocation3], 0  ;;  %s4079_s0 = inlined_call_operand.hbm [shape: f32[16,8,256], index: 0, kind: input, shape index: {}]   ;;  %s4080_s1 = inlined_call_operand.hbm [shape: f32[8,256], index: 1, kind: input, shape index: {}]   ;;  %s4081_s2 = inlined_call_operand.hbm [shape: f32[1,256], index: 2, kind: input, shape index: {}]   ;;  %s4082_s3 = inlined_call_operand.hbm [shape: bf16[256,768], index: 3, kind: input, shape index: {}]   ;;  %s4083_s4 = inlined_call_operand.hbm [shape: f32[1,768], index: 4, kind: input, shape index: {}]   ;;  %s4084_s5 = inlined_call_operand.hbm [shape: bf16[3,256,256], index: 5, kind: input, shape index: {}]   ;;  %s4085_s6 = inlined_call_operand.hbm [shape: f32[1,768], index: 6, kind: input, shape index: {}]   ;;  %s4086_s7 = inlined_call_operand.hbm [shape: bf16[768,128], index: 7, kind: input, shape index: {}]   ;;  %s4087_s8 = inlined_call_operand.vmem [shape: f32[1,128], index: 8, kind: input, shape index: {}]   ;;  %s4088_s9 = inlined_call_operand.hbm [shape: f32[16,384], index: 9, kind: output, shape index: {}]  }
   0x1   :  { %15 = vsyncpa [#allocation6], 0 }
   0x2   :  { %16 = vsyncpa [#allocation9], 0 }
   0x3   :  { %17 = vsyncpa [#allocation12], 0 }
   0x4   :  { %18 = vsyncpa [#allocation15], 0  ;;  %s38_s11 = sshll.u32 %s4080_s1, 4  ;;  %s39_s11 = int_to_ptr.hbm [resolvable:$true] %s38_s11 }
   0x5   :  { %19 = vsyncpa [#allocation4], 0  ;;  %s3889_s12 = smov [#allocation5]   ;;  %s59_s16 = sshll.u32 %s4082_s3, 4  ;;  %s60_s16 = int_to_ptr.hbm [resolvable:$true] %s59_s16 }
   0x6   :  { %s40_s13 = sshll.u32 %s3889_s12, 4  ;;  %s3890_s17 = smov [#allocation8]   ;;  %s41_s13 = int_to_ptr.vmem [resolvable:$true] %s40_s13 }
   0x7   :  { %43 = dma.hbm_to_vmem [thread:$0]  %s39_s11, 256, %s41_s13, [#allocation6]  }
   0x8   :  { %s61_s18 = sshll.u32 %s3890_s17, 4  ;;  %s3891_s19 = smov 384   ;;  %s62_s18 = int_to_ptr.vmem [resolvable:$true] %s61_s18 }
   0x9   :  { %s3892_s20 = smov 24   ;;  %s83_s22 = sshll.u32 %s4084_s5, 4  ;;  %s84_s22 = int_to_ptr.hbm [resolvable:$true] %s83_s22 }
   0xa   :  { %67 = dma.hbm_to_vmem [thread:$0]  %s60_s16, 12288, %s62_s18, [#allocation9], %s3891_s19, %s3891_s19, %s3892_s20  }
   0xb   :  { %s3893_s23 = smov [#allocation11]   ;;  %s24_s26 = sshll.u32 %s4079_s0, 4  ;;  %s25_s26 = int_to_ptr.hbm [resolvable:$true] %s24_s26 }
   0xc   :  { %s85_s24 = sshll.u32 %s3893_s23, 4  ;;  %s3894_s27 = smov 128   ;;  %s86_s24 = int_to_ptr.vmem [resolvable:$true] %s85_s24 }
   0xd   :  { %s3895_s28 = smov 8   ;;  %s3896_s29 = smov [#allocation2]  }
   0xe   :  { %91 = dma.hbm_to_vmem [thread:$0]  %s84_s22, 12288, %s86_s24, [#allocation12], %s3894_s27, %s3894_s27, %s3895_s28  }
   0xf   :  { %s26_s30 = sshll.u32 %s3896_s29, 4  ;;  %s3897_s10 = smov 256   ;;  %s27_s30 = int_to_ptr.vmem [resolvable:$true] %s26_s30 }
  0x10   :  { %s3898_s11 = smov 16   ;;  %s49_s13 = sshll.u32 %s4081_s2, 4  ;;  %s50_s13 = int_to_ptr.hbm [resolvable:$true] %s49_s13 }
  0x11   :  { %32 = dma.hbm_to_vmem [thread:$0]  %s25_s26, 4096, %s27_s30, [#allocation3], %s3897_s10, %s3897_s10, %s3898_s11  }
  0x12   :  { %s3899_s14 = smov [#allocation7]   ;;  %s73_s17 = sshll.u32 %s4083_s4, 4  ;;  %s74_s17 = int_to_ptr.hbm [resolvable:$true] %s73_s17 }
  0x13   :  { %s51_s15 = sshll.u32 %s3899_s14, 4  ;;  %s3900_s18 = smov [#allocation10]   ;;  %s52_s15 = int_to_ptr.vmem [resolvable:$true] %s51_s15 }
  0x14   :  { %54 = dma.hbm_to_vmem [thread:$0]  %s50_s13, 32, %s52_s15, [#allocation6]  }
  0x15   :  { %s75_s1 = sshll.u32 %s3900_s18, 4  ;;  %s97_s23 = sshll.u32 %s4085_s6, 4  ;;  %s76_s1 = int_to_ptr.vmem [resolvable:$true] %s75_s1  ;;  %s98_s23 = int_to_ptr.hbm [resolvable:$true] %s97_s23 }
  0x16   :  { %78 = dma.hbm_to_vmem [thread:$0]  %s74_s17, 96, %s76_s1, [#allocation9]  }
  0x17   :  { %s107_s3 = sshll.u32 %s4086_s7, 4  ;;  %s3901_s25 = smov [#allocation13]   ;;  %s108_s3 = int_to_ptr.hbm [resolvable:$true] %s107_s3 }
  0x18   :  { %s99_s26 = sshll.u32 %s3901_s25, 4  ;;  %s3902_s4 = smov [#allocation14]   ;;  %s100_s26 = int_to_ptr.vmem [resolvable:$true] %s99_s26 }
  0x19   :  { %102 = dma.hbm_to_vmem [thread:$0]  %s98_s23, 96, %s100_s26, [#allocation12]  }
  0x1a   :  { %s109_s27 = sshll.u32 %s3902_s4, 4  ;;  %s3903_s28 = smov 64   ;;  %s110_s27 = int_to_ptr.vmem [resolvable:$true] %s109_s27 }
  0x1b   :  { %s3904_s29 = smov 4  }
  0x1c   :  { %115 = dma.hbm_to_vmem [thread:$0]  %s108_s3, 6144, %s110_s27, [#allocation15], %s3903_s28, %s3903_s28, %s3904_s29  }
  0x1d   :  { %3877 = dma.done.wait [#allocation3], 4096  }
  0x1e   :  { %3878 = vsyncadd [#allocation3], 4294963200 }
  0x1f   :  { %3879 = dma.done.wait [#allocation6], 288  }
  0x20   :  { %3880 = vsyncadd [#allocation6], 4294967008 }
  0x21   :  { %3881 = dma.done.wait [#allocation9], 12384  }
  0x22   :  { %3882 = vsyncadd [#allocation9], 4294954912 }
  0x23   :  { %3883 = dma.done.wait [#allocation12], 12384  }
  0x24   :  { %3884 = vsyncadd [#allocation12], 4294954912 }
  0x25   :  { %3885 = dma.done.wait [#allocation15], 6144  }
  0x26   :  { %3886 = vsyncadd [#allocation15], 4294961152  ;;  %v150_v0 = vld [vmem:[#allocation2] sm:$0xff]  ;;  %v151_v1 = vld [vmem:[#allocation2 + $0x8] sm:$0xff]  ;;  %v3905_v48 = vmov 256.0   ;;  %v277_v59 = vlaneseq  ;;  %vm295_vm1 = vcmask 1041409  }
  0x27   :  { %v154_v2 = vld [vmem:[#allocation2 + $0x20] sm:$0xff]  ;;  %v182_v3 = vadd.f32 %v151_v1, %v150_v0  ;;  %v155_v4 = vld [vmem:[#allocation2 + $0x28] sm:$0xff]  ;;  %v152_v9 = vld [vmem:[#allocation2 + $0x10] sm:$0xff]  ;;  %3659 = vrcp.f32 %v3905_v48  ;;  %vm297_vm2 = vcmask 1042434   ;;  %vm299_vm3 = vcmask 1043459   ;;  %s2419_s12 = sshll.u32 %s4088_s9, 4  ;;  %s2420_s12 = int_to_ptr.hbm [resolvable:$true] %s2419_s12 }
  0x28   :  { %v158_v5 = vld [vmem:[#allocation2 + $0x40] sm:$0xff]  ;;  %v159_v6 = vld [vmem:[#allocation2 + $0x48] sm:$0xff]  ;;  %v188_v7 = vadd.f32 %v155_v4, %v154_v2  ;;  %v153_v10 = vld [vmem:[#allocation2 + $0x18] sm:$0xff]  ;;  %v3986_v61 = vand.u32 127, %v277_v59  ;;  %vm301_vm4 = vcmask 1044484   ;;  %vm303_vm5 = vcmask 1045509  }
  0x29   :  { %v194_v8 = vadd.f32 %v159_v6, %v158_v5  ;;  %183 = vadd.xlane.f32.xlu0 %v182_v3  ;;  %v156_v11 = vld [vmem:[#allocation2 + $0x30] sm:$0xff]  ;;  %v157_v12 = vld [vmem:[#allocation2 + $0x38] sm:$0xff]  ;;  %v185_v15 = vadd.f32 %v153_v10, %v152_v9  ;;  %v162_v18 = vld [vmem:[#allocation2 + $0x60] sm:$0xff]  ;;  %vm305_vm6 = vcmask 1046534   ;;  %vm307_vm7 = vcmask 1047559  }
  0x2a   :  { %189 = vadd.xlane.f32.xlu1 %v188_v7  ;;  %v160_v13 = vld [vmem:[#allocation2 + $0x50] sm:$0xff]  ;;  %v161_v14 = vld [vmem:[#allocation2 + $0x58] sm:$0xff]  ;;  %v191_v16 = vadd.f32 %v157_v12, %v156_v11  ;;  %v163_v19 = vld [vmem:[#allocation2 + $0x68] sm:$0xff]  ;;  %vm316_vm8 = vcmask 64512  }
  0x2b   :  { %195 = vadd.xlane.f32.xlu2 %v194_v8  ;;  %v197_v17 = vadd.f32 %v161_v14, %v160_v13  ;;  %v164_v20 = vld [vmem:[#allocation2 + $0x70] sm:$0xff]  ;;  %v165_v21 = vld [vmem:[#allocation2 + $0x78] sm:$0xff]  ;;  %v166_v22 = vld [vmem:[#allocation2 + $0x80] sm:$0xff]  ;;  %v200_v24 = vadd.f32 %v163_v19, %v162_v18 }
  0x2c   :  { %v167_v23 = vld [vmem:[#allocation2 + $0x88] sm:$0xff]  ;;  %v203_v25 = vadd.f32 %v165_v21, %v164_v20  ;;  %v168_v27 = vld [vmem:[#allocation2 + $0x90] sm:$0xff]  ;;  %v169_v28 = vld [vmem:[#allocation2 + $0x98] sm:$0xff] }
  0x2d   :  { %v206_v26 = vadd.f32 %v167_v23, %v166_v22  ;;  %v170_v29 = vld [vmem:[#allocation2 + $0xa0] sm:$0xff]  ;;  %v171_v30 = vld [vmem:[#allocation2 + $0xa8] sm:$0xff]  ;;  %v172_v31 = vld [vmem:[#allocation2 + $0xb0] sm:$0xff]  ;;  %v209_v33 = vadd.f32 %v169_v28, %v168_v27  ;;  %v3660_v49 = vpop.eup %3659 }
  0x2e   :  { %v173_v32 = vld [vmem:[#allocation2 + $0xb8] sm:$0xff]  ;;  %v212_v34 = vadd.f32 %v171_v30, %v170_v29  ;;  %v174_v36 = vld [vmem:[#allocation2 + $0xc0] sm:$0xff]  ;;  %v175_v37 = vld [vmem:[#allocation2 + $0xc8] sm:$0xff]  ;;  %v231_v50 = vmul.f32 256.0, %v3660_v49  ;;  %vm235_vm0 = vweird.f32 %v3660_v49 }
  0x2f   :  { %v215_v35 = vadd.f32 %v173_v32, %v172_v31  ;;  %v176_v38 = vld [vmem:[#allocation2 + $0xd0] sm:$0xff]  ;;  %v177_v39 = vld [vmem:[#allocation2 + $0xd8] sm:$0xff]  ;;  %v178_v40 = vld [vmem:[#allocation2 + $0xe0] sm:$0xff]  ;;  %v218_v42 = vadd.f32 %v175_v37, %v174_v36 }
  0x30   :  { %v179_v41 = vld [vmem:[#allocation2 + $0xe8] sm:$0xff]  ;;  %v221_v43 = vadd.f32 %v177_v39, %v176_v38  ;;  %v180_v45 = vld [vmem:[#allocation2 + $0xf0] sm:$0xff]  ;;  %v181_v46 = vld [vmem:[#allocation2 + $0xf8] sm:$0xff]  ;;  %v232_v53 = vsub.f32 1.0, %v231_v50 }
  0x31   :  { %186 = vadd.xlane.f32.xlu0 %v185_v15  ;;  %v224_v44 = vadd.f32 %v179_v41, %v178_v40  ;;  %v227_v47 = vadd.f32 %v181_v46, %v180_v45  ;;  %v253_v51 = vld [vmem:[#allocation5] sm:$0xff]  ;;  %v254_v52 = vld [vmem:[#allocation5 + $0x8] sm:$0xff]  ;;  %v3445_v14 = vld [vmem:[#allocation8 + $0x164] sm:$0xf0] }
  0x32   :  { %192 = vadd.xlane.f32.xlu1 %v191_v16  ;;  %336 = vmatpush.msra.mxu0 %v253_v51  ;;  %v233_v54 = vmul.f32 %v3660_v49, %v232_v53  ;;  %v2610_v13 = vld [vmem:[#allocation8 + $0x150] sm:$0xf]  ;;  %v3493_v19 = vld [vmem:[#allocation8 + $0x2e4] sm:$0xf0]  ;;  %v3442_v20 = vld [vmem:[#allocation8 + $0x154] sm:$0xf] }
  0x33   :  { %198 = vadd.xlane.f32.xlu2 %v197_v17  ;;  %359 = vmatpush.msra.mxu1 %v254_v52  ;;  %v2802_v15 = vld [vmem:[#allocation8 + $0x2d0] sm:$0xf]  ;;  %v2611_v18 = vor.u32 %v3445_v14, %v2610_v13  ;;  %v2612_v21 = vld [vmem:[#allocation8 + $0x168] sm:$0xf0]  ;;  %v2586_v28 = vld [vmem:[#allocation8 + $0x120] sm:$0xf] }
  0x34   :  { %v234_v55 = vadd.f32 %v3660_v49, %v233_v54  ;;  %v2804_v27 = vld [vmem:[#allocation8 + $0x2e8] sm:$0xf0]  ;;  %v3487_v36 = vld [vmem:[#allocation8 + $0x2b4] sm:$0xf0]  ;;  %v3436_v39 = vld [vmem:[#allocation8 + $0x124] sm:$0xf] }
  0x35   :  { %963 = vmatpush.bf16.msra.mxu2 %v2611_v18  ;;  %v2588_v40 = vld [vmem:[#allocation8 + $0x138] sm:$0xf0]  ;;  %v3484_v41 = vld [vmem:[#allocation8 + $0x2a4] sm:$0xf]  ;;  %v2562_v46 = vld [vmem:[#allocation8 + $0xf0] sm:$0xf] }
  0x36   :  { %v3984_v60 = vsel %vm235_vm0, %v3660_v49, %v234_v55  ;;  %v2780_v45 = vld [vmem:[#allocation8 + $0x2b8] sm:$0xf0]  ;;  %v2754_v51 = vld [vmem:[#allocation8 + $0x270] sm:$0xf]  ;;  %v3481_v52 = vld [vmem:[#allocation8 + $0x284] sm:$0xf0] }
  0x37   :  { %v2783_v50 = vor.u32 %v3484_v41, %v2780_v45  ;;  %v3430_v53 = vld [vmem:[#allocation8 + $0xf4] sm:$0xf]  ;;  %v3472_v13 = vld [vmem:[#allocation8 + $0x244] sm:$0xf]  ;;  %v2732_v14 = vld [vmem:[#allocation8 + $0x258] sm:$0xf0] }
  0x38   :  { %v2514_v18 = vld [vmem:[#allocation8 + $0x90] sm:$0xf] }
  0x39   :  { %201 = vadd.xlane.f32.xlu0 %v200_v24  ;;  %v2803_v24 = vor.u32 %v3493_v19, %v2802_v15  ;;  %v3421_v19 = vld [vmem:[#allocation8 + $0xa4] sm:$0xf0] }
  0x3a   :  { %204 = vadd.xlane.f32.xlu1 %v203_v25  ;;  %v2615_v25 = vor.u32 %v3442_v20, %v2612_v21  ;;  %v2706_v20 = vld [vmem:[#allocation8 + $0x210] sm:$0xf] }
  0x3b   :  { %207 = vadd.xlane.f32.xlu2 %v206_v26  ;;  %v3490_v26 = vld [vmem:[#allocation8 + $0x2d4] sm:$0xf]  ;;  %977 = vmatpush.bf16.msra.mxu3 %v2803_v24 }
  0x3c   :  { %991 = vmatpush.bf16.msrb.mxu0 %v2615_v25  ;;  %v3418_v24 = vld [vmem:[#allocation8 + $0x94] sm:$0xf]  ;;  %v2516_v25 = vld [vmem:[#allocation8 + $0xa8] sm:$0xf0] }
  0x41   :  { %210 = vadd.xlane.f32.xlu0 %v209_v33  ;;  %v2807_v33 = vor.u32 %v3490_v26, %v2804_v27  ;;  %v2735_v26 = vor.u32 %v3472_v13, %v2732_v14 }
  0x42   :  { %213 = vadd.xlane.f32.xlu1 %v212_v34  ;;  %v3439_v34 = vld [vmem:[#allocation8 + $0x134] sm:$0xf0] }
  0x43   :  { %216 = vadd.xlane.f32.xlu2 %v215_v35  ;;  %v2778_v35 = vld [vmem:[#allocation8 + $0x2a0] sm:$0xf]  ;;  %v2587_v38 = vor.u32 %v3439_v34, %v2586_v28  ;;  %1005 = vmatpush.bf16.msrb.mxu1 %v2807_v33  ;;  %v2515_v28 = vor.u32 %v3421_v19, %v2514_v18  ;;  %v2519_v34 = vor.u32 %v3418_v24, %v2516_v25 }
  0x45   :  { %964 = vmatpush.bf16.msra.mxu2 %v2587_v38 }
  0x47   :  { %1006 = vmatpush.bf16.msrb.mxu1 %v2783_v50  ;;  %v2684_v50 = vld [vmem:[#allocation8 + $0x1f8] sm:$0xf0] }
  0x49   :  { %219 = vadd.xlane.f32.xlu0 %v218_v42 }
  0x4a   :  { %222 = vadd.xlane.f32.xlu1 %v221_v43  ;;  %v2779_v43 = vor.u32 %v3487_v36, %v2778_v35  ;;  %v3415_v35 = vld [vmem:[#allocation8 + $0x74] sm:$0xf0]  ;;  %v2682_v36 = vld [vmem:[#allocation8 + $0x1e0] sm:$0xf] }
  0x4b   :  { %225 = vadd.xlane.f32.xlu2 %v224_v44  ;;  %v2591_v44 = vor.u32 %v3436_v39, %v2588_v40  ;;  %v3412_v39 = vld [vmem:[#allocation8 + $0x64] sm:$0xf]  ;;  %v2492_v40 = vld [vmem:[#allocation8 + $0x78] sm:$0xf0] }
  0x4c   :  { %978 = vmatpush.bf16.msra.mxu3 %v2779_v43 }
  0x4d   :  { %992 = vmatpush.bf16.msrb.mxu0 %v2591_v44 }
  0x51   :  { %228 = vadd.xlane.f32.xlu0 %v227_v47  ;;  %v3433_v47 = vld [vmem:[#allocation8 + $0x104] sm:$0xf0] }
  0x52   :  { %v2563_v55 = vor.u32 %v3433_v47, %v2562_v46 }
  0x54   :  { %965 = vmatpush.bf16.msra.mxu2 %v2563_v55  ;;  %v3409_v55 = vld [vmem:[#allocation8 + $0x44] sm:$0xf0] }
  0x9c   :  { %v184_v56 = vpop.xlane.xlu0 %183 }
  0x9d   :  { %v190_v57 = vpop.xlane.xlu1 %189  ;;  %v237_v62 = vmul.f32 %v3984_v60, %v184_v56  ;;  %v2564_v56 = vld [vmem:[#allocation8 + $0x108] sm:$0xf0] }
  0x9e   :  { %v196_v58 = vpop.xlane.xlu2 %195  ;;  %v239_v63 = vmul.f32 %v3984_v60, %v190_v57  ;;  %v3478_v57 = vld [vmem:[#allocation8 + $0x274] sm:$0xf] }
  0x9f   :  { %v279_v5 = vperm.slane %v237_v62, %v3986_v61  ;;  %v241_v6 = vmul.f32 %v3984_v60, %v196_v58  ;;  %v2756_v58 = vld [vmem:[#allocation8 + $0x288] sm:$0xf0]  ;;  %v2755_v62 = vor.u32 %v3481_v52, %v2754_v51 }
  0xa0   :  { %v281_v8 = vperm.slane %v239_v63, %v3986_v61  ;;  %v2567_v63 = vor.u32 %v3430_v53, %v2564_v56  ;;  %v2495_v53 = vor.u32 %v3412_v39, %v2492_v40  ;;  %v2658_v56 = vld [vmem:[#allocation8 + $0x1b0] sm:$0xf]  ;;  %v2594_v39 = vld [vmem:[#allocation8 + $0x128] sm:$0xf]  ;;  %v3440_v40 = vld [vmem:[#allocation8 + $0x13c] sm:$0xf0] }
  0xa1   :  { %v283_v16 = vperm.slane %v241_v6, %v3986_v61  ;;  %v2540_v6 = vld [vmem:[#allocation8 + $0xd8] sm:$0xf0]  ;;  %979 = vmatpush.bf16.msra.mxu3 %v2755_v62  ;;  %v2468_v62 = vld [vmem:[#allocation8 + $0x48] sm:$0xf0] }
  0xa2   :  { %993 = vmatpush.bf16.msrb.mxu0 %v2567_v63 }
  0xa4   :  { %v187_v0 = vpop.xlane.xlu0 %186 }
  0xa5   :  { %v238_v1 = vmul.f32 %v3984_v60, %v187_v0  ;;  %v193_v2 = vpop.xlane.xlu1 %192  ;;  %v2538_v0 = vld [vmem:[#allocation8 + $0xc0] sm:$0xf] }
  0xa6   :  { %v199_v3 = vpop.xlane.xlu2 %198  ;;  %v240_v4 = vmul.f32 %v3984_v60, %v193_v2  ;;  %v2730_v2 = vld [vmem:[#allocation8 + $0x240] sm:$0xf] }
  0xa7   :  { %v280_v7 = vperm.slane %v238_v1, %v3986_v61  ;;  %v242_v10 = vmul.f32 %v3984_v60, %v199_v3  ;;  %v3427_v1 = vld [vmem:[#allocation8 + $0xd4] sm:$0xf0] }
  0xa8   :  { %v282_v9 = vperm.slane %v240_v4, %v3986_v61  ;;  %v3475_v4 = vld [vmem:[#allocation8 + $0x254] sm:$0xf0] }
  0xa9   :  { %v296_v11 = vsel %vm295_vm1, %v280_v7, %v279_v5  ;;  %v284_v22 = vperm.slane %v242_v10, %v3986_v61  ;;  %v3424_v5 = vld [vmem:[#allocation8 + $0xc4] sm:$0xf] }
  0xaa   :  { %v298_v12 = vsel %vm297_vm2, %v281_v8, %v296_v11  ;;  %v2759_v8 = vor.u32 %v3478_v57, %v2756_v58  ;;  %v3457_v58 = vld [vmem:[#allocation8 + $0x1c4] sm:$0xf0] }
  0xab   :  { %v300_v17 = vsel %vm299_vm3, %v282_v9, %v298_v12  ;;  %v2539_v12 = vor.u32 %v3427_v1, %v2538_v0 }
  0xac   :  { %v202_v23 = vpop.xlane.xlu0 %201  ;;  %v302_v32 = vsel %vm301_vm4, %v283_v16, %v300_v17  ;;  %v2731_v16 = vor.u32 %v3475_v4, %v2730_v2  ;;  %v2543_v17 = vor.u32 %v3424_v5, %v2540_v6  ;;  %1007 = vmatpush.bf16.msrb.mxu1 %v2759_v8  ;;  %v3454_v4 = vld [vmem:[#allocation8 + $0x1b4] sm:$0xf]  ;;  %v2660_v5 = vld [vmem:[#allocation8 + $0x1c8] sm:$0xf0] }
  0xad   :  { %v243_v29 = vmul.f32 %v3984_v60, %v202_v23  ;;  %v205_v30 = vpop.xlane.xlu1 %204  ;;  %v304_v49 = vsel %vm303_vm5, %v284_v22, %v302_v32  ;;  %v3469_v23 = vld [vmem:[#allocation8 + $0x224] sm:$0xf0]  ;;  %966 = vmatpush.bf16.msra.mxu2 %v2539_v12  ;;  %v2663_v14 = vor.u32 %v3454_v4, %v2660_v5  ;;  %v3476_v4 = vld [vmem:[#allocation8 + $0x25c] sm:$0xf0]  ;;  %v3425_v5 = vld [vmem:[#allocation8 + $0xcc] sm:$0xf] }
  0xae   :  { %v208_v31 = vpop.xlane.xlu2 %207  ;;  %v244_v37 = vmul.f32 %v3984_v60, %v205_v30  ;;  %v2708_v30 = vld [vmem:[#allocation8 + $0x228] sm:$0xf0]  ;;  %980 = vmatpush.bf16.msra.mxu3 %v2731_v16  ;;  %994 = vmatpush.bf16.msrb.mxu0 %v2543_v17  ;;  %v2707_v33 = vor.u32 %v3469_v23, %v2706_v20  ;;  %v3400_v16 = vld [vmem:[#allocation8 + $0x4] sm:$0xf]  ;;  %v2444_v17 = vld [vmem:[#allocation8 + $0x18] sm:$0xf0] }
  0xaf   :  { %v285_v42 = vperm.slane %v243_v29, %v3986_v61  ;;  %v245_v3 = vmul.f32 %v3984_v60, %v208_v31  ;;  %v3466_v29 = vld [vmem:[#allocation8 + $0x214] sm:$0xf]  ;;  %v2490_v31 = vld [vmem:[#allocation8 + $0x60] sm:$0xf]  ;;  %v2447_v25 = vor.u32 %v3400_v16, %v2444_v17  ;;  %v3470_v16 = vld [vmem:[#allocation8 + $0x22c] sm:$0xf0] }
  0xb0   :  { %v286_v48 = vperm.slane %v244_v37, %v3986_v61  ;;  %v3463_v37 = vld [vmem:[#allocation8 + $0x1f4] sm:$0xf0]  ;;  %1008 = vmatpush.bf16.msrb.mxu1 %v2735_v26  ;;  %v2491_v47 = vor.u32 %v3415_v35, %v2490_v31  ;;  %v3494_v31 = vld [vmem:[#allocation8 + $0x2ec] sm:$0xf0]  ;;  %v3491_v35 = vld [vmem:[#allocation8 + $0x2dc] sm:$0xf] }
  0xb1   :  { %v306_v54 = vsel %vm305_vm6, %v285_v42, %v304_v49  ;;  %v287_v21 = vperm.slane %v245_v3, %v3986_v61  ;;  %v2711_v42 = vor.u32 %v3466_v29, %v2708_v30  ;;  %967 = vmatpush.bf16.msra.mxu2 %v2515_v28  ;;  %v3460_v49 = vld [vmem:[#allocation8 + $0x1e4] sm:$0xf]  ;;  %v3446_v29 = vld [vmem:[#allocation8 + $0x16c] sm:$0xf0]  ;;  %v2810_v30 = vld [vmem:[#allocation8 + $0x2d8] sm:$0xf] }
  0xb2   :  { %v308_v59 = vsel %vm307_vm7, %v286_v48, %v306_v54  ;;  %v2683_v48 = vor.u32 %v3463_v37, %v2682_v36  ;;  %981 = vmatpush.bf16.msra.mxu3 %v2707_v33  ;;  %995 = vmatpush.bf16.msrb.mxu0 %v2519_v34  ;;  %v2466_v54 = vld [vmem:[#allocation8 + $0x30] sm:$0xf]  ;;  %v2687_v0 = vor.u32 %v3460_v49, %v2684_v50  ;;  %v2620_v34 = vld [vmem:[#allocation8 + $0x170] sm:$0xf0]  ;;  %v2788_v49 = vld [vmem:[#allocation8 + $0x2c0] sm:$0xf0] }
  0xb3   :  { %2436 = vmatmul.msk.f32.vlgmr.msra.gmra.mxu0 %vm316_vm8, %v308_v59  ;;  %2438 = vmatmul.msk.f32.vlgmr.msra.gmra.mxu1 %vm316_vm8, %v308_v59  ;;  %v3406_v59 = vld [vmem:[#allocation8 + $0x34] sm:$0xf]  ;;  %v2467_v3 = vor.u32 %v3409_v55, %v2466_v54  ;;  %v2811_v33 = vor.u32 %v3494_v31, %v2810_v30  ;;  %v2570_v50 = vld [vmem:[#allocation8 + $0xf8] sm:$0xf]  ;;  %v3482_v54 = vld [vmem:[#allocation8 + $0x28c] sm:$0xf0] }
  0xb4   :  { %v211_v7 = vpop.xlane.xlu0 %210  ;;  %1009 = vmatpush.bf16.msrb.mxu1 %v2711_v42  ;;  %v2471_v8 = vor.u32 %v3406_v59, %v2468_v62  ;;  %v2812_v36 = vld [vmem:[#allocation8 + $0x2f0] sm:$0xf0]  ;;  %v2595_v42 = vor.u32 %v3440_v40, %v2594_v39  ;;  %v3479_v59 = vld [vmem:[#allocation8 + $0x27c] sm:$0xf]  ;;  %v3461_v30 = vld [vmem:[#allocation8 + $0x1ec] sm:$0xf] }
  0xb5   :  { %v246_v9 = vmul.f32 %v3984_v60, %v211_v7  ;;  %v214_v10 = vpop.xlane.xlu1 %213  ;;  %968 = vmatpush.bf16.msra.mxu2 %v2491_v47  ;;  %v2659_v7 = vor.u32 %v3457_v58, %v2658_v56  ;;  %v2572_v58 = vld [vmem:[#allocation8 + $0x110] sm:$0xf0]  ;;  %v3419_v17 = vld [vmem:[#allocation8 + $0x9c] sm:$0xf]  ;;  %v3458_v39 = vld [vmem:[#allocation8 + $0x1cc] sm:$0xf0] }
  0xb6   :  { %v217_v11 = vpop.xlane.xlu2 %216  ;;  %v247_v15 = vmul.f32 %v3984_v60, %v214_v10  ;;  %982 = vmatpush.bf16.msra.mxu3 %v2683_v48  ;;  %996 = vmatpush.bf16.msrb.mxu0 %v2495_v53  ;;  %v3403_v10 = vld [vmem:[#allocation8 + $0x14] sm:$0xf0]  ;;  %v3485_v48 = vld [vmem:[#allocation8 + $0x2ac] sm:$0xf]  ;;  %v3407_v40 = vld [vmem:[#allocation8 + $0x3c] sm:$0xf] }
  0xb7   :  { %v288_v22 = vperm.slane %v246_v9, %v3986_v61  ;;  %v248_v27 = vmul.f32 %v3984_v60, %v217_v11  ;;  %v2442_v9 = vld [vmem:[#allocation8] sm:$0xf]  ;;  %v2762_v53 = vld [vmem:[#allocation8 + $0x278] sm:$0xf] }
  0xb8   :  { %v289_v32 = vperm.slane %v247_v15, %v3986_v61  ;;  %v2634_v11 = vld [vmem:[#allocation8 + $0x180] sm:$0xf]  ;;  %1010 = vmatpush.bf16.msrb.mxu1 %v2687_v0  ;;  %v3451_v15 = vld [vmem:[#allocation8 + $0x194] sm:$0xf0]  ;;  %v2443_v20 = vor.u32 %v3403_v10, %v2442_v9  ;;  %v2763_v56 = vor.u32 %v3482_v54, %v2762_v53  ;;  %v2546_v0 = vld [vmem:[#allocation8 + $0xc8] sm:$0xf] }
  0xb9   :  { %v309_v38 = vsel %vm295_vm1, %v288_v22, %v287_v21  ;;  %v290_v43 = vperm.slane %v248_v27, %v3986_v61  ;;  %969 = vmatpush.bf16.msra.mxu2 %v2467_v3  ;;  %v3448_v21 = vld [vmem:[#allocation8 + $0x184] sm:$0xf]  ;;  %v2636_v22 = vld [vmem:[#allocation8 + $0x198] sm:$0xf0]  ;;  %v2635_v24 = vor.u32 %v3451_v15, %v2634_v11  ;;  %v2738_v3 = vld [vmem:[#allocation8 + $0x248] sm:$0xf] }
  0xba   :  { %v310_v51 = vsel %vm297_vm2, %v289_v32, %v309_v38  ;;  %983 = vmatpush.bf16.msra.mxu3 %v2659_v7  ;;  %997 = vmatpush.bf16.msrb.mxu0 %v2471_v8  ;;  %v2639_v27 = vor.u32 %v3448_v21, %v2636_v22  ;;  %v3443_v32 = vld [vmem:[#allocation8 + $0x15c] sm:$0xf]  ;;  %v2815_v38 = vor.u32 %v3491_v35, %v2812_v36  ;;  %v2548_v7 = vld [vmem:[#allocation8 + $0xe0] sm:$0xf0]  ;;  %v3473_v8 = vld [vmem:[#allocation8 + $0x24c] sm:$0xf] }
  0xbb   :  { %v311_v1 = vsel %vm299_vm3, %v290_v43, %v310_v51  ;;  %v2623_v37 = vor.u32 %v3443_v32, %v2620_v34  ;;  %v3488_v43 = vld [vmem:[#allocation8 + $0x2bc] sm:$0xf0]  ;;  %v2791_v51 = vor.u32 %v3485_v48, %v2788_v49  ;;  %v2740_v9 = vld [vmem:[#allocation8 + $0x260] sm:$0xf0]  ;;  %v2739_v10 = vor.u32 %v3476_v4, %v2738_v3  ;;  %v2522_v11 = vld [vmem:[#allocation8 + $0x98] sm:$0xf] }
  0xbc   :  { %v220_v41 = vpop.xlane.xlu0 %219  ;;  %1011 = vmatpush.bf16.msrb.mxu1 %v2663_v14  ;;  %v2743_v14 = vor.u32 %v3473_v8, %v2740_v9  ;;  %v2714_v15 = vld [vmem:[#allocation8 + $0x218] sm:$0xf]  ;;  %v3410_v36 = vld [vmem:[#allocation8 + $0x4c] sm:$0xf0]  ;;  %v2450_v48 = vld [vmem:[#allocation8 + $0x8] sm:$0xf] }
  0xbd   :  { %v249_v44 = vmul.f32 %v3984_v60, %v220_v41  ;;  %v223_v45 = vpop.xlane.xlu1 %222  ;;  %970 = vmatpush.bf16.msra.mxu2 %v2443_v20  ;;  %v2786_v41 = vld [vmem:[#allocation8 + $0x2a8] sm:$0xf]  ;;  %v2716_v20 = vld [vmem:[#allocation8 + $0x230] sm:$0xf0]  ;;  %v2715_v22 = vor.u32 %v3470_v16, %v2714_v15  ;;  %v2474_v35 = vld [vmem:[#allocation8 + $0x38] sm:$0xf] }
  0xbe   :  { %v226_v46 = vpop.xlane.xlu2 %225  ;;  %v250_v52 = vmul.f32 %v3984_v60, %v223_v45  ;;  %984 = vmatpush.bf16.msra.mxu3 %v2635_v24  ;;  %998 = vmatpush.bf16.msrb.mxu0 %v2447_v25  ;;  %v2596_v45 = vld [vmem:[#allocation8 + $0x140] sm:$0xf0]  ;;  %v3416_v24 = vld [vmem:[#allocation8 + $0x7c] sm:$0xf0]  ;;  %v3401_v53 = vld [vmem:[#allocation8 + $0xc] sm:$0xf] }
  0xbf   :  { %v291_v57 = vperm.slane %v249_v44, %v3986_v61  ;;  %v251_v63 = vmul.f32 %v3984_v60, %v226_v46  ;;  %v3437_v44 = vld [vmem:[#allocation8 + $0x12c] sm:$0xf]  ;;  %v2787_v46 = vor.u32 %v3488_v43, %v2786_v41  ;;  %v2476_v41 = vld [vmem:[#allocation8 + $0x50] sm:$0xf0]  ;;  %v3404_v49 = vld [vmem:[#allocation8 + $0x1c] sm:$0xf0] }
  0xc0   :  { %v292_v2 = vperm.slane %v250_v52, %v3986_v61  ;;  %1012 = vmatpush.bf16.msrb.mxu1 %v2639_v27  ;;  %v2599_v47 = vor.u32 %v3437_v44, %v2596_v45  ;;  %v3434_v52 = vld [vmem:[#allocation8 + $0x10c] sm:$0xf0]  ;;  %v2690_v27 = vld [vmem:[#allocation8 + $0x1e8] sm:$0xf]  ;;  %v2479_v43 = vor.u32 %v3407_v40, %v2476_v41  ;;  %v3455_v44 = vld [vmem:[#allocation8 + $0x1bc] sm:$0xf] }
  0xc1   :  { %v312_v6 = vsel %vm301_vm4, %v291_v57, %v311_v1  ;;  %v293_v12 = vperm.slane %v251_v63, %v3986_v61  ;;  %v2571_v55 = vor.u32 %v3434_v52, %v2570_v50  ;;  %v3431_v57 = vld [vmem:[#allocation8 + $0xfc] sm:$0xf]  ;;  %v2764_v63 = vld [vmem:[#allocation8 + $0x290] sm:$0xf0]  ;;  %v3428_v1 = vld [vmem:[#allocation8 + $0xdc] sm:$0xf0] }
  0xc2   :  { %v313_v19 = vsel %vm303_vm5, %v292_v2, %v312_v6  ;;  %1033 = vmatpush.bf16.msrb.mxu3 %v2811_v33  ;;  %1047 = vmatpush.bf16.msra.mxu0 %v2623_v37  ;;  %v2575_v62 = vor.u32 %v3431_v57, %v2572_v58  ;;  %v2767_v2 = vor.u32 %v3479_v59, %v2764_v63  ;;  %v2666_v37 = vld [vmem:[#allocation8 + $0x1b8] sm:$0xf]  ;;  %v2668_v45 = vld [vmem:[#allocation8 + $0x1d0] sm:$0xf0]  ;;  %v2642_v50 = vld [vmem:[#allocation8 + $0x188] sm:$0xf] }
  0xc3   :  { %v314_v26 = vsel %vm305_vm6, %v293_v12, %v313_v19  ;;  %v2547_v6 = vor.u32 %v3428_v1, %v2546_v0  ;;  %v3422_v12 = vld [vmem:[#allocation8 + $0xac] sm:$0xf0]  ;;  %v3467_v19 = vld [vmem:[#allocation8 + $0x21c] sm:$0xf]  ;;  %v3452_v52 = vld [vmem:[#allocation8 + $0x19c] sm:$0xf0] }
  0xc4   :  { %v229_v13 = vpop.xlane.xlu0 %228  ;;  %1061 = vmatpush.bf16.msra.mxu1 %v2815_v38  ;;  %v2523_v21 = vor.u32 %v3422_v12, %v2522_v11  ;;  %v2475_v38 = vor.u32 %v3410_v36, %v2474_v35  ;;  %v2452_v54 = vld [vmem:[#allocation8 + $0x20] sm:$0xf0]  ;;  %v3449_v57 = vld [vmem:[#allocation8 + $0x18c] sm:$0xf]  ;;  %v2626_v4 = vld [vmem:[#allocation8 + $0x160] sm:$0xf] }
  0xc5   :  { %v252_v18 = vmul.f32 %v3984_v60, %v229_v13  ;;  %v2618_v60 = vld [vmem:[#allocation8 + $0x158] sm:$0xf]  ;;  %v2551_v13 = vor.u32 %v3425_v5, %v2548_v7  ;;  %v2644_v58 = vld [vmem:[#allocation8 + $0x1a0] sm:$0xf0]  ;;  %v2818_v8 = vld [vmem:[#allocation8 + $0x2e0] sm:$0xf] }
  0xc6   :  { %1034 = vmatpush.bf16.msrb.mxu3 %v2787_v46  ;;  %1048 = vmatpush.bf16.msra.mxu0 %v2599_v47  ;;  %v255_v46 = vld [vmem:[#allocation7] sm:$0x3]  ;;  %v2671_v47 = vor.u32 %v3455_v44, %v2668_v45  ;;  %v2647_v63 = vor.u32 %v3449_v57, %v2644_v58  ;;  %v3447_v5 = vld [vmem:[#allocation8 + $0x174] sm:$0xf0]  ;;  %v2602_v16 = vld [vmem:[#allocation8 + $0x130] sm:$0xf] }
  0xc7   :  { %v294_v23 = vperm.slane %v252_v18, %v3986_v61  ;;  %v2619_v61 = vor.u32 %v3446_v29, %v2618_v60  ;;  %v2524_v18 = vld [vmem:[#allocation8 + $0xb0] sm:$0xf0]  ;;  %v3413_v60 = vld [vmem:[#allocation8 + $0x6c] sm:$0xf]  ;;  %v2500_v29 = vld [vmem:[#allocation8 + $0x80] sm:$0xf0] }
  0xc8   :  { %1062 = vmatpush.bf16.msra.mxu1 %v2791_v51  ;;  %v2527_v25 = vor.u32 %v3419_v17, %v2524_v18  ;;  %v2503_v33 = vor.u32 %v3413_v60, %v2500_v29  ;;  %v2451_v51 = vor.u32 %v3404_v49, %v2450_v48  ;;  %v257_v59 = vperm.slane %v255_v46, 0  ;;  %v3495_v9 = vld [vmem:[#allocation8 + $0x2f4] sm:$0xf0]  ;;  %v2820_v15 = vld [vmem:[#allocation8 + $0x2f8] sm:$0xf0] }
  0xc9   :  { %v315_v28 = vsel %vm307_vm7, %v294_v23, %v314_v26  ;;  %1019 = vmatpush.bf16.msrb.mxu2 %v2619_v61  ;;  %v2498_v23 = vld [vmem:[#allocation8 + $0x68] sm:$0xf]  ;;  %v2719_v26 = vor.u32 %v3467_v19, %v2716_v20  ;;  %v2692_v61 = vld [vmem:[#allocation8 + $0x200] sm:$0xf0]  ;;  %v2627_v19 = vor.u32 %v3447_v5, %v2626_v4  ;;  %v2819_v20 = vor.u32 %v3495_v9, %v2818_v8  ;;  %v2796_v60 = vld [vmem:[#allocation8 + $0x2c8] sm:$0xf0] }
  0xca   :  { %2437 = vmatmul.msk.f32.gmra.mxu0 %vm316_vm8, %v315_v28  ;;  %2439 = vmatmul.msk.f32.gmra.mxu1 %vm316_vm8, %v315_v28  ;;  %v3464_v28 = vld [vmem:[#allocation8 + $0x1fc] sm:$0xf0]  ;;  %v2499_v31 = vor.u32 %v3416_v24, %v2498_v23  ;;  %v2695_v34 = vor.u32 %v3461_v30, %v2692_v61  ;;  %v3483_v35 = vld [vmem:[#allocation8 + $0x294] sm:$0xf0]  ;;  %v3432_v36 = vld [vmem:[#allocation8 + $0x104] sm:$0xf] }
  0xcb   :  { %1035 = vmatpush.bf16.msrb.mxu3 %v2763_v56  ;;  %1049 = vmatpush.bf16.msra.mxu0 %v2575_v62  ;;  %v2691_v32 = vor.u32 %v3464_v28, %v2690_v27  ;;  %v2455_v56 = vor.u32 %v3401_v53, %v2452_v54  ;;  %v258_v62 = vperm.slane %v255_v46, 1  ;;  %v2604_v27 = vld [vmem:[#allocation8 + $0x148] sm:$0xf0]  ;;  %v3486_v28 = vld [vmem:[#allocation8 + $0x2b4] sm:$0xf] }
  0xcc   :  { %1063 = vmatpush.bf16.msra.mxu1 %v2767_v2  ;;  %v2578_v61 = vld [vmem:[#allocation8 + $0x100] sm:$0xf]  ;;  %v2746_v46 = vld [vmem:[#allocation8 + $0x250] sm:$0xf]  ;;  %v3426_v48 = vld [vmem:[#allocation8 + $0xd4] sm:$0xf] }
  0xcd   :  { %1020 = vmatpush.bf16.msrb.mxu2 %v2595_v42  ;;  %v2667_v42 = vor.u32 %v3458_v39, %v2666_v37  ;;  %v2580_v37 = vld [vmem:[#allocation8 + $0x118] sm:$0xf0]  ;;  %v2556_v49 = vld [vmem:[#allocation8 + $0xe8] sm:$0xf0]  ;;  %v2530_v54 = vld [vmem:[#allocation8 + $0xa0] sm:$0xf] }
  0xce   :  { %v2772_v39 = vld [vmem:[#allocation8 + $0x298] sm:$0xf0]  ;;  %v2583_v44 = vor.u32 %v3432_v36, %v2580_v37  ;;  %v2722_v58 = vld [vmem:[#allocation8 + $0x220] sm:$0xf]  ;;  %v2506_v4 = vld [vmem:[#allocation8 + $0x70] sm:$0xf] }
  0xcf   :  { %1036 = vmatpush.bf16.msrb.mxu3 %v2739_v10  ;;  %1050 = vmatpush.bf16.msra.mxu0 %v2551_v13  ;;  %v3444_v10 = vld [vmem:[#allocation8 + $0x164] sm:$0xf]  ;;  %v2628_v13 = vld [vmem:[#allocation8 + $0x178] sm:$0xf0]  ;;  %v3417_v5 = vld [vmem:[#allocation8 + $0x84] sm:$0xf0] }
  0xd0   :  { %1064 = vmatpush.bf16.msra.mxu1 %v2743_v14  ;;  %v3492_v14 = vld [vmem:[#allocation8 + $0x2e4] sm:$0xf]  ;;  %v2631_v23 = vor.u32 %v3444_v10, %v2628_v13  ;;  %v2698_v8 = vld [vmem:[#allocation8 + $0x1f0] sm:$0xf]  ;;  %v3465_v9 = vld [vmem:[#allocation8 + $0x204] sm:$0xf0] }
  0xd1   :  { %1021 = vmatpush.bf16.msrb.mxu2 %v2571_v55  ;;  %v2643_v55 = vor.u32 %v3452_v52, %v2642_v50  ;;  %v2823_v24 = vor.u32 %v3492_v14, %v2820_v15  ;;  %v3474_v50 = vld [vmem:[#allocation8 + $0x254] sm:$0xf]  ;;  %v2700_v13 = vld [vmem:[#allocation8 + $0x208] sm:$0xf0]  ;;  %v2507_v14 = vor.u32 %v3417_v5, %v2506_v4  ;;  %v2699_v15 = vor.u32 %v3465_v9, %v2698_v8  ;;  %v3522_v4 = vld [vmem:[#allocation11 + $0xd4] sm:$0xf] }
  0xd2   :  { %v3414_v10 = vld [vmem:[#allocation8 + $0x74] sm:$0xf]  ;;  %v2652_v37 = vld [vmem:[#allocation8 + $0x1a8] sm:$0xf0]  ;;  %v2932_v5 = vld [vmem:[#allocation11 + $0xd8] sm:$0xf0] }
  0xd3   :  { %1037 = vmatpush.bf16.msrb.mxu3 %v2715_v22  ;;  %1051 = vmatpush.bf16.msra.mxu0 %v2527_v25  ;;  %v2794_v22 = vld [vmem:[#allocation8 + $0x2b0] sm:$0xf]  ;;  %v3489_v25 = vld [vmem:[#allocation8 + $0x2c4] sm:$0xf0]  ;;  %v3450_v36 = vld [vmem:[#allocation8 + $0x194] sm:$0xf] }
  0xd4   :  { %1065 = vmatpush.bf16.msra.mxu1 %v2719_v26  ;;  %v3438_v26 = vld [vmem:[#allocation8 + $0x134] sm:$0xf]  ;;  %v2795_v30 = vor.u32 %v3489_v25, %v2794_v22  ;;  %v2674_v22 = vld [vmem:[#allocation8 + $0x1c0] sm:$0xf]  ;;  %v2484_v25 = vld [vmem:[#allocation8 + $0x58] sm:$0xf0] }
  0xd5   :  { %1022 = vmatpush.bf16.msrb.mxu2 %v2547_v6  ;;  %v2922_v8 = vld [vmem:[#allocation11 + $0xc0] sm:$0xf]  ;;  %v2866_v9 = vld [vmem:[#allocation11 + $0x50] sm:$0xf] }
  0xd7   :  { %1038 = vmatpush.bf16.msrb.mxu3 %v2691_v32  ;;  %1052 = vmatpush.bf16.msra.mxu0 %v2503_v33  ;;  %v2607_v32 = vor.u32 %v3438_v26, %v2604_v27  ;;  %v2799_v33 = vor.u32 %v3486_v28, %v2796_v60  ;;  %v3456_v26 = vld [vmem:[#allocation8 + $0x1c4] sm:$0xf]  ;;  %v2676_v27 = vld [vmem:[#allocation8 + $0x1d8] sm:$0xf0] }
  0xd8   :  { %1066 = vmatpush.bf16.msra.mxu1 %v2695_v34  ;;  %v2770_v34 = vld [vmem:[#allocation8 + $0x280] sm:$0xf] }
  0xd9   :  { %1023 = vmatpush.bf16.msrb.mxu2 %v2523_v21  ;;  %v3441_v21 = vld [vmem:[#allocation8 + $0x144] sm:$0xf0]  ;;  %v2771_v41 = vor.u32 %v3483_v35, %v2770_v34  ;;  %v3402_v34 = vld [vmem:[#allocation8 + $0x14] sm:$0xf]  ;;  %v2460_v35 = vld [vmem:[#allocation8 + $0x28] sm:$0xf0] }
  0xda   :  { %v2603_v29 = vor.u32 %v3441_v21, %v2602_v16  ;;  %v2482_v16 = vld [vmem:[#allocation8 + $0x40] sm:$0xf] }
  0xdb   :  { %1039 = vmatpush.bf16.msrb.mxu3 %v2667_v42  ;;  %1053 = vmatpush.bf16.msra.mxu0 %v2479_v43  ;;  %v2554_v42 = vld [vmem:[#allocation8 + $0xd0] sm:$0xf]  ;;  %v3429_v43 = vld [vmem:[#allocation8 + $0xe4] sm:$0xf0] }
  0xdc   :  { %1067 = vmatpush.bf16.msra.mxu1 %v2671_v47  ;;  %v3477_v47 = vld [vmem:[#allocation8 + $0x264] sm:$0xf0]  ;;  %v2555_v52 = vor.u32 %v3429_v43, %v2554_v42 }
  0xdd   :  { %1024 = vmatpush.bf16.msrb.mxu2 %v2499_v31  ;;  %v3435_v31 = vld [vmem:[#allocation8 + $0x114] sm:$0xf0]  ;;  %v2747_v53 = vor.u32 %v3477_v47, %v2746_v46  ;;  %v2938_v46 = vld [vmem:[#allocation11 + $0xe0] sm:$0xf] }
  0xde   :  { %v2579_v40 = vor.u32 %v3435_v31, %v2578_v61  ;;  %v2650_v61 = vld [vmem:[#allocation8 + $0x190] sm:$0xf]  ;;  %v2882_v47 = vld [vmem:[#allocation11 + $0x70] sm:$0xf] }
  0xdf   :  { %1040 = vmatpush.bf16.msrb.mxu3 %v2643_v55  ;;  %1054 = vmatpush.bf16.msra.mxu0 %v2455_v56  ;;  %v3423_v55 = vld [vmem:[#allocation8 + $0xb4] sm:$0xf0]  ;;  %v2559_v56 = vor.u32 %v3426_v48, %v2556_v49 }
  0xe0   :  { %1068 = vmatpush.bf16.msra.mxu1 %v2647_v63  ;;  %v2532_v63 = vld [vmem:[#allocation8 + $0xb8] sm:$0xf0] }
  0xe1   :  { %1025 = vmatpush.bf16.msrb.mxu2 %v2475_v38  ;;  %v3480_v38 = vld [vmem:[#allocation8 + $0x284] sm:$0xf] }
  0xe2   :  { %v2775_v45 = vor.u32 %v3480_v38, %v2772_v39  ;;  %v2946_v38 = vld [vmem:[#allocation11 + $0xf0] sm:$0xf]  ;;  %v3527_v39 = vld [vmem:[#allocation11 + $0xf4] sm:$0xf0] }
  0xe3   :  { %v2947_v48 = vor.u32 %v3527_v39, %v2946_v38  ;;  %v3516_v38 = vld [vmem:[#allocation11 + $0xa4] sm:$0xf]  ;;  %v2908_v39 = vld [vmem:[#allocation11 + $0xa8] sm:$0xf0] }
  0xe5   :  { %1026 = vmatpush.bf16.msrb.mxu2 %v2451_v51  ;;  %v2748_v51 = vld [vmem:[#allocation8 + $0x268] sm:$0xf0] }
  0xe6   :  { %v2751_v57 = vor.u32 %v3474_v50, %v2748_v51  ;;  %v3511_v50 = vld [vmem:[#allocation11 + $0x74] sm:$0xf0]  ;;  %v3510_v51 = vld [vmem:[#allocation11 + $0x74] sm:$0xf] }
 0x130   :  { %v338_v0 = vpop.f32.mrf.mxu0  ;;  %v361_v1 = vpop.f32.mrf.mxu1 }
 0x131   :  { %v339_v2 = vadd.f32 %v338_v0, %v257_v59  ;;  %v362_v3 = vadd.f32 %v361_v1, %v258_v62  ;;  %v3468_v0 = vld [vmem:[#allocation8 + $0x224] sm:$0xf]  ;;  %v2724_v1 = vld [vmem:[#allocation8 + $0x238] sm:$0xf0] }
 0x133   :  { %367 = vst [vmem:[#allocation16] sm:$0xff] %v339_v2 }
 0x134   :  { %368 = vst [vmem:[#allocation16 + $0x8] sm:$0xff] %v362_v3 }
 0x147   :  { %v341_v6 = vpop.f32.mrf.mxu0  ;;  %v364_v7 = vpop.f32.mrf.mxu1 }
 0x148   :  { %v342_v11 = vadd.f32 %v341_v6, %v257_v59  ;;  %v365_v12 = vadd.f32 %v364_v7, %v258_v62  ;;  %v3471_v59 = vld [vmem:[#allocation8 + $0x234] sm:$0xf0]  ;;  %v3420_v62 = vld [vmem:[#allocation8 + $0xa4] sm:$0xf]  ;;  %v2727_v7 = vor.u32 %v3468_v0, %v2724_v1  ;;  %v3509_v0 = vld [vmem:[#allocation11 + $0x64] sm:$0xf0] }
 0x149   :  { %v2535_v6 = vor.u32 %v3420_v62, %v2532_v63  ;;  %v3508_v1 = vld [vmem:[#allocation11 + $0x64] sm:$0xf] }
 0x14a   :  { %369 = vst [vmem:[#allocation16 + $0x18] sm:$0xff] %v342_v11  ;;  %v4038_v17 = vpack.c.bf16 %v342_v11, %v339_v2  ;;  %v4040_v18 = vpack.c.bf16 %v365_v12, %v362_v3  ;;  %v2531_v2 = vor.u32 %v3423_v55, %v2530_v54  ;;  %v2723_v3 = vor.u32 %v3471_v59, %v2722_v58  ;;  %v2508_v11 = vld [vmem:[#allocation8 + $0x88] sm:$0xf0]  ;;  %v2940_v55 = vld [vmem:[#allocation11 + $0xe8] sm:$0xf0] }
 0x14b   :  { %370 = vst [vmem:[#allocation16 + $0x20] sm:$0xff] %v365_v12  ;;  %v3462_v12 = vld [vmem:[#allocation8 + $0x1f4] sm:$0xf]  ;;  %v3524_v54 = vld [vmem:[#allocation11 + $0xe4] sm:$0xf] }
 0x14c   :  { %971 = vmatmul.bf16.vlgmr.msra.gmra.mxu2 %v4038_v17  ;;  %985 = vmatmul.bf16.vlgmr.msra.gmra.mxu3 %v4040_v18  ;;  %v2703_v21 = vor.u32 %v3462_v12, %v2700_v13  ;;  %v2930_v58 = vld [vmem:[#allocation11 + $0xd0] sm:$0xf]  ;;  %v2874_v59 = vld [vmem:[#allocation11 + $0x60] sm:$0xf]  ;;  %v2943_v63 = vor.u32 %v3524_v54, %v2940_v55  ;;  %v3507_v12 = vld [vmem:[#allocation11 + $0x54] sm:$0xf0] }
 0x14d   :  { %999 = vmatmul.bf16.vlgmr.msrb.gmra.mxu0 %v4038_v17  ;;  %1013 = vmatmul.bf16.vlgmr.msrb.gmra.mxu1 %v4040_v18  ;;  %v3506_v13 = vld [vmem:[#allocation11 + $0x54] sm:$0xf]  ;;  %v2890_v54 = vld [vmem:[#allocation11 + $0x80] sm:$0xf]  ;;  %v3513_v55 = vld [vmem:[#allocation11 + $0x84] sm:$0xf0] }
 0x14e   :  { %1075 = vmatpush.bf16.msra.mxu2 %v2627_v19  ;;  %1089 = vmatpush.bf16.msra.mxu3 %v2819_v20  ;;  %v3411_v19 = vld [vmem:[#allocation8 + $0x54] sm:$0xf0]  ;;  %v2511_v20 = vor.u32 %v3414_v10, %v2508_v11  ;;  %v2935_v11 = vor.u32 %v3522_v4, %v2932_v5  ;;  %v3076_v5 = vld [vmem:[#allocation11 + $0x1f8] sm:$0xf0] }
 0x14f   :  { %1103 = vmatpush.bf16.msrb.mxu0 %v2631_v23  ;;  %1117 = vmatpush.bf16.msrb.mxu1 %v2823_v24  ;;  %v3459_v23 = vld [vmem:[#allocation8 + $0x1d4] sm:$0xf0]  ;;  %v3408_v24 = vld [vmem:[#allocation8 + $0x44] sm:$0xf]  ;;  %v2483_v28 = vor.u32 %v3411_v19, %v2482_v16  ;;  %v3520_v16 = vld [vmem:[#allocation11 + $0xc4] sm:$0xf] }
 0x150   :  { %v2675_v60 = vor.u32 %v3459_v23, %v2674_v22  ;;  %v2487_v31 = vor.u32 %v3408_v24, %v2484_v25  ;;  %v2924_v19 = vld [vmem:[#allocation11 + $0xc8] sm:$0xf0]  ;;  %v3505_v24 = vld [vmem:[#allocation11 + $0x44] sm:$0xf0]  ;;  %v3504_v25 = vld [vmem:[#allocation11 + $0x44] sm:$0xf] }
 0x151   :  { %v2927_v23 = vor.u32 %v3520_v16, %v2924_v19  ;;  %v3558_v4 = vld [vmem:[#allocation11 + $0x1f4] sm:$0xf] }
 0x152   :  { %1076 = vmatpush.bf16.msra.mxu2 %v2603_v29  ;;  %1090 = vmatpush.bf16.msra.mxu3 %v2795_v30  ;;  %v2458_v29 = vld [vmem:[#allocation8 + $0x10] sm:$0xf]  ;;  %v3405_v30 = vld [vmem:[#allocation8 + $0x24] sm:$0xf0]  ;;  %v3079_v19 = vor.u32 %v3558_v4, %v3076_v5 }
 0x153   :  { %1104 = vmatpush.bf16.msrb.mxu0 %v2607_v32  ;;  %1118 = vmatpush.bf16.msrb.mxu1 %v2799_v33  ;;  %v2679_v32 = vor.u32 %v3456_v26, %v2676_v27  ;;  %v3453_v33 = vld [vmem:[#allocation8 + $0x1a4] sm:$0xf0]  ;;  %v2459_v42 = vor.u32 %v3405_v30, %v2458_v29  ;;  %v2860_v26 = vld [vmem:[#allocation11 + $0x48] sm:$0xf0]  ;;  %v3519_v27 = vld [vmem:[#allocation11 + $0xb4] sm:$0xf0] }
 0x154   :  { %v2651_v43 = vor.u32 %v3453_v33, %v2650_v61  ;;  %v2863_v30 = vor.u32 %v3504_v25, %v2860_v26  ;;  %v2906_v61 = vld [vmem:[#allocation11 + $0xa0] sm:$0xf]  ;;  %v3548_v4 = vld [vmem:[#allocation11 + $0x1a4] sm:$0xf] }
 0x156   :  { %1077 = vmatpush.bf16.msra.mxu2 %v2579_v40  ;;  %1091 = vmatpush.bf16.msra.mxu3 %v2771_v41  ;;  %v3526_v40 = vld [vmem:[#allocation11 + $0xf4] sm:$0xf]  ;;  %v2948_v41 = vld [vmem:[#allocation11 + $0xf8] sm:$0xf0] }
 0x157   :  { %1105 = vmatpush.bf16.msrb.mxu0 %v2583_v44  ;;  %1119 = vmatpush.bf16.msrb.mxu1 %v2775_v45  ;;  %v2463_v44 = vor.u32 %v3402_v34, %v2460_v35  ;;  %v2655_v45 = vor.u32 %v3450_v36, %v2652_v37  ;;  %v2951_v49 = vor.u32 %v3526_v40, %v2948_v41  ;;  %v3503_v34 = vld [vmem:[#allocation11 + $0x34] sm:$0xf0]  ;;  %v3502_v35 = vld [vmem:[#allocation11 + $0x34] sm:$0xf]  ;;  %v2852_v36 = vld [vmem:[#allocation11 + $0x38] sm:$0xf0] }
 0x158   :  { %v3517_v37 = vld [vmem:[#allocation11 + $0xa4] sm:$0xf0]  ;;  %v2855_v41 = vor.u32 %v3502_v35, %v2852_v36  ;;  %v3060_v35 = vld [vmem:[#allocation11 + $0x1d8] sm:$0xf0] }
 0x15a   :  { %1078 = vmatpush.bf16.msra.mxu2 %v2555_v52  ;;  %1092 = vmatpush.bf16.msra.mxu3 %v2747_v53  ;;  %v2884_v52 = vld [vmem:[#allocation11 + $0x78] sm:$0xf0]  ;;  %v3525_v53 = vld [vmem:[#allocation11 + $0xe4] sm:$0xf0] }
 0x15b   :  { %1106 = vmatpush.bf16.msrb.mxu0 %v2559_v56  ;;  %1120 = vmatpush.bf16.msrb.mxu1 %v2751_v57  ;;  %v2883_v56 = vor.u32 %v3511_v50, %v2882_v47  ;;  %v2887_v57 = vor.u32 %v3510_v51, %v2884_v52  ;;  %v2939_v62 = vor.u32 %v3525_v53, %v2938_v46  ;;  %v3501_v46 = vld [vmem:[#allocation11 + $0x24] sm:$0xf0]  ;;  %v3500_v47 = vld [vmem:[#allocation11 + $0x24] sm:$0xf]  ;;  %v3514_v50 = vld [vmem:[#allocation11 + $0x94] sm:$0xf] }
 0x15c   :  { %1027 = vmatmul.bf16.vlgmr.msrb.gmra.mxu2 %v4038_v17  ;;  %1041 = vmatmul.bf16.vlgmr.msrb.gmra.mxu3 %v4040_v18  ;;  %v2900_v51 = vld [vmem:[#allocation11 + $0x98] sm:$0xf0] }
 0x15d   :  { %1055 = vmatmul.bf16.vlgmr.msra.gmra.mxu0 %v4038_v17  ;;  %1069 = vmatmul.bf16.vlgmr.msra.gmra.mxu1 %v4040_v18 }
 0x15e   :  { %1079 = vmatpush.bf16.msra.mxu2 %v2531_v2  ;;  %1093 = vmatpush.bf16.msra.mxu3 %v2723_v3  ;;  %v2876_v2 = vld [vmem:[#allocation11 + $0x68] sm:$0xf0]  ;;  %v3523_v3 = vld [vmem:[#allocation11 + $0xd4] sm:$0xf0] }
 0x15f   :  { %1107 = vmatpush.bf16.msrb.mxu0 %v2535_v6  ;;  %1121 = vmatpush.bf16.msrb.mxu1 %v2727_v7  ;;  %v2875_v6 = vor.u32 %v3509_v0, %v2874_v59  ;;  %v2879_v7 = vor.u32 %v3508_v1, %v2876_v2  ;;  %v2931_v10 = vor.u32 %v3523_v3, %v2930_v58  ;;  %v3499_v59 = vld [vmem:[#allocation11 + $0x14] sm:$0xf0]  ;;  %v3512_v0 = vld [vmem:[#allocation11 + $0x84] sm:$0xf]  ;;  %v2892_v1 = vld [vmem:[#allocation11 + $0x88] sm:$0xf0] }
 0x160   :  { %v2903_v58 = vor.u32 %v3514_v50, %v2900_v51  ;;  %v3074_v2 = vld [vmem:[#allocation11 + $0x1f0] sm:$0xf]  ;;  %v3559_v3 = vld [vmem:[#allocation11 + $0x1f4] sm:$0xf0]  ;;  %v2996_v50 = vld [vmem:[#allocation11 + $0x158] sm:$0xf0] }
 0x161   :  { %v3075_v16 = vor.u32 %v3559_v3, %v3074_v2  ;;  %v3034_v2 = vld [vmem:[#allocation11 + $0x1a0] sm:$0xf]  ;;  %v3549_v3 = vld [vmem:[#allocation11 + $0x1a4] sm:$0xf0] }
 0x162   :  { %1080 = vmatpush.bf16.msra.mxu2 %v2507_v14  ;;  %1094 = vmatpush.bf16.msra.mxu3 %v2699_v15  ;;  %v2868_v14 = vld [vmem:[#allocation11 + $0x58] sm:$0xf0]  ;;  %v3521_v15 = vld [vmem:[#allocation11 + $0xc4] sm:$0xf0]  ;;  %v3035_v5 = vor.u32 %v3549_v3, %v3034_v2 }
 0x163   :  { %1108 = vmatpush.bf16.msrb.mxu0 %v2511_v20  ;;  %1122 = vmatpush.bf16.msrb.mxu1 %v2703_v21  ;;  %v2914_v20 = vld [vmem:[#allocation11 + $0xb0] sm:$0xf]  ;;  %v2858_v21 = vld [vmem:[#allocation11 + $0x40] sm:$0xf]  ;;  %v2923_v22 = vor.u32 %v3521_v15, %v2922_v8 }
 0x164   :  { %v2859_v29 = vor.u32 %v3505_v24, %v2858_v21  ;;  %v2826_v8 = vld [vmem:[#allocation11] sm:$0xf]  ;;  %v3010_v15 = vld [vmem:[#allocation11 + $0x170] sm:$0xf]  ;;  %v3557_v21 = vld [vmem:[#allocation11 + $0x1e4] sm:$0xf0] }
 0x166   :  { %1081 = vmatpush.bf16.msra.mxu2 %v2483_v28  ;;  %1095 = vmatpush.bf16.msra.mxu3 %v2675_v60  ;;  %v3518_v28 = vld [vmem:[#allocation11 + $0xb4] sm:$0xf]  ;;  %v2916_v60 = vld [vmem:[#allocation11 + $0xb8] sm:$0xf0] }
 0x167   :  { %1109 = vmatpush.bf16.msrb.mxu0 %v2487_v31  ;;  %1123 = vmatpush.bf16.msrb.mxu1 %v2679_v32  ;;  %v2850_v31 = vld [vmem:[#allocation11 + $0x30] sm:$0xf]  ;;  %v2915_v32 = vor.u32 %v3519_v27, %v2914_v20  ;;  %v2919_v33 = vor.u32 %v3518_v28, %v2916_v60  ;;  %v3012_v20 = vld [vmem:[#allocation11 + $0x178] sm:$0xf0]  ;;  %v3002_v60 = vld [vmem:[#allocation11 + $0x160] sm:$0xf] }
 0x168   :  { %v2851_v40 = vor.u32 %v3503_v34, %v2850_v31  ;;  %v3058_v28 = vld [vmem:[#allocation11 + $0x1d0] sm:$0xf]  ;;  %v3540_v31 = vld [vmem:[#allocation11 + $0x164] sm:$0xf]  ;;  %v3554_v34 = vld [vmem:[#allocation11 + $0x1d4] sm:$0xf] }
 0x16a   :  { %1082 = vmatpush.bf16.msra.mxu2 %v2459_v42  ;;  %1096 = vmatpush.bf16.msra.mxu3 %v2651_v43  ;;  %v2898_v42 = vld [vmem:[#allocation11 + $0x90] sm:$0xf]  ;;  %v2842_v43 = vld [vmem:[#allocation11 + $0x20] sm:$0xf] }
 0x16b   :  { %1110 = vmatpush.bf16.msrb.mxu0 %v2463_v44  ;;  %1124 = vmatpush.bf16.msrb.mxu1 %v2655_v45  ;;  %v2907_v44 = vor.u32 %v3517_v37, %v2906_v61  ;;  %v2911_v45 = vor.u32 %v3516_v38, %v2908_v39  ;;  %v2843_v52 = vor.u32 %v3501_v46, %v2842_v43  ;;  %v3541_v61 = vld [vmem:[#allocation11 + $0x164] sm:$0xf0]  ;;  %v2994_v46 = vld [vmem:[#allocation11 + $0x150] sm:$0xf] }
 0x16c   :  { %v3003_v36 = vor.u32 %v3541_v61, %v3002_v60  ;;  %v3063_v39 = vor.u32 %v3554_v34, %v3060_v35  ;;  %v2962_v61 = vld [vmem:[#allocation11 + $0x110] sm:$0xf]  ;;  %v2964_v34 = vld [vmem:[#allocation11 + $0x118] sm:$0xf0] }
 0x16d   :  { %1083 = vmatmul.bf16.vlgmr.msra.gmra.mxu2 %v4038_v17  ;;  %1097 = vmatmul.bf16.vlgmr.msra.gmra.mxu3 %v4040_v18 }
 0x16e   :  { %1351 = vmatpush.bf16.msrb.mxu3 %v2947_v48  ;;  %1111 = vmatmul.bf16.vlgmr.msrb.gmra.mxu0 %v4038_v17  ;;  %v2867_v17 = vor.u32 %v3507_v12, %v2866_v9  ;;  %v2844_v48 = vld [vmem:[#allocation11 + $0x28] sm:$0xf0]  ;;  %v3497_v9 = vld [vmem:[#allocation11 + $0x4] sm:$0xf0]  ;;  %v3066_v12 = vld [vmem:[#allocation11 + $0x1e0] sm:$0xf] }
 0x16f   :  { %1379 = vmatpush.bf16.msra.mxu1 %v2951_v49  ;;  %1337 = vmatpush.bf16.msrb.mxu2 %v2883_v56  ;;  %v3515_v49 = vld [vmem:[#allocation11 + $0x94] sm:$0xf0]  ;;  %v2847_v53 = vor.u32 %v3500_v47, %v2844_v48  ;;  %v2834_v56 = vld [vmem:[#allocation11 + $0x10] sm:$0xf]  ;;  %v2827_v24 = vor.u32 %v3497_v9, %v2826_v8  ;;  %v3538_v48 = vld [vmem:[#allocation11 + $0x154] sm:$0xf] }
 0x170   :  { %1125 = vmatmul.bf16.vlgmr.msrb.gmra.mxu1 %v4040_v18  ;;  %1365 = vmatpush.bf16.msra.mxu0 %v2887_v57  ;;  %v2871_v18 = vor.u32 %v3506_v13, %v2868_v14  ;;  %v2899_v57 = vor.u32 %v3515_v49, %v2898_v42  ;;  %v3496_v13 = vld [vmem:[#allocation11 + $0x4] sm:$0xf]  ;;  %v2828_v14 = vld [vmem:[#allocation11 + $0x8] sm:$0xf0]  ;;  %v3539_v47 = vld [vmem:[#allocation11 + $0x154] sm:$0xf0]  ;;  %v2999_v51 = vor.u32 %v3538_v48, %v2996_v50 }
 0x171   :  { %v2831_v25 = vor.u32 %v3496_v13, %v2828_v14  ;;  %v3552_v42 = vld [vmem:[#allocation11 + $0x1c4] sm:$0xf]  ;;  %v2995_v49 = vor.u32 %v3539_v47, %v2994_v46  ;;  %v2978_v8 = vld [vmem:[#allocation11 + $0x130] sm:$0xf]  ;;  %v3535_v9 = vld [vmem:[#allocation11 + $0x134] sm:$0xf0] }
 0x172   :  { %1352 = vmatpush.bf16.msrb.mxu3 %v2939_v62  ;;  %v3498_v62 = vld [vmem:[#allocation11 + $0x14] sm:$0xf]  ;;  %v3026_v14 = vld [vmem:[#allocation11 + $0x190] sm:$0xf] }
 0x173   :  { %1380 = vmatpush.bf16.msra.mxu1 %v2943_v63  ;;  %1338 = vmatpush.bf16.msrb.mxu2 %v2875_v6  ;;  %v2836_v63 = vld [vmem:[#allocation11 + $0x18] sm:$0xf0]  ;;  %v2835_v6 = vor.u32 %v3499_v59, %v2834_v56  ;;  %v3537_v59 = vld [vmem:[#allocation11 + $0x144] sm:$0xf0] }
 0x174   :  { %1366 = vmatpush.bf16.msra.mxu0 %v2879_v7  ;;  %v2839_v7 = vor.u32 %v3498_v62, %v2836_v63  ;;  %v3044_v56 = vld [vmem:[#allocation11 + $0x1b8] sm:$0xf0]  ;;  %v3536_v63 = vld [vmem:[#allocation11 + $0x144] sm:$0xf] }
 0x176   :  { %1353 = vmatpush.bf16.msrb.mxu3 %v2931_v10  ;;  %v2891_v10 = vor.u32 %v3513_v55, %v2890_v54  ;;  %v3550_v54 = vld [vmem:[#allocation11 + $0x1b4] sm:$0xf] }
 0x177   :  { %1381 = vmatpush.bf16.msra.mxu1 %v2935_v11  ;;  %1339 = vmatpush.bf16.msrb.mxu2 %v2867_v17  ;;  %v2895_v11 = vor.u32 %v3512_v0, %v2892_v1  ;;  %v3543_v17 = vld [vmem:[#allocation11 + $0x174] sm:$0xf0]  ;;  %v2988_v0 = vld [vmem:[#allocation11 + $0x148] sm:$0xf0] }
 0x178   :  { %1367 = vmatpush.bf16.msra.mxu0 %v2871_v18  ;;  %v3542_v18 = vld [vmem:[#allocation11 + $0x174] sm:$0xf]  ;;  %v3011_v26 = vor.u32 %v3543_v17, %v3010_v15  ;;  %v2991_v1 = vor.u32 %v3536_v63, %v2988_v0  ;;  %v3547_v15 = vld [vmem:[#allocation11 + $0x194] sm:$0xf0]  ;;  %v3028_v17 = vld [vmem:[#allocation11 + $0x198] sm:$0xf0] }
 0x179   :  { %v3015_v27 = vor.u32 %v3542_v18, %v3012_v20  ;;  %v2970_v20 = vld [vmem:[#allocation11 + $0x120] sm:$0xf] }
 0x17a   :  { %1354 = vmatpush.bf16.msrb.mxu3 %v2923_v22  ;;  %v3556_v22 = vld [vmem:[#allocation11 + $0x1e4] sm:$0xf] }
 0x17b   :  { %1382 = vmatpush.bf16.msra.mxu1 %v2927_v23  ;;  %1340 = vmatpush.bf16.msrb.mxu2 %v2859_v29  ;;  %v3068_v23 = vld [vmem:[#allocation11 + $0x1e8] sm:$0xf0]  ;;  %v3067_v29 = vor.u32 %v3557_v21, %v3066_v12  ;;  %v2980_v12 = vld [vmem:[#allocation11 + $0x138] sm:$0xf0]  ;;  %v3533_v21 = vld [vmem:[#allocation11 + $0x124] sm:$0xf0] }
 0x17c   :  { %1368 = vmatpush.bf16.msra.mxu0 %v2863_v30  ;;  %v3071_v30 = vor.u32 %v3556_v22, %v3068_v23  ;;  %v3532_v22 = vld [vmem:[#allocation11 + $0x124] sm:$0xf]  ;;  %v2971_v23 = vor.u32 %v3533_v21, %v2970_v20 }
 0x17e   :  { %1355 = vmatpush.bf16.msrb.mxu3 %v2915_v32  ;;  %v3004_v32 = vld [vmem:[#allocation11 + $0x168] sm:$0xf0] }
 0x17f   :  { %1383 = vmatpush.bf16.msra.mxu1 %v2919_v33  ;;  %1341 = vmatpush.bf16.msrb.mxu2 %v2851_v40  ;;  %v3555_v33 = vld [vmem:[#allocation11 + $0x1d4] sm:$0xf0]  ;;  %v3007_v37 = vor.u32 %v3540_v31, %v3004_v32  ;;  %v3050_v40 = vld [vmem:[#allocation11 + $0x1c0] sm:$0xf]  ;;  %v3530_v32 = vld [vmem:[#allocation11 + $0x114] sm:$0xf] }
 0x180   :  { %1369 = vmatpush.bf16.msra.mxu0 %v2855_v41  ;;  %v3059_v38 = vor.u32 %v3555_v33, %v3058_v28  ;;  %v3553_v41 = vld [vmem:[#allocation11 + $0x1c4] sm:$0xf0]  ;;  %v3544_v28 = vld [vmem:[#allocation11 + $0x184] sm:$0xf]  ;;  %v3531_v31 = vld [vmem:[#allocation11 + $0x114] sm:$0xf0]  ;;  %v2967_v35 = vor.u32 %v3530_v32, %v2964_v34 }
 0x181   :  { %v3051_v43 = vor.u32 %v3553_v41, %v3050_v40  ;;  %v2963_v33 = vor.u32 %v3531_v31, %v2962_v61  ;;  %v3573_v32 = vld [vmem:[#allocation11 + $0x264] sm:$0xf0]  ;;  %v3132_v34 = vld [vmem:[#allocation11 + $0x268] sm:$0xf0] }
 0x182   :  { %1356 = vmatpush.bf16.msrb.mxu3 %v2907_v44  ;;  %v3052_v44 = vld [vmem:[#allocation11 + $0x1c8] sm:$0xf0] }
 0x183   :  { %1384 = vmatpush.bf16.msra.mxu1 %v2911_v45  ;;  %1342 = vmatpush.bf16.msrb.mxu2 %v2843_v52  ;;  %v3055_v45 = vor.u32 %v3552_v42, %v3052_v44  ;;  %v3042_v52 = vld [vmem:[#allocation11 + $0x1b0] sm:$0xf]  ;;  %v4054_v42 = vld [vmem:[#allocation10] sm:$0x3f] }
 0x184   :  { %1370 = vmatpush.bf16.msra.mxu0 %v2847_v53  ;;  %v3551_v53 = vld [vmem:[#allocation11 + $0x1b4] sm:$0xf0] }
 0x185   :  { %v3043_v55 = vor.u32 %v3551_v53, %v3042_v52 }
 0x186   :  { %1357 = vmatpush.bf16.msrb.mxu3 %v2899_v57  ;;  %v3047_v57 = vor.u32 %v3550_v54, %v3044_v56 }
 0x187   :  { %1385 = vmatpush.bf16.msra.mxu1 %v2903_v58  ;;  %1343 = vmatpush.bf16.msrb.mxu2 %v2835_v6  ;;  %v2986_v58 = vld [vmem:[#allocation11 + $0x140] sm:$0xf]  ;;  %v3036_v6 = vld [vmem:[#allocation11 + $0x1a8] sm:$0xf0] }
 0x188   :  { %1371 = vmatpush.bf16.msra.mxu0 %v2839_v7  ;;  %v2987_v62 = vor.u32 %v3537_v59, %v2986_v58  ;;  %v3039_v7 = vor.u32 %v3548_v4, %v3036_v6  ;;  %v3590_v58 = vld [vmem:[#allocation11 + $0x2f4] sm:$0xf]  ;;  %v3204_v59 = vld [vmem:[#allocation11 + $0x2f8] sm:$0xf0]  ;;  %v3194_v6 = vld [vmem:[#allocation11 + $0x2e0] sm:$0xf] }
 0x18a   :  { %1358 = vmatpush.bf16.msrb.mxu3 %v2891_v10  ;;  %v3534_v10 = vld [vmem:[#allocation11 + $0x134] sm:$0xf] }
 0x18b   :  { %1386 = vmatpush.bf16.msra.mxu1 %v2895_v11  ;;  %1344 = vmatpush.bf16.msrb.mxu2 %v2827_v24  ;;  %v2979_v11 = vor.u32 %v3535_v9, %v2978_v8  ;;  %v2983_v13 = vor.u32 %v3534_v10, %v2980_v12  ;;  %v2972_v24 = vld [vmem:[#allocation11 + $0x128] sm:$0xf0]  ;;  %v3589_v8 = vld [vmem:[#allocation11 + $0x2e4] sm:$0xf0]  ;;  %v3588_v9 = vld [vmem:[#allocation11 + $0x2e4] sm:$0xf] }
 0x18c   :  { %1372 = vmatpush.bf16.msra.mxu0 %v2831_v25  ;;  %v2975_v25 = vor.u32 %v3532_v22, %v2972_v24  ;;  %v3196_v10 = vld [vmem:[#allocation11 + $0x2e8] sm:$0xf0]  ;;  %v474_v12 = vperm.slane %v4054_v42, 3  ;;  %v3195_v21 = vor.u32 %v3589_v8, %v3194_v6  ;;  %v3587_v24 = vld [vmem:[#allocation11 + $0x2d4] sm:$0xf0] }
 0x18d   :  { %v3199_v22 = vor.u32 %v3588_v9, %v3196_v10  ;;  %v3568_v8 = vld [vmem:[#allocation11 + $0x244] sm:$0xf]  ;;  %v3116_v9 = vld [vmem:[#allocation11 + $0x248] sm:$0xf0] }
 0x18e   :  { %1602 = vmatpush.bf16.msra.mxu3 %v3075_v16  ;;  %v3546_v16 = vld [vmem:[#allocation11 + $0x194] sm:$0xf] }
 0x18f   :  { %1630 = vmatpush.bf16.msrb.mxu1 %v3079_v19  ;;  %1588 = vmatpush.bf16.msra.mxu2 %v3011_v26  ;;  %v3027_v19 = vor.u32 %v3547_v15, %v3026_v14  ;;  %v3031_v18 = vor.u32 %v3546_v16, %v3028_v17  ;;  %v3018_v26 = vld [vmem:[#allocation11 + $0x180] sm:$0xf]  ;;  %v3138_v15 = vld [vmem:[#allocation11 + $0x270] sm:$0xf]  ;;  %v3575_v16 = vld [vmem:[#allocation11 + $0x274] sm:$0xf0] }
 0x190   :  { %1616 = vmatpush.bf16.msrb.mxu0 %v3015_v27  ;;  %v3545_v27 = vld [vmem:[#allocation11 + $0x184] sm:$0xf0]  ;;  %v3140_v17 = vld [vmem:[#allocation11 + $0x278] sm:$0xf0] }
 0x191   :  { %v3019_v60 = vor.u32 %v3545_v27, %v3018_v26  ;;  %v3188_v26 = vld [vmem:[#allocation11 + $0x2d8] sm:$0xf0] }
 0x192   :  { %1603 = vmatpush.bf16.msra.mxu3 %v3067_v29  ;;  %v3020_v29 = vld [vmem:[#allocation11 + $0x188] sm:$0xf0] }
 0x193   :  { %1631 = vmatpush.bf16.msrb.mxu1 %v3071_v30  ;;  %1589 = vmatpush.bf16.msra.mxu2 %v3003_v36  ;;  %v3023_v30 = vor.u32 %v3544_v28, %v3020_v29  ;;  %v2954_v36 = vld [vmem:[#allocation11 + $0x100] sm:$0xf]  ;;  %v3139_v28 = vor.u32 %v3575_v16, %v3138_v15  ;;  %v3581_v15 = vld [vmem:[#allocation11 + $0x2a4] sm:$0xf0]  ;;  %v3580_v16 = vld [vmem:[#allocation11 + $0x2a4] sm:$0xf] }
 0x194   :  { %1617 = vmatpush.bf16.msrb.mxu0 %v3007_v37  ;;  %v3529_v37 = vld [vmem:[#allocation11 + $0x104] sm:$0xf0]  ;;  %v3130_v29 = vld [vmem:[#allocation11 + $0x260] sm:$0xf] }
 0x195   :  { %v2955_v40 = vor.u32 %v3529_v37, %v2954_v36 }
 0x196   :  { %1604 = vmatpush.bf16.msra.mxu3 %v3059_v38  ;;  %v3528_v38 = vld [vmem:[#allocation11 + $0x104] sm:$0xf] }
 0x197   :  { %1632 = vmatpush.bf16.msrb.mxu1 %v3063_v39  ;;  %1590 = vmatpush.bf16.msra.mxu2 %v2995_v49  ;;  %v2956_v39 = vld [vmem:[#allocation11 + $0x108] sm:$0xf0]  ;;  %v471_v49 = vperm.slane %v4054_v42, 0 }
 0x198   :  { %1618 = vmatpush.bf16.msrb.mxu0 %v2999_v51  ;;  %v2959_v41 = vor.u32 %v3528_v38, %v2956_v39  ;;  %v3178_v38 = vld [vmem:[#allocation11 + $0x2c0] sm:$0xf]  ;;  %v3585_v39 = vld [vmem:[#allocation11 + $0x2c4] sm:$0xf0] }
 0x19a   :  { %1605 = vmatpush.bf16.msra.mxu3 %v3051_v43 }
 0x19b   :  { %1633 = vmatpush.bf16.msrb.mxu1 %v3055_v45  ;;  %1591 = vmatpush.bf16.msra.mxu2 %v2987_v62  ;;  %v472_v45 = vperm.slane %v4054_v42, 1 }
 0x19c   :  { %1619 = vmatpush.bf16.msrb.mxu0 %v2991_v1 }
 0x19e   :  { %1606 = vmatpush.bf16.msra.mxu3 %v3043_v55  ;;  %v3202_v55 = vld [vmem:[#allocation11 + $0x2f0] sm:$0xf] }
 0x19f   :  { %1634 = vmatpush.bf16.msrb.mxu1 %v3047_v57  ;;  %1592 = vmatpush.bf16.msra.mxu2 %v2979_v11  ;;  %v3591_v57 = vld [vmem:[#allocation11 + $0x2f4] sm:$0xf0] }
 0x1a0   :  { %1620 = vmatpush.bf16.msrb.mxu0 %v2983_v13  ;;  %v3203_v4 = vor.u32 %v3591_v57, %v3202_v55  ;;  %v3583_v57 = vld [vmem:[#allocation11 + $0x2b4] sm:$0xf0] }
 0x1a2   :  { %1607 = vmatpush.bf16.msra.mxu3 %v3035_v5  ;;  %v3207_v5 = vor.u32 %v3590_v58, %v3204_v59  ;;  %v3582_v59 = vld [vmem:[#allocation11 + $0x2b4] sm:$0xf] }
 0x1a3   :  { %1635 = vmatpush.bf16.msrb.mxu1 %v3039_v7  ;;  %1593 = vmatpush.bf16.msra.mxu2 %v2971_v23  ;;  %v3186_v23 = vld [vmem:[#allocation11 + $0x2d0] sm:$0xf] }
 0x1a4   :  { %1621 = vmatpush.bf16.msrb.mxu0 %v2975_v25  ;;  %v3586_v25 = vld [vmem:[#allocation11 + $0x2d4] sm:$0xf]  ;;  %v3187_v36 = vor.u32 %v3587_v24, %v3186_v23 }
 0x1a5   :  { %v3191_v37 = vor.u32 %v3586_v25, %v3188_v26  ;;  %v3567_v25 = vld [vmem:[#allocation11 + $0x234] sm:$0xf0]  ;;  %v3566_v26 = vld [vmem:[#allocation11 + $0x234] sm:$0xf] }
 0x1a6   :  { %1608 = vmatpush.bf16.msra.mxu3 %v3027_v19  ;;  %v3574_v19 = vld [vmem:[#allocation11 + $0x274] sm:$0xf] }
 0x1a7   :  { %1636 = vmatpush.bf16.msrb.mxu1 %v3031_v18  ;;  %1594 = vmatpush.bf16.msra.mxu2 %v2963_v33  ;;  %v3572_v33 = vld [vmem:[#allocation11 + $0x264] sm:$0xf] }
 0x1a8   :  { %1622 = vmatpush.bf16.msrb.mxu0 %v2967_v35  ;;  %v473_v35 = vperm.slane %v4054_v42, 2 }
 0x1aa   :  { %1609 = vmatpush.bf16.msra.mxu3 %v3019_v60  ;;  %v3143_v60 = vor.u32 %v3574_v19, %v3140_v17  ;;  %v3164_v19 = vld [vmem:[#allocation11 + $0x2a8] sm:$0xf0] }
 0x1ab   :  { %1637 = vmatpush.bf16.msrb.mxu1 %v3023_v30  ;;  %1595 = vmatpush.bf16.msra.mxu2 %v2955_v40  ;;  %v3584_v40 = vld [vmem:[#allocation11 + $0x2c4] sm:$0xf] }
 0x1ac   :  { %1623 = vmatpush.bf16.msrb.mxu0 %v2959_v41  ;;  %v3180_v41 = vld [vmem:[#allocation11 + $0x2c8] sm:$0xf0] }
 0x1ad   :  { %v3183_v55 = vor.u32 %v3584_v40, %v3180_v41  ;;  %v3100_v40 = vld [vmem:[#allocation11 + $0x228] sm:$0xf0] }
 0x1ca   :  { %v1000_v43 = vpop.f32.mrf.mxu0  ;;  %v1014_v44 = vpop.f32.mrf.mxu1 }
 0x1cb   :  { %v1001_v46 = vadd.f32 %v1000_v43, %v472_v45 }
 0x1cd   :  { %v1015_v52 = vadd.f32 %v1014_v44, %v1001_v46  ;;  %v3135_v46 = vor.u32 %v3572_v33, %v3132_v34  ;;  %v3156_v33 = vld [vmem:[#allocation11 + $0x298] sm:$0xf0] }
 0x1cf   :  { %v972_v47 = vpop.f32.mrf.mxu2  ;;  %v986_v48 = vpop.f32.mrf.mxu3  ;;  %v1132_v62 = vmax.f32 %v1015_v52, 0.0  ;;  %v3124_v52 = vld [vmem:[#allocation11 + $0x258] sm:$0xf0] }
 0x1d0   :  { %v973_v54 = vadd.f32 %v972_v47, %v471_v49  ;;  %v3122_v47 = vld [vmem:[#allocation11 + $0x250] sm:$0xf] }
 0x1d2   :  { %v1002_v50 = vpop.f32.mrf.mxu0  ;;  %v1016_v51 = vpop.f32.mrf.mxu1  ;;  %v987_v2 = vadd.f32 %v986_v48, %v973_v54  ;;  %v3179_v54 = vor.u32 %v3585_v39, %v3178_v38  ;;  %v3565_v38 = vld [vmem:[#allocation11 + $0x224] sm:$0xf0]  ;;  %v3564_v39 = vld [vmem:[#allocation11 + $0x224] sm:$0xf] }
 0x1d3   :  { %v1003_v53 = vadd.f32 %v1002_v50, %v472_v45  ;;  %v3131_v45 = vor.u32 %v3573_v32, %v3130_v29  ;;  %v3571_v50 = vld [vmem:[#allocation11 + $0x254] sm:$0xf0]  ;;  %v3578_v32 = vld [vmem:[#allocation11 + $0x294] sm:$0xf] }
 0x1d4   :  { %v1131_v18 = vmax.f32 %v987_v2, 0.0  ;;  %v3569_v2 = vld [vmem:[#allocation11 + $0x244] sm:$0xf0] }
 0x1d5   :  { %v1017_v56 = vadd.f32 %v1016_v51, %v1003_v53  ;;  %v3570_v51 = vld [vmem:[#allocation11 + $0x254] sm:$0xf] }
 0x1d7   :  { %v1138_v63 = vmax.f32 %v1017_v56, 0.0  ;;  %v974_v0 = vpop.f32.mrf.mxu2  ;;  %v988_v1 = vpop.f32.mrf.mxu3  ;;  %v3170_v56 = vld [vmem:[#allocation11 + $0x2b0] sm:$0xf] }
 0x1d8   :  { %v975_v3 = vadd.f32 %v974_v0, %v471_v49  ;;  %v3127_v0 = vor.u32 %v3570_v51, %v3124_v52  ;;  %v3148_v51 = vld [vmem:[#allocation11 + $0x288] sm:$0xf0] }
 0x1d9   :  { %v1144_v7 = vpack.c.bf16 %v1138_v63, %v1132_v62  ;;  %v3172_v62 = vld [vmem:[#allocation11 + $0x2b8] sm:$0xf0]  ;;  %v3123_v63 = vor.u32 %v3571_v50, %v3122_v47  ;;  %v3146_v47 = vld [vmem:[#allocation11 + $0x280] sm:$0xf]  ;;  %v3576_v50 = vld [vmem:[#allocation11 + $0x284] sm:$0xf] }
 0x1da   :  { %v989_v11 = vadd.f32 %v988_v1, %v975_v3  ;;  %v1056_v13 = vpop.f32.mrf.mxu0  ;;  %v1070_v14 = vpop.f32.mrf.mxu1  ;;  %v3114_v1 = vld [vmem:[#allocation11 + $0x240] sm:$0xf] }
 0x1db   :  { %1359 = vmatmul.bf16.vlgmr.msrb.gmra.mxu3 %v1144_v7  ;;  %1387 = vmatmul.bf16.vlgmr.msra.gmra.mxu1 %v1144_v7  ;;  %v1057_v30 = vadd.f32 %v1056_v13, %v474_v12  ;;  %v3171_v7 = vor.u32 %v3583_v57, %v3170_v56  ;;  %v3162_v13 = vld [vmem:[#allocation11 + $0x2a0] sm:$0xf]  ;;  %v3563_v57 = vld [vmem:[#allocation11 + $0x214] sm:$0xf0] }
 0x1dc   :  { %v1137_v20 = vmax.f32 %v989_v11, 0.0  ;;  %1853 = vmatpush.bf16.msrb.mxu3 %v3203_v4  ;;  %1881 = vmatpush.bf16.msra.mxu1 %v3207_v5  ;;  %v3163_v29 = vor.u32 %v3581_v15, %v3162_v13  ;;  %v3606_v15 = vld [vmem:[#allocation14 + $0x70] sm:$0xff] }
 0x1dd   :  { %v1071_v48 = vadd.f32 %v1070_v14, %v1057_v30  ;;  %v3167_v30 = vor.u32 %v3580_v16, %v3164_v19 }
 0x1de   :  { %v1143_v27 = vpack.c.bf16 %v1137_v20, %v1131_v18  ;;  %v476_v18 = vperm.slane %v4054_v42, 5  ;;  %v3115_v20 = vor.u32 %v3569_v2, %v3114_v1  ;;  %v3607_v2 = vld [vmem:[#allocation14 + $0x78] sm:$0xff] }
 0x1df   :  { %v1028_v61 = vpop.f32.mrf.mxu2  ;;  %v1042_v31 = vpop.f32.mrf.mxu3  ;;  %v1134_v3 = vmax.f32 %v1071_v48, 0.0  ;;  %v3577_v48 = vld [vmem:[#allocation11 + $0x284] sm:$0xf0] }
 0x1e0   :  { %1854 = vmatpush.bf16.msrb.mxu3 %v3195_v21  ;;  %1882 = vmatpush.bf16.msra.mxu1 %v3199_v22  ;;  %v1029_v53 = vadd.f32 %v1028_v61, %v473_v35  ;;  %v3119_v21 = vor.u32 %v3568_v8, %v3116_v9  ;;  %v3106_v22 = vld [vmem:[#allocation11 + $0x230] sm:$0xf]  ;;  %v3147_v56 = vor.u32 %v3577_v48, %v3146_v47  ;;  %v3560_v8 = vld [vmem:[#allocation11 + $0x204] sm:$0xf]  ;;  %v3084_v9 = vld [vmem:[#allocation11 + $0x208] sm:$0xf0] }
 0x1e1   :  { %1345 = vmatmul.bf16.vlgmr.msrb.gmra.mxu2 %v1143_v27  ;;  %1373 = vmatmul.bf16.vlgmr.msra.gmra.mxu0 %v1143_v27  ;;  %v3108_v27 = vld [vmem:[#allocation11 + $0x238] sm:$0xf0]  ;;  %v3154_v61 = vld [vmem:[#allocation11 + $0x290] sm:$0xf] }
 0x1e2   :  { %v1058_v43 = vpop.f32.mrf.mxu0  ;;  %v1072_v44 = vpop.f32.mrf.mxu1  ;;  %1839 = vmatpush.bf16.msrb.mxu2 %v3139_v28  ;;  %1867 = vmatpush.bf16.msra.mxu0 %v3143_v60  ;;  %v1043_v10 = vadd.f32 %v1042_v31, %v1029_v53  ;;  %v3579_v31 = vld [vmem:[#allocation11 + $0x294] sm:$0xf0]  ;;  %v3103_v53 = vor.u32 %v3564_v39, %v3100_v40  ;;  %v3620_v39 = vld [vmem:[#allocation14 + $0xe0] sm:$0xff]  ;;  %v3593_v40 = vld [vmem:[#allocation14 + $0x8] sm:$0xff] }
 0x1e3   :  { %v1059_v49 = vadd.f32 %v1058_v43, %v474_v12  ;;  %v3175_v12 = vor.u32 %v3582_v59, %v3172_v62  ;;  %v3092_v59 = vld [vmem:[#allocation11 + $0x218] sm:$0xf0] }
 0x1e4   :  { %1855 = vmatpush.bf16.msrb.mxu3 %v3187_v36  ;;  %1883 = vmatpush.bf16.msra.mxu1 %v3191_v37  ;;  %v1133_v28 = vmax.f32 %v1043_v10, 0.0  ;;  %v3111_v36 = vor.u32 %v3566_v26, %v3108_v27  ;;  %v3098_v37 = vld [vmem:[#allocation11 + $0x220] sm:$0xf]  ;;  %v3598_v26 = vld [vmem:[#allocation14 + $0x30] sm:$0xff]  ;;  %v3604_v27 = vld [vmem:[#allocation14 + $0x60] sm:$0xff] }
 0x1e5   :  { %v1073_v58 = vadd.f32 %v1072_v44, %v1059_v49  ;;  %v475_v49 = vperm.slane %v4054_v42, 4  ;;  %v3099_v52 = vor.u32 %v3565_v38, %v3098_v37  ;;  %v3614_v37 = vld [vmem:[#allocation14 + $0xb0] sm:$0xff]  ;;  %v3600_v38 = vld [vmem:[#allocation14 + $0x40] sm:$0xff] }
 0x1e6   :  { %1840 = vmatpush.bf16.msrb.mxu2 %v3131_v45  ;;  %1868 = vmatpush.bf16.msra.mxu0 %v3135_v46  ;;  %v3155_v45 = vor.u32 %v3579_v31, %v3154_v61  ;;  %v3159_v46 = vor.u32 %v3578_v32, %v3156_v33  ;;  %v3602_v61 = vld [vmem:[#allocation14 + $0x50] sm:$0xff]  ;;  %v3595_v32 = vld [vmem:[#allocation14 + $0x18] sm:$0xff] }
 0x1e7   :  { %v1140_v4 = vmax.f32 %v1073_v58, 0.0  ;;  %v1030_v5 = vpop.f32.mrf.mxu2  ;;  %v1044_v6 = vpop.f32.mrf.mxu3  ;;  %v3562_v58 = vld [vmem:[#allocation11 + $0x214] sm:$0xf]  ;;  %v3615_v33 = vld [vmem:[#allocation14 + $0xb8] sm:$0xff] }
 0x1e8   :  { %v1031_v11 = vadd.f32 %v1030_v5, %v473_v35  ;;  %1856 = vmatpush.bf16.msrb.mxu3 %v3179_v54  ;;  %1884 = vmatpush.bf16.msra.mxu1 %v3183_v55  ;;  %v3107_v35 = vor.u32 %v3567_v25, %v3106_v22  ;;  %v3090_v54 = vld [vmem:[#allocation11 + $0x210] sm:$0xf]  ;;  %v3095_v5 = vor.u32 %v3562_v58, %v3092_v59  ;;  %v3622_v31 = vld [vmem:[#allocation14 + $0xf0] sm:$0xff] }
 0x1e9   :  { %v1394_v14 = vpack.c.bf16 %v1140_v4, %v1134_v3  ;;  %v3091_v4 = vor.u32 %v3563_v57, %v3090_v54  ;;  %v3605_v25 = vld [vmem:[#allocation14 + $0x68] sm:$0xff]  ;;  %v3618_v47 = vld [vmem:[#allocation14 + $0xd0] sm:$0xff]  ;;  %v3636_v57 = vld [vmem:[#allocation14 + $0x160] sm:$0xff] }
 0x1ea   :  { %v1045_v17 = vadd.f32 %v1044_v6, %v1031_v11  ;;  %1841 = vmatpush.bf16.msrb.mxu2 %v3123_v63  ;;  %1869 = vmatpush.bf16.msra.mxu0 %v3127_v0  ;;  %v3151_v0 = vor.u32 %v3576_v50, %v3148_v51  ;;  %v3082_v6 = vld [vmem:[#allocation11 + $0x200] sm:$0xf]  ;;  %v3638_v48 = vld [vmem:[#allocation14 + $0x170] sm:$0xff]  ;;  %v3617_v51 = vld [vmem:[#allocation14 + $0xc8] sm:$0xff] }
 0x1eb   :  { %v1112_v23 = vpop.f32.mrf.mxu0  ;;  %1610 = vmatmul.bf16.vlgmr.msra.gmra.mxu3 %v1394_v14  ;;  %1638 = vmatmul.bf16.vlgmr.msrb.gmra.mxu1 %v1394_v14  ;;  %v3631_v50 = vld [vmem:[#allocation14 + $0x138] sm:$0xff]  ;;  %v3610_v54 = vld [vmem:[#allocation14 + $0x90] sm:$0xff]  ;;  %v3609_v58 = vld [vmem:[#allocation14 + $0x88] sm:$0xff] }
 0x1ec   :  { %v1139_v60 = vmax.f32 %v1045_v17, 0.0  ;;  %1857 = vmatpush.bf16.msrb.mxu3 %v3171_v7  ;;  %1885 = vmatpush.bf16.msra.mxu1 %v3175_v12  ;;  %v1113_v41 = vadd.f32 %v1112_v23, %v476_v18  ;;  %v3561_v7 = vld [vmem:[#allocation11 + $0x204] sm:$0xf0]  ;;  %v3629_v59 = vld [vmem:[#allocation14 + $0x128] sm:$0xff] }
 0x1ed   :  { %v1126_v24 = vpop.f32.mrf.mxu1  ;;  %v3083_v17 = vor.u32 %v3561_v7, %v3082_v6  ;;  %v3634_v6 = vld [vmem:[#allocation14 + $0x150] sm:$0xff] }
 0x1ee   :  { %v1393_v34 = vpack.c.bf16 %v1139_v60, %v1133_v28  ;;  %1842 = vmatpush.bf16.msrb.mxu2 %v3115_v20  ;;  %1870 = vmatpush.bf16.msra.mxu0 %v3119_v21  ;;  %v1127_v62 = vadd.f32 %v1126_v24, %v1113_v41  ;;  %v3599_v21 = vld [vmem:[#allocation14 + $0x38] sm:$0xff]  ;;  %v3597_v28 = vld [vmem:[#allocation14 + $0x28] sm:$0xff] }
 0x1ef   :  { %v3603_v60 = vld [vmem:[#allocation14 + $0x58] sm:$0xff]  ;;  %v3613_v41 = vld [vmem:[#allocation14 + $0xa8] sm:$0xff] }
 0x1f0   :  { %v1084_v43 = vpop.f32.mrf.mxu2  ;;  %v1098_v44 = vpop.f32.mrf.mxu3  ;;  %1858 = vmatpush.bf16.msrb.mxu3 %v3163_v29  ;;  %1886 = vmatpush.bf16.msra.mxu1 %v3167_v30  ;;  %v1136_v10 = vmax.f32 %v1127_v62, 0.0  ;;  %v3623_v29 = vld [vmem:[#allocation14 + $0xf8] sm:$0xff]  ;;  %v3596_v30 = vld [vmem:[#allocation14 + $0x20] sm:$0xff] }
 0x1f1   :  { %1596 = vmatmul.bf16.vlgmr.msra.gmra.mxu2 %v1393_v34  ;;  %1624 = vmatmul.bf16.vlgmr.msrb.gmra.mxu0 %v1393_v34  ;;  %v1085_v42 = vadd.f32 %v1084_v43, %v475_v49  ;;  %v3601_v34 = vld [vmem:[#allocation14 + $0x48] sm:$0xff]  ;;  %v3619_v43 = vld [vmem:[#allocation14 + $0xd8] sm:$0xff] }
 0x1f2   :  { %1843 = vmatpush.bf16.msrb.mxu2 %v3107_v35  ;;  %1871 = vmatpush.bf16.msra.mxu0 %v3111_v36  ;;  %v3621_v35 = vld [vmem:[#allocation14 + $0xe8] sm:$0xff]  ;;  %v3594_v36 = vld [vmem:[#allocation14 + $0x10] sm:$0xff] }
 0x1f3   :  { %v1114_v55 = vpop.f32.mrf.mxu0  ;;  %v1099_v13 = vadd.f32 %v1098_v44, %v1085_v42  ;;  %v3639_v44 = vld [vmem:[#allocation14 + $0x178] sm:$0xff] }
 0x1f4   :  { %v1115_v63 = vadd.f32 %v1114_v55, %v476_v18  ;;  %1859 = vmatpush.bf16.msrb.mxu3 %v3155_v45  ;;  %1887 = vmatpush.bf16.msra.mxu1 %v3159_v46  ;;  %v3087_v18 = vor.u32 %v3560_v8, %v3084_v9  ;;  %v3592_v45 = vld [vmem:[#allocation14] sm:$0xff]  ;;  %v3630_v55 = vld [vmem:[#allocation14 + $0x130] sm:$0xff]  ;;  %v4062_v42 = vld [vmem:[#allocation13] sm:$0x3f] }
 0x1f5   :  { %v1128_v1 = vpop.f32.mrf.mxu1  ;;  %v1135_v22 = vmax.f32 %v1099_v13, 0.0  ;;  %v3612_v46 = vld [vmem:[#allocation14 + $0xa0] sm:$0xff]  ;;  %v3627_v8 = vld [vmem:[#allocation14 + $0x118] sm:$0xff]  ;;  %v3633_v13 = vld [vmem:[#allocation14 + $0x148] sm:$0xff] }
 0x1f6   :  { %v1129_v3 = vadd.f32 %v1128_v1, %v1115_v63  ;;  %1844 = vmatpush.bf16.msrb.mxu2 %v3099_v52  ;;  %1872 = vmatpush.bf16.msra.mxu0 %v3103_v53  ;;  %v3637_v52 = vld [vmem:[#allocation14 + $0x168] sm:$0xff] }
 0x1f8   :  { %v1142_v11 = vmax.f32 %v1129_v3, 0.0  ;;  %v1086_v12 = vpop.f32.mrf.mxu2  ;;  %1860 = vmatpush.bf16.msrb.mxu3 %v3147_v56  ;;  %1888 = vmatpush.bf16.msra.mxu1 %v3151_v0  ;;  %v1100_v19 = vpop.f32.mrf.mxu3  ;;  %v3616_v56 = vld [vmem:[#allocation14 + $0xc0] sm:$0xff]  ;;  %v3635_v0 = vld [vmem:[#allocation14 + $0x158] sm:$0xff] }
 0x1f9   :  { %v1087_v14 = vadd.f32 %v1086_v12, %v475_v49  ;;  %v3611_v49 = vld [vmem:[#allocation14 + $0x98] sm:$0xff]  ;;  %v3628_v3 = vld [vmem:[#allocation14 + $0x120] sm:$0xff] }
 0x1fa   :  { %v1645_v16 = vpack.c.bf16 %v1142_v11, %v1136_v10  ;;  %1845 = vmatpush.bf16.msrb.mxu2 %v3091_v4  ;;  %1873 = vmatpush.bf16.msra.mxu0 %v3095_v5  ;;  %v1898_v5 = vperm.slane %v4062_v42, 1 }
 0x1fb   :  { %v1101_v20 = vadd.f32 %v1100_v19, %v1087_v14 }
 0x1fc   :  { %2341 = vmatpush.bf16.msra.mxu3 %v3607_v2  ;;  %1889 = vmatmul.bf16.vlgmr.msra.gmra.mxu1 %v1645_v16  ;;  %v3608_v2 = vld [vmem:[#allocation14 + $0x80] sm:$0xff] }
 0x1fd   :  { %1861 = vmatmul.bf16.vlgmr.msrb.gmra.mxu3 %v1645_v16  ;;  %v1141_v23 = vmax.f32 %v1101_v20, 0.0  ;;  %2369 = vmatpush.bf16.msrb.mxu1 %v3623_v29  ;;  %v1897_v16 = vperm.slane %v4062_v42, 0 }
 0x1fe   :  { %1846 = vmatpush.bf16.msrb.mxu2 %v3083_v17  ;;  %1874 = vmatpush.bf16.msra.mxu0 %v3087_v18  ;;  %v3626_v17 = vld [vmem:[#allocation14 + $0x110] sm:$0xff] }
 0x1ff   :  { %v1644_v24 = vpack.c.bf16 %v1141_v23, %v1135_v22 }
 0x200   :  { %2342 = vmatpush.bf16.msra.mxu3 %v3606_v15 }
 0x201   :  { %1847 = vmatmul.bf16.vlgmr.msrb.gmra.mxu2 %v1644_v24  ;;  %1875 = vmatmul.bf16.vlgmr.msra.gmra.mxu0 %v1644_v24 }
 0x202   :  { %2327 = vmatpush.bf16.msra.mxu2 %v3599_v21  ;;  %2370 = vmatpush.bf16.msrb.mxu1 %v3622_v31  ;;  %v3632_v21 = vld [vmem:[#allocation14 + $0x140] sm:$0xff] }
 0x203   :  { %2355 = vmatpush.bf16.msrb.mxu0 %v3615_v33 }
 0x204   :  { %2343 = vmatpush.bf16.msra.mxu3 %v3605_v25 }
 0x206   :  { %2328 = vmatpush.bf16.msra.mxu2 %v3598_v26  ;;  %2371 = vmatpush.bf16.msrb.mxu1 %v3621_v35  ;;  %v3625_v26 = vld [vmem:[#allocation14 + $0x108] sm:$0xff] }
 0x207   :  { %2356 = vmatpush.bf16.msrb.mxu0 %v3614_v37 }
 0x208   :  { %2344 = vmatpush.bf16.msra.mxu3 %v3604_v27 }
 0x20a   :  { %2329 = vmatpush.bf16.msra.mxu2 %v3597_v28  ;;  %2372 = vmatpush.bf16.msrb.mxu1 %v3620_v39 }
 0x20b   :  { %2357 = vmatpush.bf16.msrb.mxu0 %v3613_v41  ;;  %v1899_v41 = vperm.slane %v4062_v42, 2 }
 0x20c   :  { %2345 = vmatpush.bf16.msra.mxu3 %v3603_v60 }
 0x20e   :  { %2330 = vmatpush.bf16.msra.mxu2 %v3596_v30  ;;  %2373 = vmatpush.bf16.msrb.mxu1 %v3619_v43 }
 0x20f   :  { %2358 = vmatpush.bf16.msrb.mxu0 %v3612_v46 }
 0x210   :  { %2346 = vmatpush.bf16.msra.mxu3 %v3602_v61  ;;  %v3624_v61 = vld [vmem:[#allocation14 + $0x100] sm:$0xff] }
 0x212   :  { %2331 = vmatpush.bf16.msra.mxu2 %v3595_v32  ;;  %2374 = vmatpush.bf16.msrb.mxu1 %v3618_v47 }
 0x213   :  { %2359 = vmatpush.bf16.msrb.mxu0 %v3611_v49 }
 0x214   :  { %2347 = vmatpush.bf16.msra.mxu3 %v3601_v34  ;;  %v1900_v34 = vperm.slane %v4062_v42, 3 }
 0x216   :  { %2332 = vmatpush.bf16.msra.mxu2 %v3594_v36  ;;  %2375 = vmatpush.bf16.msrb.mxu1 %v3617_v51 }
 0x217   :  { %2360 = vmatpush.bf16.msrb.mxu0 %v3610_v54 }
 0x218   :  { %2348 = vmatpush.bf16.msra.mxu3 %v3600_v38 }
 0x21a   :  { %2333 = vmatpush.bf16.msra.mxu2 %v3593_v40  ;;  %2376 = vmatpush.bf16.msrb.mxu1 %v3616_v56 }
 0x21b   :  { %2361 = vmatpush.bf16.msrb.mxu0 %v3609_v58  ;;  %v1902_v58 = vperm.slane %v4062_v42, 5 }
 0x21c   :  { %2397 = vmatpush.bf16.msrb.mxu3 %v3639_v44 }
 0x21e   :  { %2334 = vmatpush.bf16.msra.mxu2 %v3592_v45 }
 0x21f   :  { %2362 = vmatpush.bf16.msrb.mxu0 %v3608_v2 }
 0x220   :  { %2398 = vmatpush.bf16.msrb.mxu3 %v3638_v48 }
 0x222   :  { %2383 = vmatpush.bf16.msrb.mxu2 %v3631_v50 }
 0x224   :  { %2399 = vmatpush.bf16.msrb.mxu3 %v3637_v52 }
 0x226   :  { %2384 = vmatpush.bf16.msrb.mxu2 %v3630_v55 }
 0x228   :  { %2400 = vmatpush.bf16.msrb.mxu3 %v3636_v57 }
 0x22a   :  { %2385 = vmatpush.bf16.msrb.mxu2 %v3629_v59 }
 0x22c   :  { %2401 = vmatpush.bf16.msrb.mxu3 %v3635_v0 }
 0x22e   :  { %2386 = vmatpush.bf16.msrb.mxu2 %v3628_v3  ;;  %v1901_v3 = vperm.slane %v4062_v42, 4  ;;  %v3658_v42 = vld [vmem:[%s4087_s8] ss:$0 sm:$0xff]  ;;  %s3906_s8 = smov [#allocation16]  }
 0x22f   :  { %s2417_s30 = sshll.u32 %s3906_s8, 4  ;;  %s2418_s30 = int_to_ptr.vmem [resolvable:$true] %s2417_s30 }
 0x230   :  { %2402 = vmatpush.bf16.msrb.mxu3 %v3634_v6 }
 0x232   :  { %2387 = vmatpush.bf16.msrb.mxu2 %v3627_v8 }
 0x234   :  { %2403 = vmatpush.bf16.msrb.mxu3 %v3633_v13 }
 0x236   :  { %2388 = vmatpush.bf16.msrb.mxu2 %v3626_v17 }
 0x238   :  { %2404 = vmatpush.bf16.msrb.mxu3 %v3632_v21 }
 0x23a   :  { %2389 = vmatpush.bf16.msrb.mxu2 %v3625_v26 }
 0x23e   :  { %2390 = vmatpush.bf16.msrb.mxu2 %v3624_v61 }
 0x258   :  { %v1388_v53 = vpop.f32.mrf.mxu1 }
 0x25e   :  { %v1360_v62 = vpop.f32.mrf.mxu3  ;;  %v1374_v63 = vpop.f32.mrf.mxu0 }
 0x25f   :  { %v1389_v4 = vadd.f32 %v1388_v53, %v1374_v63 }
 0x260   :  { %v1390_v1 = vpop.f32.mrf.mxu1 }
 0x261   :  { %v1910_v11 = vadd.f32 %v1898_v5, %v1389_v4 }
 0x263   :  { %v1922_v18 = vmax.f32 %v1910_v11, 0.0 }
 0x264   :  { %v1346_v7 = vpop.f32.mrf.mxu2 }
 0x265   :  { %v1361_v15 = vadd.f32 %v1360_v62, %v1346_v7 }
 0x266   :  { %v1362_v9 = vpop.f32.mrf.mxu3  ;;  %v1376_v10 = vpop.f32.mrf.mxu0 }
 0x267   :  { %v1391_v12 = vadd.f32 %v1390_v1, %v1376_v10  ;;  %v1909_v23 = vadd.f32 %v1897_v16, %v1361_v15 }
 0x268   :  { %v1639_v14 = vpop.f32.mrf.mxu1 }
 0x269   :  { %v1916_v19 = vadd.f32 %v1898_v5, %v1391_v12  ;;  %v1921_v29 = vmax.f32 %v1909_v23, 0.0 }
 0x26b   :  { %v1928_v20 = vmax.f32 %v1916_v19, 0.0 }
 0x26c   :  { %v1348_v22 = vpop.f32.mrf.mxu2 }
 0x26d   :  { %v1934_v24 = vpack.c.bf16 %v1928_v20, %v1922_v18  ;;  %v1363_v25 = vadd.f32 %v1362_v9, %v1348_v22 }
 0x26e   :  { %v1611_v27 = vpop.f32.mrf.mxu3  ;;  %v1625_v28 = vpop.f32.mrf.mxu0 }
 0x26f   :  { %v1915_v60 = vadd.f32 %v1897_v16, %v1363_v25  ;;  %2349 = vmatmul.bf16.vlgmr.msra.gmra.mxu3 %v1934_v24  ;;  %v1640_v33 = vadd.f32 %v1639_v14, %v1625_v28 }
 0x270   :  { %v1641_v31 = vpop.f32.mrf.mxu1 }
 0x271   :  { %v1927_v30 = vmax.f32 %v1915_v60, 0.0  ;;  %v1912_v37 = vadd.f32 %v1900_v34, %v1640_v33 }
 0x273   :  { %v1933_v32 = vpack.c.bf16 %v1927_v30, %v1921_v29  ;;  %v1924_v44 = vmax.f32 %v1912_v37, 0.0 }
 0x274   :  { %v1597_v35 = vpop.f32.mrf.mxu2 }
 0x275   :  { %2335 = vmatmul.bf16.vlgmr.msra.gmra.mxu2 %v1933_v32  ;;  %v1612_v40 = vadd.f32 %v1611_v27, %v1597_v35 }
 0x276   :  { %v1627_v36 = vpop.f32.mrf.mxu0  ;;  %v1613_v39 = vpop.f32.mrf.mxu3 }
 0x277   :  { %v1642_v38 = vadd.f32 %v1641_v31, %v1627_v36  ;;  %v1911_v48 = vadd.f32 %v1899_v41, %v1612_v40 }
 0x279   :  { %v1918_v43 = vadd.f32 %v1900_v34, %v1642_v38  ;;  %v1890_v46 = vpop.f32.mrf.mxu1  ;;  %v1923_v53 = vmax.f32 %v1911_v48, 0.0 }
 0x27b   :  { %v1930_v45 = vmax.f32 %v1918_v43, 0.0 }
 0x27c   :  { %v1599_v47 = vpop.f32.mrf.mxu2 }
 0x27d   :  { %v1936_v49 = vpack.c.bf16 %v1930_v45, %v1924_v44  ;;  %v1614_v50 = vadd.f32 %v1613_v39, %v1599_v47 }
 0x27e   :  { %v1876_v51 = vpop.f32.mrf.mxu0 }
 0x27f   :  { %v1917_v52 = vadd.f32 %v1899_v41, %v1614_v50  ;;  %2377 = vmatmul.bf16.vlgmr.msrb.gmra.mxu1 %v1936_v49  ;;  %v1891_v57 = vadd.f32 %v1890_v46, %v1876_v51 }
 0x280   :  { %v1862_v55 = vpop.f32.mrf.mxu3 }
 0x281   :  { %v1929_v54 = vmax.f32 %v1917_v52, 0.0  ;;  %v1892_v62 = vpop.f32.mrf.mxu1  ;;  %v1914_v0 = vadd.f32 %v1902_v58, %v1891_v57 }
 0x283   :  { %v1935_v56 = vpack.c.bf16 %v1929_v54, %v1923_v53  ;;  %v1926_v5 = vmax.f32 %v1914_v0, 0.0 }
 0x284   :  { %v1848_v59 = vpop.f32.mrf.mxu2 }
 0x285   :  { %2363 = vmatmul.bf16.vlgmr.msrb.gmra.mxu0 %v1935_v56  ;;  %v1863_v2 = vadd.f32 %v1862_v55, %v1848_v59 }
 0x286   :  { %v1878_v63 = vpop.f32.mrf.mxu0 }
 0x287   :  { %v1893_v1 = vadd.f32 %v1892_v62, %v1878_v63  ;;  %v1913_v9 = vadd.f32 %v1901_v3, %v1863_v2 }
 0x288   :  { %v1864_v7 = vpop.f32.mrf.mxu3 }
 0x289   :  { %v1920_v4 = vadd.f32 %v1902_v58, %v1893_v1  ;;  %v1925_v13 = vmax.f32 %v1913_v9, 0.0 }
 0x28b   :  { %v1932_v6 = vmax.f32 %v1920_v4, 0.0 }
 0x28c   :  { %v1850_v8 = vpop.f32.mrf.mxu2 }
 0x28d   :  { %v1938_v10 = vpack.c.bf16 %v1932_v6, %v1926_v5  ;;  %v1865_v11 = vadd.f32 %v1864_v7, %v1850_v8 }
 0x28f   :  { %v1919_v12 = vadd.f32 %v1901_v3, %v1865_v11  ;;  %2405 = vmatmul.bf16.vlgmr.msrb.gmra.mxu3 %v1938_v10 }
 0x291   :  { %v1931_v14 = vmax.f32 %v1919_v12, 0.0 }
 0x293   :  { %v1937_v15 = vpack.c.bf16 %v1931_v14, %v1925_v13 }
 0x295   :  { %2391 = vmatmul.bf16.vlgmr.msrb.gmra.mxu2 %v1937_v15 }
 0x2f2   :  { %v2350_v16 = vpop.f32.mrf.mxu3 }
 0x2f8   :  { %v2336_v19 = vpop.f32.mrf.mxu2 }
 0x2f9   :  { %v2337_v17 = vadd.f32 %v3658_v42, %v2336_v19 }
 0x2fa   :  { %v2352_v20 = vpop.f32.mrf.mxu3 }
 0x2fb   :  { %v2351_v22 = vadd.f32 %v2350_v16, %v2337_v17 }
 0x2fc   :  { %v2378_v24 = vpop.f32.mrf.mxu1 }
 0x300   :  { %v2338_v21 = vpop.f32.mrf.mxu2 }
 0x301   :  { %v2339_v25 = vadd.f32 %v3658_v42, %v2338_v21 }
 0x302   :  { %v2364_v18 = vpop.f32.mrf.mxu0 }
 0x303   :  { %v2365_v23 = vadd.f32 %v2364_v18, %v2351_v22  ;;  %v2353_v29 = vadd.f32 %v2352_v20, %v2339_v25 }
 0x304   :  { %v2380_v32 = vpop.f32.mrf.mxu1 }
 0x305   :  { %v2379_v27 = vadd.f32 %v2378_v24, %v2365_v23 }
 0x30a   :  { %v2366_v26 = vpop.f32.mrf.mxu0 }
 0x30b   :  { %v2367_v61 = vadd.f32 %v2366_v26, %v2353_v29 }
 0x30d   :  { %v2381_v33 = vadd.f32 %v2380_v32, %v2367_v61 }
 0x312   :  { %v2406_v28 = vpop.f32.mrf.mxu3 }
 0x318   :  { %v2392_v60 = vpop.f32.mrf.mxu2 }
 0x319   :  { %v2393_v30 = vadd.f32 %v2392_v60, %v2379_v27 }
 0x31a   :  { %v2408_v36 = vpop.f32.mrf.mxu3 }
 0x31b   :  { %v2407_v31 = vadd.f32 %v2406_v28, %v2393_v30 }
 0x31d   :  { %2411 = vst [vmem:[#allocation16 + $0x10] sm:$0xff] %v2407_v31 }
 0x320   :  { %v2394_v34 = vpop.f32.mrf.mxu2 }
 0x321   :  { %v2395_v35 = vadd.f32 %v2394_v34, %v2381_v33 }
 0x323   :  { %v2409_v37 = vadd.f32 %v2408_v36, %v2395_v35 }
 0x325   :  { %2412 = vst [vmem:[#allocation16 + $0x28] sm:$0xff] %v2409_v37 }
 0x326   :  { %2425 = dma.vmem_to_hbm [thread:$0]  %s2418_s30, 768, %s2420_s12, [#allocation4], %s3891_s19, %s3891_s19, %s3892_s20  }
 0x327   :  { %3887 = dma.done.wait [#allocation4], 768  }
 0x328   :  { %3888 = vsyncadd [#allocation4], 4294966528 }
 0x329   :  { %2430 = vsyncpa [#allocation3], 1 }
 0x32a   :  { %2431 = vsyncpa [#allocation6], 1 }
 0x32b   :  { %2432 = vsyncpa [#allocation9], 1 }
 0x32c   :  { %2433 = vsyncpa [#allocation12], 1 }
 0x32d   :  { %2434 = vsyncpa [#allocation15], 1 }
 0x32e   :  { %2435 = vsyncpa [#allocation4], 1 }

</bundles_post_ra>
